<compile_context>
chip_gen: v7x
topology: tpu7x:2x2x1
jax: 0.10.0
libtpu: 0.0.40
codegen_flags: <defaults>
</compile_context>

<pallas_src>
import functools
import math

import jax
import jax.numpy as jnp
from jax.experimental import pallas as pl
from jax.experimental.pallas import tpu as pltpu

F32 = jnp.float32
BF16 = jnp.bfloat16


# ---------------------------------------------------------------------------
# Pallas kernels
# ---------------------------------------------------------------------------
def _matmul_bn_kernel(a_ref, w_ref, b_ref, g_ref, beta_ref, o_ref, *, eps):
    """ConvTranspose #1 (as im2col matmul) fused with BatchNorm2d (batch stats)."""
    acc = jnp.dot(a_ref[...].astype(BF16), w_ref[...],
                  preferred_element_type=jnp.float32)          # (M, Cout) f32
    h = acc + b_ref[...]
    # Training-mode BatchNorm: per-channel mean / biased variance over (B,H,W),
    # which is exactly the M (row) axis here since batch is folded into M.
    mean = jnp.mean(h, axis=0, keepdims=True)                  # (1, Cout)
    d = h - mean
    var = jnp.mean(d * d, axis=0, keepdims=True)               # biased variance
    y = d * jax.lax.rsqrt(var + eps) * g_ref[...] + beta_ref[...]
    o_ref[...] = y.astype(o_ref.dtype)


def _matmul_elu_kernel(a_ref, w_ref, b_ref, o_ref):
    """ConvTranspose #2 (as im2col matmul) fused with ELU (alpha=1)."""
    acc = jnp.dot(a_ref[...].astype(BF16), w_ref[...],
                  preferred_element_type=jnp.float32)
    h = acc + b_ref[...]
    o_ref[...] = jnp.where(h > 0, h, jnp.exp(h) - 1.0).astype(o_ref.dtype)


# ---------------------------------------------------------------------------
# Pallas wrappers
# ---------------------------------------------------------------------------
def conv_t_bn(patches, w_flat, bias, gamma, beta, eps=1e-5):
    """patches: (M, 9*Cin) f32, w_flat: (9*Cin, Cout) f32. Returns (M, Cout) f32."""
    M, K = patches.shape
    N = w_flat.shape[1]
    kern = functools.partial(_matmul_bn_kernel, eps=eps)
    # Single invocation: the BatchNorm reduction needs every row (whole batch)
    # resident, and the whole problem is only a few hundred KiB of VMEM.
    return pl.pallas_call(
        kern,
        out_shape=jax.ShapeDtypeStruct((M, N), F32),
    )(patches, w_flat.astype(BF16), bias.reshape(1, N),
      gamma.reshape(1, N), beta.reshape(1, N))


def conv_t_elu(patches, w_flat, bias):
    """patches: (M, 9*Cin) f32, w_flat: (9*Cin, Cout) f32. Returns (M, Cout) f32."""
    M, K = patches.shape
    N = w_flat.shape[1]
    # 2-way parallel split over M so v7x's two TensorCores both get work;
    # on v5e/v6e this is just a 2-iteration pipelined loop (negligible overhead).
    m_split = 2 if (M % 2 == 0 and (M // 2) % 8 == 0) else 1
    tm = M // m_split
    return pl.pallas_call(
        _matmul_elu_kernel,
        grid=(m_split,),
        in_specs=[
            pl.BlockSpec((tm, K), lambda i: (i, 0)),
            pl.BlockSpec((K, N), lambda i: (0, 0)),
            pl.BlockSpec((1, N), lambda i: (0, 0)),
        ],
        out_specs=pl.BlockSpec((tm, N), lambda i: (i, 0)),
        out_shape=jax.ShapeDtypeStruct((M, N), F32),
        compiler_params=pltpu.CompilerParams(dimension_semantics=("parallel",)),
    )(patches, w_flat.astype(BF16), bias.reshape(1, N))


# ---------------------------------------------------------------------------
# Glue: im2col + ConvTranspose weight re-layout (plain JAX / XLA)
# ---------------------------------------------------------------------------
def im2col_3x3_valid(xpad):
    """xpad: (B, Hp, Wp, C) zero-padded input -> (B, Hp-2, Wp-2, 9*C) patches.
    Channel order of the 9*C axis is (dh, dw, ci), matching the weight flatten."""
    B, Hp, Wp, C = xpad.shape
    Ho, Wo = Hp - 2, Wp - 2
    cols = [xpad[:, dh:dh + Ho, dw:dw + Wo, :]
            for dh in range(3) for dw in range(3)]
    return jnp.concatenate(cols, axis=-1)


def convtranspose_weight_to_matmul(w_ct):
    """PyTorch ConvTranspose2d weight (Cin, Cout, 3, 3) -> (9*Cin, Cout) matmul
    weight for 'pad input by 2 + valid 3x3 correlation with flipped kernel'.
      out[b,co,p,q] = sum_{dh,dw,ci} xpad[b,p+dh,q+dw,ci] * w_ct[ci,co,2-dh,2-dw]
    """
    w = jnp.transpose(w_ct, (2, 3, 0, 1))[::-1, ::-1]   # (3, 3, Cin, Cout), flipped
    return w.reshape(9 * w.shape[2], w.shape[3])


# ---------------------------------------------------------------------------
# up_conv_block forward
# ---------------------------------------------------------------------------
def up_conv_block_forward(params, x_nchw, eps=1e-5):
    B, Cin, H, W = x_nchw.shape
    x = jnp.transpose(x_nchw, (0, 2, 3, 1))                       # NCHW -> NHWC

    # --- ConvTranspose2d #1 (k=3, s=1, p=0) + BatchNorm2d, fused kernel ------
    xp = jnp.pad(x, ((0, 0), (2, 2), (2, 2), (0, 0)))
    H1, W1 = H + 2, W + 2
    p1 = im2col_3x3_valid(xp).reshape(B * H1 * W1, 9 * Cin)
    C1 = params['w1f'].shape[1]
    h = conv_t_bn(p1, params['w1f'], params['b1'],
                  params['bn_g'], params['bn_b'], eps=eps)
    h = h.reshape(B, H1, W1, C1)
    # TODO(synk): eval-mode BatchNorm (running_mean/running_var buffers) not
    # modeled; forward uses training-mode batch statistics (module default).

    # --- ConvTranspose2d #2 (k=3, s=1, p=0) + ELU, fused kernel --------------
    hp = jnp.pad(h, ((0, 0), (2, 2), (2, 2), (0, 0)))
    H2, W2 = H1 + 2, W1 + 2
    p2 = im2col_3x3_valid(hp).reshape(B * H2 * W2, 9 * C1)
    C2 = params['w2f'].shape[1]
    y = conv_t_elu(p2, params['w2f'], params['b2'])
    y = y.reshape(B, H2, W2, C2)

    return jnp.transpose(y, (0, 3, 1, 2))                         # NHWC -> NCHW


# ---------------------------------------------------------------------------
# Deterministic synthetic parameters (mirrors nn.ConvTranspose2d / BatchNorm2d)
# ---------------------------------------------------------------------------
def init_params(key, in_ch=4, out_ch=16):
    k1, k2, k3, k4 = jax.random.split(key, 4)
    w1_ct = jax.random.normal(k1, (in_ch, out_ch, 3, 3), F32) / math.sqrt(9 * in_ch)
    b1 = 0.01 * jax.random.normal(k2, (out_ch,), F32)
    w2_ct = jax.random.normal(k3, (out_ch, out_ch, 3, 3), F32) / math.sqrt(9 * out_ch)
    b2 = 0.01 * jax.random.normal(k4, (out_ch,), F32)
    return dict(
        w1f=convtranspose_weight_to_matmul(w1_ct),   # (9*in_ch, out_ch)
        b1=b1,
        w2f=convtranspose_weight_to_matmul(w2_ct),   # (9*out_ch, out_ch)
        b2=b2,
        bn_g=jnp.ones((out_ch,), F32),               # BatchNorm2d(16) affine init
        bn_b=jnp.zeros((out_ch,), F32),
    )


# ---------------------------------------------------------------------------
# main
# ---------------------------------------------------------------------------
if __name__ == "__main__":
    key = jax.random.PRNGKey(0)
    kx, kp = jax.random.split(key)

    B, in_ch, out_ch, H = 2, 4, 16, 16     # BatchNorm2d(16) => out_ch must be 16
    x = jax.random.normal(kx, (B, in_ch, H, H), F32)
    params = init_params(kp, in_ch, out_ch)

    fwd = jax.jit(up_conv_block_forward)
    y = fwd(params, x)
    jax.block_until_ready(y)

    # ConvTranspose2d(k=3) grows each spatial dim by 2, applied twice: 16 -> 20
    assert y.shape == (B, out_ch, H + 4, H + 4), y.shape
    assert bool(jnp.all(jnp.isfinite(y)))
    print("KERNEL_OK")
</pallas_src>

<mosaic_0001>
module attributes {stable_mosaic.version = 11 : i64} {
  func.func @_matmul_bn_kernel(%arg0: memref<648x36xf32, #tpu.memory_space<vmem>>, %arg1: memref<36x16xbf16, #tpu.memory_space<vmem>>, %arg2: memref<1x16xf32, #tpu.memory_space<vmem>>, %arg3: memref<1x16xf32, #tpu.memory_space<vmem>>, %arg4: memref<1x16xf32, #tpu.memory_space<vmem>>, %arg5: memref<648x16xf32, #tpu.memory_space<vmem>>) attributes {dimension_semantics = [], scalar_prefetch = 0 : i64, scratch_operands = 0 : i64, tpu.core_type = #tpu.core_type<tc>} {
    %c0 = arith.constant 0 : index
    %c0_0 = arith.constant 0 : index
    %0 = vector.load %arg0[%c0, %c0_0] : memref<648x36xf32, #tpu.memory_space<vmem>>, vector<648x36xf32>
    %1 = arith.truncf %0 : vector<648x36xf32> to vector<648x36xbf16>
    %c0_1 = arith.constant 0 : index
    %c0_2 = arith.constant 0 : index
    %2 = vector.load %arg1[%c0_1, %c0_2] : memref<36x16xbf16, #tpu.memory_space<vmem>>, vector<36x16xbf16>
    %cst = arith.constant dense<0.000000e+00> : vector<648x16xf32>
    %3 = tpu.matmul %1, %2, %cst {dimension_numbers = #tpu.dot_dimension_numbers<[1], [0], [0], [1], [0, 0, 1, 1], [], []>} : vector<648x36xbf16>, vector<36x16xbf16>, vector<648x16xf32> -> vector<648x16xf32>
    %c0_3 = arith.constant 0 : index
    %c0_4 = arith.constant 0 : index
    %4 = vector.load %arg2[%c0_3, %c0_4] : memref<1x16xf32, #tpu.memory_space<vmem>>, vector<1x16xf32>
    %5 = vector.broadcast %4 : vector<1x16xf32> to vector<648x16xf32>
    %6 = arith.addf %3, %5 : vector<648x16xf32>
    %cst_5 = arith.constant dense<0.000000e+00> : vector<16xf32>
    %7 = vector.multi_reduction <add>, %6, %cst_5 [0] : vector<648x16xf32> to vector<16xf32>
    %8 = vector.shape_cast %7 : vector<16xf32> to vector<1x16xf32>
    %cst_6 = arith.constant 6.480000e+02 : f32
    %9 = vector.broadcast %cst_6 : f32 to vector<1x16xf32>
    %10 = arith.divf %8, %9 : vector<1x16xf32>
    %11 = vector.broadcast %10 : vector<1x16xf32> to vector<648x16xf32>
    %12 = arith.subf %6, %11 : vector<648x16xf32>
    %13 = arith.mulf %12, %12 : vector<648x16xf32>
    %cst_7 = arith.constant dense<0.000000e+00> : vector<16xf32>
    %14 = vector.multi_reduction <add>, %13, %cst_7 [0] : vector<648x16xf32> to vector<16xf32>
    %15 = vector.shape_cast %14 : vector<16xf32> to vector<1x16xf32>
    %cst_8 = arith.constant 6.480000e+02 : f32
    %16 = vector.broadcast %cst_8 : f32 to vector<1x16xf32>
    %17 = arith.divf %15, %16 : vector<1x16xf32>
    %cst_9 = arith.constant 9.99999974E-6 : f32
    %18 = vector.broadcast %cst_9 : f32 to vector<1x16xf32>
    %19 = arith.addf %17, %18 : vector<1x16xf32>
    %20 = math.rsqrt %19 : vector<1x16xf32>
    %21 = vector.broadcast %20 : vector<1x16xf32> to vector<648x16xf32>
    %22 = arith.mulf %12, %21 : vector<648x16xf32>
    %c0_10 = arith.constant 0 : index
    %c0_11 = arith.constant 0 : index
    %23 = vector.load %arg3[%c0_10, %c0_11] : memref<1x16xf32, #tpu.memory_space<vmem>>, vector<1x16xf32>
    %24 = vector.broadcast %23 : vector<1x16xf32> to vector<648x16xf32>
    %25 = arith.mulf %22, %24 : vector<648x16xf32>
    %c0_12 = arith.constant 0 : index
    %c0_13 = arith.constant 0 : index
    %26 = vector.load %arg4[%c0_12, %c0_13] : memref<1x16xf32, #tpu.memory_space<vmem>>, vector<1x16xf32>
    %27 = vector.broadcast %26 : vector<1x16xf32> to vector<648x16xf32>
    %28 = arith.addf %25, %27 : vector<648x16xf32>
    %c0_14 = arith.constant 0 : index
    %c0_15 = arith.constant 0 : index
    %29 = vector.load %arg5[%c0_14, %c0_15] : memref<648x16xf32, #tpu.memory_space<vmem>>, vector<648x16xf32>
    tpu.vector_store %arg5[%c0_14, %c0_15], %28 {strides = array<i32>} : memref<648x16xf32, #tpu.memory_space<vmem>>, vector<648x16xf32>,
    return
  }
}

module attributes {stable_mosaic.version = 11 : i64} {
  func.func @_matmul_elu_kernel(%arg0: i32, %arg1: memref<400x144xf32, #tpu.memory_space<vmem>>, %arg2: memref<144x16xbf16, #tpu.memory_space<vmem>>, %arg3: memref<1x16xf32, #tpu.memory_space<vmem>>, %arg4: memref<400x16xf32, #tpu.memory_space<vmem>>) attributes {dimension_semantics = [#tpu.dimension_semantics<parallel>], iteration_bounds = array<i64: 2>, scalar_prefetch = 0 : i64, scratch_operands = 0 : i64, tpu.core_type = #tpu.core_type<tc>, window_params = [{transform_indices = @transform_0, window_bounds = array<i64: 400, 144>}, {pipeline_mode = #tpu.pipeline_mode<synchronous>, transform_indices = @transform_1, window_bounds = array<i64: 144, 16>}, {pipeline_mode = #tpu.pipeline_mode<synchronous>, transform_indices = @transform_2, window_bounds = array<i64: 1, 16>}, {transform_indices = @transform_3, window_bounds = array<i64: 400, 16>}]} {
    %c0 = arith.constant 0 : index
    %c0_0 = arith.constant 0 : index
    %0 = vector.load %arg1[%c0, %c0_0] : memref<400x144xf32, #tpu.memory_space<vmem>>, vector<400x144xf32>
    %1 = arith.truncf %0 : vector<400x144xf32> to vector<400x144xbf16>
    %c0_1 = arith.constant 0 : index
    %c0_2 = arith.constant 0 : index
    %2 = vector.load %arg2[%c0_1, %c0_2] : memref<144x16xbf16, #tpu.memory_space<vmem>>, vector<144x16xbf16>
    %cst = arith.constant dense<0.000000e+00> : vector<400x16xf32>
    %3 = tpu.matmul %1, %2, %cst {dimension_numbers = #tpu.dot_dimension_numbers<[1], [0], [0], [1], [0, 0, 1, 1], [], []>} : vector<400x144xbf16>, vector<144x16xbf16>, vector<400x16xf32> -> vector<400x16xf32>
    %c0_3 = arith.constant 0 : index
    %c0_4 = arith.constant 0 : index
    %4 = vector.load %arg3[%c0_3, %c0_4] : memref<1x16xf32, #tpu.memory_space<vmem>>, vector<1x16xf32>
    %5 = vector.broadcast %4 : vector<1x16xf32> to vector<400x16xf32>
    %6 = arith.addf %3, %5 : vector<400x16xf32>
    %cst_5 = arith.constant 0.000000e+00 : f32
    %7 = vector.broadcast %cst_5 : f32 to vector<400x16xf32>
    %8 = arith.cmpf ogt, %6, %7 : vector<400x16xf32>
    %9 = math.exp %6 : vector<400x16xf32>
    %cst_6 = arith.constant 1.000000e+00 : f32
    %10 = vector.broadcast %cst_6 : f32 to vector<400x16xf32>
    %11 = arith.subf %9, %10 : vector<400x16xf32>
    %12 = arith.select %8, %6, %11 : vector<400x16xi1>, vector<400x16xf32>
    %c0_7 = arith.constant 0 : index
    %c0_8 = arith.constant 0 : index
    %13 = vector.load %arg4[%c0_7, %c0_8] : memref<400x16xf32, #tpu.memory_space<vmem>>, vector<400x16xf32>
    tpu.vector_store %arg4[%c0_7, %c0_8], %12 {strides = array<i32>} : memref<400x16xf32, #tpu.memory_space<vmem>>, vector<400x16xf32>,
    return
  }
  func.func @transform_0(%arg0: i32) -> (i32, i32) {
    %c0_i32 = arith.constant 0 : i32
    %c0_i32_0 = arith.constant 0 : i32
    return %arg0, %c0_i32 : i32, i32
  }
  func.func @transform_1(%arg0: i32) -> (i32, i32) {
    %c0_i32 = arith.constant 0 : i32
    %c0_i32_0 = arith.constant 0 : i32
    %c0_i32_1 = arith.constant 0 : i32
    return %c0_i32, %c0_i32_0 : i32, i32
  }
  func.func @transform_2(%arg0: i32) -> (i32, i32) {
    %c0_i32 = arith.constant 0 : i32
    %c0_i32_0 = arith.constant 0 : i32
    %c0_i32_1 = arith.constant 0 : i32
    return %c0_i32, %c0_i32_0 : i32, i32
  }
  func.func @transform_3(%arg0: i32) -> (i32, i32) {
    %c0_i32 = arith.constant 0 : i32
    %c0_i32_0 = arith.constant 0 : i32
    return %arg0, %c0_i32 : i32, i32
  }
}

</mosaic_0001>

<bundles_post_ra>
// kernel: up_conv_block_forward.2
= control target key start
LH: loop header
LB: loop body
LE: loop exit
PB: predicated region body
PF: predicated region fallthrough
CT: control target
= control target key end

     0   :  { %v1776_v0 = vmov 0.0   ;;  %vm1777_vm0 = vmmov 0   ;;  %vm294_vm1 = vcmask 1041408   ;;  %vm170_vm2 = vcmask 293888   ;;  %s4431_s1 = inlined_call_operand.vmem [shape: bf16[36,16], index: 1, kind: input, shape index: {}]   ;;  %s4432_s0 = inlined_call_operand.vmem [shape: f32[648,36], index: 0, kind: input, shape index: {}]   ;;  %s4433_s2 = inlined_call_operand.vmem [shape: f32[1,16], index: 2, kind: input, shape index: {}]   ;;  %s4434_s3 = inlined_call_operand.vmem [shape: f32[1,16], index: 3, kind: input, shape index: {}]   ;;  %s4435_s4 = inlined_call_operand.vmem [shape: f32[1,16], index: 4, kind: input, shape index: {}]   ;;  %s4436_s5 = inlined_call_operand.vmem [shape: f32[648,16], index: 5, kind: output, shape index: {}]  }
   0x1   :  { %1593 = vmatprep.subr.bf16.mxu0 %v1776_v0  ;;  %v1771_v1 = vld [vmem:[%s4431_s1] sm:$0xff]   ;;  %1599 = vmatprep.mubr.msk.bf16.mxu0 %vm1777_vm0, %v1776_v0  ;;  %v1772_v2 = vld [vmem:[%s4431_s1 + $0x8] sm:$0xff]   ;;  %v1773_v3 = vld [vmem:[%s4431_s1 + $0x10] ss:$0 sps:$4 sm:$0x33]   ;;  %vm658_vm3 = vcmask 130048  }
   0x2   :  { %1763 = vmatprep.subr.bf16.mxu1 %v1776_v0  ;;  %1683 = vmatprep.mubr.msk.bf16.mxu1 %vm1777_vm0, %v1776_v0  ;;  %v21_v4 = vld [vmem:[%s4432_s0] sm:$0xff]  ;;  %v22_v5 = vld [vmem:[%s4432_s0 + $0x8] sm:$0xff]  ;;  %v296_v6 = vsel %vm294_vm1, %v1773_v3, 0  ;;  %v63_v8 = vld [vmem:[%s4432_s0 + $0x150] sm:$0xff] }
   0x3   :  { %1594 = vmatpush3.bf16.msra.mxu0 %v1771_v1  ;;  %1766 = vmatpush3.bf16.msra.mxu1 %v1771_v1  ;;  %v102_v7 = vpack.c.bf16 %v22_v5, %v21_v4  ;;  %v64_v9 = vld [vmem:[%s4432_s0 + $0x158] sm:$0xff]  ;;  %v23_v11 = vld [vmem:[%s4432_s0 + $0x10] sm:$0xff]  ;;  %v65_v13 = vld [vmem:[%s4432_s0 + $0x160] sm:$0xff] }
   0x4   :  { %1595 = vmatprep.subr.bf16.mxu0 %v1776_v0  ;;  %1764 = vmatprep.subr.bf16.mxu1 %v1776_v0  ;;  %v123_v10 = vpack.c.bf16 %v64_v9, %v63_v8  ;;  %v24_v12 = vld [vmem:[%s4432_s0 + $0x18] sm:$0xff]  ;;  %v66_v14 = vld [vmem:[%s4432_s0 + $0x168] sm:$0xff]  ;;  %v25_v17 = vld [vmem:[%s4432_s0 + $0x20] sm:$0xff] }
   0x5   :  { %v103_v15 = vpack.c.bf16 %v24_v12, %v23_v11  ;;  %v124_v16 = vpack.c.bf16 %v66_v14, %v65_v13  ;;  %v26_v18 = vld [vmem:[%s4432_s0 + $0x28] sm:$0xff]  ;;  %v67_v19 = vld [vmem:[%s4432_s0 + $0x170] sm:$0xff]  ;;  %v68_v20 = vld [vmem:[%s4432_s0 + $0x178] sm:$0xff] }
   0x6   :  { %v104_v21 = vpack.c.bf16 %v26_v18, %v25_v17  ;;  %v125_v22 = vpack.c.bf16 %v68_v20, %v67_v19  ;;  %v27_v23 = vld [vmem:[%s4432_s0 + $0x30] sm:$0xff]  ;;  %v28_v24 = vld [vmem:[%s4432_s0 + $0x38] sm:$0xff]  ;;  %v69_v25 = vld [vmem:[%s4432_s0 + $0x180] sm:$0xff] }
   0x7   :  { %1596 = vmatpush3.bf16.msra.mxu0 %v1772_v2  ;;  %1767 = vmatpush3.bf16.msra.mxu1 %v1772_v2  ;;  %v70_v26 = vld [vmem:[%s4432_s0 + $0x188] sm:$0xff]  ;;  %v105_v27 = vpack.c.bf16 %v28_v24, %v27_v23  ;;  %v29_v29 = vld [vmem:[%s4432_s0 + $0x40] sm:$0xff]  ;;  %v71_v31 = vld [vmem:[%s4432_s0 + $0x190] sm:$0xff] }
   0x8   :  { %1597 = vmatprep.subr.bf16.mxu0 %v1776_v0  ;;  %1765 = vmatprep.subr.bf16.mxu1 %v1776_v0  ;;  %v126_v28 = vpack.c.bf16 %v70_v26, %v69_v25  ;;  %v30_v30 = vld [vmem:[%s4432_s0 + $0x48] sm:$0xff]  ;;  %v72_v32 = vld [vmem:[%s4432_s0 + $0x198] sm:$0xff]  ;;  %v31_v35 = vld [vmem:[%s4432_s0 + $0x50] sm:$0xff] }
   0x9   :  { %v106_v33 = vpack.c.bf16 %v30_v30, %v29_v29  ;;  %v127_v34 = vpack.c.bf16 %v72_v32, %v71_v31  ;;  %v32_v36 = vld [vmem:[%s4432_s0 + $0x58] sm:$0xff]  ;;  %v73_v37 = vld [vmem:[%s4432_s0 + $0x1a0] sm:$0xff]  ;;  %v74_v38 = vld [vmem:[%s4432_s0 + $0x1a8] sm:$0xff] }
   0xa   :  { %v107_v39 = vpack.c.bf16 %v32_v36, %v31_v35  ;;  %v128_v40 = vpack.c.bf16 %v74_v38, %v73_v37  ;;  %v33_v41 = vld [vmem:[%s4432_s0 + $0x60] sm:$0xff]  ;;  %v34_v42 = vld [vmem:[%s4432_s0 + $0x68] sm:$0xff]  ;;  %v75_v43 = vld [vmem:[%s4432_s0 + $0x1b0] sm:$0xff] }
   0xb   :  { %1598 = vmatpush3.bf16.msra.mxu0 %v296_v6  ;;  %1768 = vmatpush3.bf16.msra.mxu1 %v296_v6  ;;  %v76_v44 = vld [vmem:[%s4432_s0 + $0x1b8] sm:$0xff]  ;;  %v108_v45 = vpack.c.bf16 %v34_v42, %v33_v41  ;;  %v35_v47 = vld [vmem:[%s4432_s0 + $0x70] sm:$0xff]  ;;  %v77_v49 = vld [vmem:[%s4432_s0 + $0x1c0] sm:$0xff] }
   0xc   :  { %v129_v46 = vpack.c.bf16 %v76_v44, %v75_v43  ;;  %v36_v48 = vld [vmem:[%s4432_s0 + $0x78] sm:$0xff]  ;;  %v78_v50 = vld [vmem:[%s4432_s0 + $0x1c8] sm:$0xff]  ;;  %v37_v53 = vld [vmem:[%s4432_s0 + $0x80] sm:$0xff] }
   0xd   :  { %v109_v51 = vpack.c.bf16 %v36_v48, %v35_v47  ;;  %v130_v52 = vpack.c.bf16 %v78_v50, %v77_v49  ;;  %v38_v54 = vld [vmem:[%s4432_s0 + $0x88] sm:$0xff]  ;;  %v79_v55 = vld [vmem:[%s4432_s0 + $0x1d0] sm:$0xff]  ;;  %v80_v56 = vld [vmem:[%s4432_s0 + $0x1d8] sm:$0xff] }
   0xe   :  { %1600 = vmatmul.mubr.msk.bf16.vlgmr.msra.gmra.mrb[0].mxu0 %vm170_vm2, %v102_v7  ;;  %1684 = vmatmul.mubr.msk.bf16.vlgmr.msra.gmra.mrb[0].mxu1 %vm170_vm2, %v123_v10  ;;  %v110_v57 = vpack.c.bf16 %v38_v54, %v37_v53  ;;  %v131_v58 = vpack.c.bf16 %v80_v56, %v79_v55  ;;  %v39_v59 = vld [vmem:[%s4432_s0 + $0x90] sm:$0xff]  ;;  %v40_v60 = vld [vmem:[%s4432_s0 + $0x98] sm:$0xff]  ;;  %v81_v61 = vld [vmem:[%s4432_s0 + $0x1e0] sm:$0xff] }
   0xf   :  { %1603 = vmatprep.mubr.msk.bf16.mxu0 %vm1777_vm0, %v1776_v0  ;;  %1687 = vmatprep.mubr.msk.bf16.mxu1 %vm1777_vm0, %v1776_v0  ;;  %v82_v62 = vld [vmem:[%s4432_s0 + $0x1e8] sm:$0xff]  ;;  %v111_v63 = vpack.c.bf16 %v40_v60, %v39_v59  ;;  %v41_v2 = vld [vmem:[%s4432_s0 + $0xa0] sm:$0xff]  ;;  %v83_v4 = vld [vmem:[%s4432_s0 + $0x1f0] sm:$0xff] }
  0x10   :  { %v132_v1 = vpack.c.bf16 %v82_v62, %v81_v61  ;;  %v42_v3 = vld [vmem:[%s4432_s0 + $0xa8] sm:$0xff]  ;;  %v84_v5 = vld [vmem:[%s4432_s0 + $0x1f8] sm:$0xff]  ;;  %v43_v8 = vld [vmem:[%s4432_s0 + $0xb0] sm:$0xff] }
  0x11   :  { %v112_v6 = vpack.c.bf16 %v42_v3, %v41_v2  ;;  %v133_v7 = vpack.c.bf16 %v84_v5, %v83_v4  ;;  %v44_v9 = vld [vmem:[%s4432_s0 + $0xb8] sm:$0xff]  ;;  %v85_v10 = vld [vmem:[%s4432_s0 + $0x200] sm:$0xff]  ;;  %v86_v11 = vld [vmem:[%s4432_s0 + $0x208] sm:$0xff] }
  0x12   :  { %v113_v12 = vpack.c.bf16 %v44_v9, %v43_v8  ;;  %v134_v13 = vpack.c.bf16 %v86_v11, %v85_v10  ;;  %v45_v14 = vld [vmem:[%s4432_s0 + $0xc0] sm:$0xff]  ;;  %v88_v17 = vld [vmem:[%s4432_s0 + $0x218] sm:$0xff]  ;;  %v47_v20 = vld [vmem:[%s4432_s0 + $0xd0] sm:$0xff] }
  0x13   :  { %v90_v23 = vld [vmem:[%s4432_s0 + $0x228] sm:$0xff]  ;;  %v49_v26 = vld [vmem:[%s4432_s0 + $0xe0] sm:$0xff]  ;;  %v92_v29 = vld [vmem:[%s4432_s0 + $0x238] sm:$0xff] }
  0x14   :  { %v51_v32 = vld [vmem:[%s4432_s0 + $0xf0] sm:$0xff]  ;;  %v94_v35 = vld [vmem:[%s4432_s0 + $0x248] sm:$0xff]  ;;  %v53_v38 = vld [vmem:[%s4432_s0 + $0x100] sm:$0xff] }
  0x15   :  { %v96_v41 = vld [vmem:[%s4432_s0 + $0x258] sm:$0xff]  ;;  %v55_v44 = vld [vmem:[%s4432_s0 + $0x110] sm:$0xff]  ;;  %v98_v47 = vld [vmem:[%s4432_s0 + $0x268] sm:$0xff] }
  0x16   :  { %1604 = vmatmul.mubr.msk.bf16.gmra.mrb[4].mxu0 %vm170_vm2, %v103_v15  ;;  %1688 = vmatmul.mubr.msk.bf16.gmra.mrb[4].mxu1 %vm170_vm2, %v124_v16  ;;  %v46_v15 = vld [vmem:[%s4432_s0 + $0xc8] sm:$0xff]  ;;  %v87_v16 = vld [vmem:[%s4432_s0 + $0x210] sm:$0xff]  ;;  %v57_v50 = vld [vmem:[%s4432_s0 + $0x120] sm:$0xff] }
  0x17   :  { %1607 = vmatprep.mubr.msk.bf16.mxu0 %vm1777_vm0, %v1776_v0  ;;  %1691 = vmatprep.mubr.msk.bf16.mxu1 %vm1777_vm0, %v1776_v0  ;;  %v114_v18 = vpack.c.bf16 %v46_v15, %v45_v14  ;;  %v135_v19 = vpack.c.bf16 %v88_v17, %v87_v16  ;;  %v100_v53 = vld [vmem:[%s4432_s0 + $0x278] sm:$0xff]  ;;  %v59_v56 = vld [vmem:[%s4432_s0 + $0x130] sm:$0xff]  ;;  %v61_v61 = vld [vmem:[%s4432_s0 + $0x140] sm:$0xff] }
  0x18   :  { %v62_v62 = vld [vmem:[%s4432_s0 + $0x148] sm:$0xff] }
  0x1e   :  { %1608 = vmatmul.mubr.msk.bf16.gmra.mrb[8].mxu0 %vm170_vm2, %v104_v21  ;;  %1692 = vmatmul.mubr.msk.bf16.gmra.mrb[8].mxu1 %vm170_vm2, %v125_v22  ;;  %v48_v21 = vld [vmem:[%s4432_s0 + $0xd8] sm:$0xff]  ;;  %v89_v22 = vld [vmem:[%s4432_s0 + $0x220] sm:$0xff] }
  0x1f   :  { %1611 = vmatprep.mubr.msk.bf16.mxu0 %vm1777_vm0, %v1776_v0  ;;  %1695 = vmatprep.mubr.msk.bf16.mxu1 %vm1777_vm0, %v1776_v0  ;;  %v115_v24 = vpack.c.bf16 %v48_v21, %v47_v20  ;;  %v136_v25 = vpack.c.bf16 %v90_v23, %v89_v22 }
  0x26   :  { %1612 = vmatmul.mubr.msk.bf16.gmra.mrb[12].mxu0 %vm170_vm2, %v105_v27  ;;  %1696 = vmatmul.mubr.msk.bf16.gmra.mrb[12].mxu1 %vm170_vm2, %v126_v28  ;;  %v50_v27 = vld [vmem:[%s4432_s0 + $0xe8] sm:$0xff]  ;;  %v91_v28 = vld [vmem:[%s4432_s0 + $0x230] sm:$0xff] }
  0x27   :  { %1615 = vmatprep.mubr.msk.bf16.mxu0 %vm1777_vm0, %v1776_v0  ;;  %1699 = vmatprep.mubr.msk.bf16.mxu1 %vm1777_vm0, %v1776_v0  ;;  %v116_v30 = vpack.c.bf16 %v50_v27, %v49_v26  ;;  %v137_v31 = vpack.c.bf16 %v92_v29, %v91_v28 }
  0x2e   :  { %1616 = vmatmul.mubr.msk.bf16.gmra.mrb[16].mxu0 %vm170_vm2, %v106_v33  ;;  %1700 = vmatmul.mubr.msk.bf16.gmra.mrb[16].mxu1 %vm170_vm2, %v127_v34  ;;  %v52_v33 = vld [vmem:[%s4432_s0 + $0xf8] sm:$0xff]  ;;  %v93_v34 = vld [vmem:[%s4432_s0 + $0x240] sm:$0xff] }
  0x2f   :  { %1619 = vmatprep.mubr.msk.bf16.mxu0 %vm1777_vm0, %v1776_v0  ;;  %1703 = vmatprep.mubr.msk.bf16.mxu1 %vm1777_vm0, %v1776_v0  ;;  %v117_v36 = vpack.c.bf16 %v52_v33, %v51_v32  ;;  %v138_v37 = vpack.c.bf16 %v94_v35, %v93_v34 }
  0x36   :  { %1620 = vmatmul.mubr.msk.bf16.gmra.mrb[20].mxu0 %vm170_vm2, %v107_v39  ;;  %1704 = vmatmul.mubr.msk.bf16.gmra.mrb[20].mxu1 %vm170_vm2, %v128_v40  ;;  %v54_v39 = vld [vmem:[%s4432_s0 + $0x108] sm:$0xff]  ;;  %v95_v40 = vld [vmem:[%s4432_s0 + $0x250] sm:$0xff] }
  0x37   :  { %1623 = vmatprep.mubr.msk.bf16.mxu0 %vm1777_vm0, %v1776_v0  ;;  %1707 = vmatprep.mubr.msk.bf16.mxu1 %vm1777_vm0, %v1776_v0  ;;  %v118_v42 = vpack.c.bf16 %v54_v39, %v53_v38  ;;  %v139_v43 = vpack.c.bf16 %v96_v41, %v95_v40  ;;  %v2212_v40 = vld [vmem:[%s4433_s2] ss:$0 sm:$0xff] }
  0x3e   :  { %1624 = vmatmul.mubr.msk.bf16.gmra.mrb[24].mxu0 %vm170_vm2, %v108_v45  ;;  %1708 = vmatmul.mubr.msk.bf16.gmra.mrb[24].mxu1 %vm170_vm2, %v129_v46  ;;  %v56_v45 = vld [vmem:[%s4432_s0 + $0x118] sm:$0xff]  ;;  %v97_v46 = vld [vmem:[%s4432_s0 + $0x260] sm:$0xff] }
  0x3f   :  { %1627 = vmatprep.mubr.msk.bf16.mxu0 %vm1777_vm0, %v1776_v0  ;;  %1711 = vmatprep.mubr.msk.bf16.mxu1 %vm1777_vm0, %v1776_v0  ;;  %v119_v48 = vpack.c.bf16 %v56_v45, %v55_v44  ;;  %v140_v49 = vpack.c.bf16 %v98_v47, %v97_v46 }
  0x46   :  { %1628 = vmatmul.mubr.msk.bf16.gmra.mrb[28].mxu0 %vm170_vm2, %v109_v51  ;;  %1712 = vmatmul.mubr.msk.bf16.gmra.mrb[28].mxu1 %vm170_vm2, %v130_v52  ;;  %v58_v51 = vld [vmem:[%s4432_s0 + $0x128] sm:$0xff]  ;;  %v99_v52 = vld [vmem:[%s4432_s0 + $0x270] sm:$0xff] }
  0x47   :  { %1631 = vmatprep.mubr.msk.bf16.mxu0 %vm1777_vm0, %v1776_v0  ;;  %1715 = vmatprep.mubr.msk.bf16.mxu1 %vm1777_vm0, %v1776_v0  ;;  %v120_v54 = vpack.c.bf16 %v58_v51, %v57_v50  ;;  %v141_v55 = vpack.c.bf16 %v100_v53, %v99_v52 }
  0x4e   :  { %1632 = vmatmul.mubr.msk.bf16.gmra.mrb[32].mxu0 %vm170_vm2, %v110_v57  ;;  %1716 = vmatmul.mubr.msk.bf16.gmra.mrb[32].mxu1 %vm170_vm2, %v131_v58  ;;  %v60_v57 = vld [vmem:[%s4432_s0 + $0x138] sm:$0xff]  ;;  %v101_v58 = vld [vmem:[%s4432_s0 + $0x280] sm:$0xff] }
  0x4f   :  { %1635 = vmatprep.mubr.msk.bf16.mxu0 %vm1777_vm0, %v1776_v0  ;;  %1719 = vmatprep.mubr.msk.bf16.mxu1 %vm1777_vm0, %v1776_v0  ;;  %v121_v59 = vpack.c.bf16 %v60_v57, %v59_v56  ;;  %v142_v60 = vpack.c.bf16 %v101_v58, %v101_v58 }
  0x56   :  { %1636 = vmatmul.mubr.msk.bf16.gmra.mrb[36].mxu0 %vm170_vm2, %v111_v63  ;;  %1720 = vmatmul.mubr.msk.bf16.gmra.mrb[36].mxu1 %vm170_vm2, %v132_v1  ;;  %v122_v63 = vpack.c.bf16 %v62_v62, %v61_v61 }
  0x57   :  { %1639 = vmatprep.mubr.msk.bf16.mxu0 %vm1777_vm0, %v1776_v0  ;;  %1723 = vmatprep.mubr.msk.bf16.mxu1 %vm1777_vm0, %v1776_v0 }
  0x5e   :  { %1640 = vmatmul.mubr.msk.bf16.gmra.mrb[40].mxu0 %vm170_vm2, %v112_v6  ;;  %1724 = vmatmul.mubr.msk.bf16.gmra.mrb[40].mxu1 %vm170_vm2, %v133_v7 }
  0x5f   :  { %1643 = vmatprep.mubr.msk.bf16.mxu0 %vm1777_vm0, %v1776_v0  ;;  %1727 = vmatprep.mubr.msk.bf16.mxu1 %vm1777_vm0, %v1776_v0 }
  0x66   :  { %1644 = vmatmul.mubr.msk.bf16.gmra.mrb[44].mxu0 %vm170_vm2, %v113_v12  ;;  %1728 = vmatmul.mubr.msk.bf16.gmra.mrb[44].mxu1 %vm170_vm2, %v134_v13 }
  0x67   :  { %1647 = vmatprep.mubr.msk.bf16.mxu0 %vm1777_vm0, %v1776_v0  ;;  %1731 = vmatprep.mubr.msk.bf16.mxu1 %vm1777_vm0, %v1776_v0 }
  0x6e   :  { %1648 = vmatmul.mubr.msk.bf16.gmra.mrb[48].mxu0 %vm170_vm2, %v114_v18  ;;  %1732 = vmatmul.mubr.msk.bf16.gmra.mrb[48].mxu1 %vm170_vm2, %v135_v19 }
  0x6f   :  { %1651 = vmatprep.mubr.msk.bf16.mxu0 %vm1777_vm0, %v1776_v0  ;;  %1735 = vmatprep.mubr.msk.bf16.mxu1 %vm1777_vm0, %v1776_v0 }
  0x76   :  { %1652 = vmatmul.mubr.msk.bf16.gmra.mrb[52].mxu0 %vm170_vm2, %v115_v24  ;;  %1736 = vmatmul.mubr.msk.bf16.gmra.mrb[52].mxu1 %vm170_vm2, %v136_v25 }
  0x77   :  { %1655 = vmatprep.mubr.msk.bf16.mxu0 %vm1777_vm0, %v1776_v0  ;;  %1739 = vmatprep.mubr.msk.bf16.mxu1 %vm1777_vm0, %v1776_v0 }
  0x7e   :  { %1656 = vmatmul.mubr.msk.bf16.gmra.mrb[56].mxu0 %vm170_vm2, %v116_v30  ;;  %1740 = vmatmul.mubr.msk.bf16.gmra.mrb[56].mxu1 %vm170_vm2, %v137_v31 }
  0x7f   :  { %1659 = vmatprep.mubr.msk.bf16.mxu0 %vm1777_vm0, %v1776_v0  ;;  %1743 = vmatprep.mubr.msk.bf16.mxu1 %vm1777_vm0, %v1776_v0 }
  0x86   :  { %1660 = vmatmul.mubr.msk.bf16.gmra.mrb[60].mxu0 %vm170_vm2, %v117_v36  ;;  %1744 = vmatmul.mubr.msk.bf16.gmra.mrb[60].mxu1 %vm170_vm2, %v138_v37 }
  0x87   :  { %1663 = vmatprep.mubr.msk.bf16.mxu0 %vm1777_vm0, %v1776_v0  ;;  %1747 = vmatprep.mubr.msk.bf16.mxu1 %vm1777_vm0, %v1776_v0 }
  0x8e   :  { %1664 = vmatmul.mubr.msk.bf16.gmra.mrb[64].mxu0 %vm170_vm2, %v118_v42  ;;  %1748 = vmatmul.mubr.msk.bf16.gmra.mrb[64].mxu1 %vm170_vm2, %v139_v43 }
  0x8f   :  { %1667 = vmatprep.mubr.msk.bf16.mxu0 %vm1777_vm0, %v1776_v0  ;;  %1751 = vmatprep.mubr.msk.bf16.mxu1 %vm1777_vm0, %v1776_v0 }
  0x96   :  { %1668 = vmatmul.mubr.msk.bf16.gmra.mrb[68].mxu0 %vm170_vm2, %v119_v48  ;;  %1752 = vmatmul.mubr.msk.bf16.gmra.mrb[68].mxu1 %vm170_vm2, %v140_v49 }
  0x97   :  { %1671 = vmatprep.mubr.msk.bf16.mxu0 %vm1777_vm0, %v1776_v0  ;;  %1755 = vmatprep.mubr.msk.bf16.mxu1 %vm1777_vm0, %v1776_v0 }
  0x9e   :  { %1672 = vmatmul.mubr.msk.bf16.gmra.mrb[72].mxu0 %vm170_vm2, %v120_v54  ;;  %1756 = vmatmul.mubr.msk.bf16.gmra.mrb[72].mxu1 %vm170_vm2, %v141_v55 }
  0x9f   :  { %1675 = vmatprep.mubr.msk.bf16.mxu0 %vm1777_vm0, %v1776_v0  ;;  %1759 = vmatprep.mubr.msk.bf16.mxu1 %vm1777_vm0, %v1776_v0 }
  0xa6   :  { %1676 = vmatmul.mubr.msk.bf16.gmra.mrb[76].mxu0 %vm170_vm2, %v121_v59  ;;  %1760 = vmatmul.mubr.msk.bf16.gmra.mrb[76].mxu1 %vm170_vm2, %v142_v60 }
  0xa7   :  { %1679 = vmatprep.mubr.msk.bf16.mxu0 %vm1777_vm0, %v1776_v0 }
  0xae   :  { %1680 = vmatmul.mubr.msk.bf16.gmra.mrb[80].mxu0 %vm170_vm2, %v122_v63 }
  0xe1   :  { %v332_v1 = vpop.f32.mrb[0].mxu0  ;;  %v2189_v2 = vpop.f32.mrb[0].mxu1 }
  0xe2   :  { %v1601_v3 = vpop.f32.mrb[1].mxu0  ;;  %v1685_v4 = vpop.f32.mrb[1].mxu1  ;;  %v2222_v48 = vadd.f32 %v2212_v40, %v332_v1 }
  0xe3   :  { %v335_v5 = vpop.f32.mrb[2].mxu0  ;;  %v2191_v6 = vpop.f32.mrb[2].mxu1 }
  0xe4   :  { %v1602_v0 = vpop.f32.mrb[3].mxu0  ;;  %v1686_v7 = vpop.f32.mrb[3].mxu1  ;;  %v2217_v43 = vadd.f32 %v2212_v40, %v335_v5  ;;  %v659_v53 = vsel %vm658_vm3, %v2222_v48, 0.0 }
  0xe6   :  { %v660_v52 = vsel %vm658_vm3, %v2217_v43, 0.0 }
  0xe7   :  { %v661_v56 = vadd.f32 %v660_v52, %v659_v53 }
  0xe9   :  { %v340_v8 = vpop.f32.mrb[4].mxu0  ;;  %v2193_v9 = vpop.f32.mrb[4].mxu1 }
  0xea   :  { %v1605_v10 = vpop.f32.mrb[5].mxu0  ;;  %v1689_v11 = vpop.f32.mrb[5].mxu1  ;;  %v2225_v49 = vadd.f32 %v2212_v40, %v340_v8 }
  0xeb   :  { %v343_v12 = vpop.f32.mrb[6].mxu0  ;;  %v2195_v13 = vpop.f32.mrb[6].mxu1 }
  0xec   :  { %v1606_v14 = vpop.f32.mrb[7].mxu0  ;;  %v1690_v15 = vpop.f32.mrb[7].mxu1  ;;  %v662_v54 = vsel %vm658_vm3, %v2225_v49, 0.0  ;;  %v2234_v55 = vadd.f32 %v2212_v40, %v343_v12 }
  0xed   :  { %v663_v62 = vadd.f32 %v662_v54, %v661_v56 }
  0xee   :  { %v664_v3 = vsel %vm658_vm3, %v2234_v55, 0.0 }
  0xef   :  { %v665_v8 = vadd.f32 %v664_v3, %v663_v62 }
  0xf1   :  { %v348_v16 = vpop.f32.mrb[8].mxu0  ;;  %v2197_v17 = vpop.f32.mrb[8].mxu1 }
  0xf2   :  { %v1609_v18 = vpop.f32.mrb[9].mxu0  ;;  %v1693_v19 = vpop.f32.mrb[9].mxu1  ;;  %v2239_v59 = vadd.f32 %v2212_v40, %v348_v16 }
  0xf3   :  { %v351_v20 = vpop.f32.mrb[10].mxu0  ;;  %v2199_v21 = vpop.f32.mrb[10].mxu1 }
  0xf4   :  { %v1610_v22 = vpop.f32.mrb[11].mxu0  ;;  %v1694_v23 = vpop.f32.mrb[11].mxu1  ;;  %v666_v0 = vsel %vm658_vm3, %v2239_v59, 0.0  ;;  %v2248_v7 = vadd.f32 %v2212_v40, %v351_v20 }
  0xf5   :  { %v667_v11 = vadd.f32 %v666_v0, %v665_v8 }
  0xf6   :  { %v668_v15 = vsel %vm658_vm3, %v2248_v7, 0.0 }
  0xf9   :  { %v356_v24 = vpop.f32.mrb[12].mxu0  ;;  %v2201_v25 = vpop.f32.mrb[12].mxu1 }
  0xfa   :  { %v1613_v26 = vpop.f32.mrb[13].mxu0  ;;  %v1697_v27 = vpop.f32.mrb[13].mxu1  ;;  %v2251_v10 = vadd.f32 %v2212_v40, %v356_v24 }
  0xfb   :  { %v359_v28 = vpop.f32.mrb[14].mxu0  ;;  %v2203_v29 = vpop.f32.mrb[14].mxu1  ;;  %v669_v27 = vadd.f32 %v668_v15, %v667_v11 }
  0xfc   :  { %v1614_v30 = vpop.f32.mrb[15].mxu0  ;;  %v1698_v31 = vpop.f32.mrb[15].mxu1  ;;  %v670_v20 = vsel %vm658_vm3, %v2251_v10, 0.0  ;;  %v2262_v23 = vadd.f32 %v2212_v40, %v359_v28 }
  0xfd   :  { %v671_v31 = vadd.f32 %v670_v20, %v669_v27 }
 0x101   :  { %v364_v32 = vpop.f32.mrb[16].mxu0  ;;  %v2205_v33 = vpop.f32.mrb[16].mxu1 }
 0x102   :  { %v1617_v34 = vpop.f32.mrb[17].mxu0  ;;  %v1701_v35 = vpop.f32.mrb[17].mxu1  ;;  %v2265_v30 = vadd.f32 %v2212_v40, %v364_v32 }
 0x103   :  { %v367_v36 = vpop.f32.mrb[18].mxu0  ;;  %v2207_v37 = vpop.f32.mrb[18].mxu1  ;;  %v672_v34 = vsel %vm658_vm3, %v2262_v23, 0.0 }
 0x104   :  { %v1618_v38 = vpop.f32.mrb[19].mxu0  ;;  %v1702_v39 = vpop.f32.mrb[19].mxu1  ;;  %4506 = vst [vmem:[#allocation2_spill] sm:$0xff] %v2265_v30 }
 0x105   :  { %v674_v39 = vsel %vm658_vm3, %v2265_v30, 0.0 }
 0x109   :  { %v372_v41 = vpop.f32.mrb[20].mxu0  ;;  %v2214_v42 = vpop.f32.mrb[20].mxu1 }
 0x10a   :  { %v1621_v44 = vpop.f32.mrb[21].mxu0  ;;  %v1705_v45 = vpop.f32.mrb[21].mxu1  ;;  %v2279_v32 = vadd.f32 %v2212_v40, %v372_v41 }
 0x10b   :  { %v375_v46 = vpop.f32.mrb[22].mxu0  ;;  %v2219_v47 = vpop.f32.mrb[22].mxu1  ;;  %v2274_v44 = vadd.f32 %v2212_v40, %v367_v36 }
 0x10c   :  { %v1622_v50 = vpop.f32.mrb[23].mxu0  ;;  %v1706_v51 = vpop.f32.mrb[23].mxu1  ;;  %4508 = vst [vmem:[#allocation4_spill] sm:$0xff] %v2279_v32  ;;  %v2286_v36 = vadd.f32 %v2212_v40, %v375_v46 }
 0x10d   :  { %4507 = vst [vmem:[#allocation3_spill] sm:$0xff] %v2274_v44  ;;  %v673_v50 = vadd.f32 %v672_v34, %v671_v31 }
 0x10e   :  { %4509 = vst [vmem:[#allocation5_spill] sm:$0xff] %v2286_v36 }
 0x10f   :  { %v675_v56 = vadd.f32 %v674_v39, %v673_v50 }
 0x111   :  { %v380_v57 = vpop.f32.mrb[24].mxu0  ;;  %v2236_v58 = vpop.f32.mrb[24].mxu1 }
 0x112   :  { %v1625_v60 = vpop.f32.mrb[25].mxu0  ;;  %v1709_v61 = vpop.f32.mrb[25].mxu1 }
 0x113   :  { %v383_v63 = vpop.f32.mrb[26].mxu0  ;;  %v2241_v1 = vpop.f32.mrb[26].mxu1  ;;  %v676_v60 = vsel %vm658_vm3, %v2274_v44, 0.0  ;;  %v678_v61 = vsel %vm658_vm3, %v2279_v32, 0.0 }
 0x114   :  { %v1626_v4 = vpop.f32.mrb[27].mxu0  ;;  %v1710_v5 = vpop.f32.mrb[27].mxu1  ;;  %v677_v62 = vadd.f32 %v676_v60, %v675_v56 }
 0x115   :  { %v2291_v5 = vadd.f32 %v2212_v40, %v380_v57 }
 0x116   :  { %v679_v8 = vadd.f32 %v678_v61, %v677_v62 }
 0x117   :  { %4510 = vst [vmem:[#allocation6_spill] sm:$0xff] %v2291_v5  ;;  %v682_v46 = vsel %vm658_vm3, %v2291_v5, 0.0 }
 0x119   :  { %v388_v12 = vpop.f32.mrb[28].mxu0  ;;  %v2253_v14 = vpop.f32.mrb[28].mxu1 }
 0x11a   :  { %v1629_v16 = vpop.f32.mrb[29].mxu0  ;;  %v1713_v18 = vpop.f32.mrb[29].mxu1  ;;  %v2303_v57 = vadd.f32 %v2212_v40, %v388_v12 }
 0x11b   :  { %v391_v19 = vpop.f32.mrb[30].mxu0  ;;  %v2257_v22 = vpop.f32.mrb[30].mxu1  ;;  %v680_v16 = vsel %vm658_vm3, %v2286_v36, 0.0 }
 0x11c   :  { %v1630_v24 = vpop.f32.mrb[31].mxu0  ;;  %v1714_v26 = vpop.f32.mrb[31].mxu1  ;;  %4512 = vst [vmem:[#allocation8_spill] sm:$0xff] %v2303_v57 }
 0x11d   :  { %v2300_v24 = vadd.f32 %v2212_v40, %v383_v63  ;;  %v681_v26 = vadd.f32 %v680_v16, %v679_v8  ;;  %v686_v63 = vsel %vm658_vm3, %v2303_v57, 0.0 }
 0x11f   :  { %4511 = vst [vmem:[#allocation7_spill] sm:$0xff] %v2300_v24  ;;  %v683_v27 = vadd.f32 %v682_v46, %v681_v26  ;;  %v684_v39 = vsel %vm658_vm3, %v2300_v24, 0.0 }
 0x121   :  { %v396_v35 = vpop.f32.mrb[32].mxu0  ;;  %v2269_v38 = vpop.f32.mrb[32].mxu1  ;;  %v685_v60 = vadd.f32 %v684_v39, %v683_v27 }
 0x122   :  { %v1633_v28 = vpop.f32.mrb[33].mxu0  ;;  %v1717_v45 = vpop.f32.mrb[33].mxu1  ;;  %v2317_v61 = vadd.f32 %v2212_v40, %v396_v35 }
 0x123   :  { %v399_v51 = vpop.f32.mrb[34].mxu0  ;;  %v2276_v52 = vpop.f32.mrb[34].mxu1  ;;  %v687_v62 = vadd.f32 %v686_v63, %v685_v60 }
 0x124   :  { %v1634_v53 = vpop.f32.mrb[35].mxu0  ;;  %v1718_v54 = vpop.f32.mrb[35].mxu1  ;;  %4514 = vst [vmem:[#allocation10_spill] sm:$0xff] %v2317_v61  ;;  %v690_v16 = vsel %vm658_vm3, %v2317_v61, 0.0 }
 0x125   :  { %v2314_v54 = vadd.f32 %v2212_v40, %v391_v19 }
 0x127   :  { %4513 = vst [vmem:[#allocation9_spill] sm:$0xff] %v2314_v54 }
 0x129   :  { %v404_v3 = vpop.f32.mrb[36].mxu0  ;;  %v2288_v4 = vpop.f32.mrb[36].mxu1 }
 0x12a   :  { %v1637_v41 = vpop.f32.mrb[37].mxu0  ;;  %v1721_v0 = vpop.f32.mrb[37].mxu1  ;;  %v2331_v35 = vadd.f32 %v2212_v40, %v404_v3 }
 0x12b   :  { %v407_v11 = vpop.f32.mrb[38].mxu0  ;;  %v2293_v15 = vpop.f32.mrb[38].mxu1  ;;  %v688_v41 = vsel %vm658_vm3, %v2314_v54, 0.0 }
 0x12c   :  { %v1638_v18 = vpop.f32.mrb[39].mxu0  ;;  %v1722_v20 = vpop.f32.mrb[39].mxu1  ;;  %v689_v46 = vadd.f32 %v688_v41, %v687_v62  ;;  %4516 = vst [vmem:[#allocation12_spill] sm:$0xff] %v2331_v35 }
 0x12d   :  { %v2326_v18 = vadd.f32 %v2212_v40, %v399_v51  ;;  %v2338_v51 = vadd.f32 %v2212_v40, %v407_v11 }
 0x12f   :  { %4515 = vst [vmem:[#allocation11_spill] sm:$0xff] %v2326_v18  ;;  %v692_v63 = vsel %vm658_vm3, %v2326_v18, 0.0  ;;  %4517 = vst [vmem:[#allocation13_spill] sm:$0xff] %v2338_v51 }
 0x131   :  { %v412_v31 = vpop.f32.mrb[40].mxu0  ;;  %v2305_v34 = vpop.f32.mrb[40].mxu1 }
 0x132   :  { %v1641_v28 = vpop.f32.mrb[41].mxu0  ;;  %v1725_v45 = vpop.f32.mrb[41].mxu1  ;;  %v2343_v41 = vadd.f32 %v2212_v40, %v412_v31 }
 0x133   :  { %v415_v50 = vpop.f32.mrb[42].mxu0  ;;  %v2309_v53 = vpop.f32.mrb[42].mxu1  ;;  %v691_v45 = vadd.f32 %v690_v16, %v689_v46 }
 0x134   :  { %v1642_v12 = vpop.f32.mrb[43].mxu0  ;;  %v1726_v56 = vpop.f32.mrb[43].mxu1  ;;  %4518 = vst [vmem:[#allocation14_spill] sm:$0xff] %v2343_v41  ;;  %v698_v11 = vsel %vm658_vm3, %v2343_v41, 0.0 }
 0x135   :  { %v694_v12 = vsel %vm658_vm3, %v2331_v35, 0.0  ;;  %v693_v56 = vadd.f32 %v692_v63, %v691_v45  ;;  %v2352_v45 = vadd.f32 %v2212_v40, %v415_v50 }
 0x137   :  { %4519 = vst [vmem:[#allocation15_spill] sm:$0xff] %v2352_v45 }
 0x139   :  { %v420_v0 = vpop.f32.mrb[44].mxu0  ;;  %v2321_v8 = vpop.f32.mrb[44].mxu1 }
 0x13a   :  { %v1645_v19 = vpop.f32.mrb[45].mxu0  ;;  %v1729_v20 = vpop.f32.mrb[45].mxu1  ;;  %v2355_v31 = vadd.f32 %v2212_v40, %v420_v0 }
 0x13b   :  { %v423_v26 = vpop.f32.mrb[46].mxu0  ;;  %v2328_v27 = vpop.f32.mrb[46].mxu1  ;;  %v695_v20 = vadd.f32 %v694_v12, %v693_v56 }
 0x13c   :  { %v1646_v39 = vpop.f32.mrb[47].mxu0  ;;  %v1730_v28 = vpop.f32.mrb[47].mxu1  ;;  %4520 = vst [vmem:[#allocation16_spill] sm:$0xff] %v2355_v31  ;;  %v702_v50 = vsel %vm658_vm3, %v2355_v31, 0.0 }
 0x13d   :  { %v696_v39 = vsel %vm658_vm3, %v2338_v51, 0.0 }
 0x13e   :  { %v697_v63 = vadd.f32 %v696_v39, %v695_v20  ;;  %v2366_v20 = vadd.f32 %v2212_v40, %v423_v26 }
 0x140   :  { %4521 = vst [vmem:[#allocation17_spill] sm:$0xff] %v2366_v20 }
 0x141   :  { %v428_v60 = vpop.f32.mrb[48].mxu0  ;;  %v2340_v62 = vpop.f32.mrb[48].mxu1 }
 0x142   :  { %v1649_v3 = vpop.f32.mrb[49].mxu0  ;;  %v1733_v19 = vpop.f32.mrb[49].mxu1 }
 0x143   :  { %v431_v16 = vpop.f32.mrb[50].mxu0  ;;  %v2345_v46 = vpop.f32.mrb[50].mxu1  ;;  %v699_v3 = vadd.f32 %v698_v11, %v697_v63  ;;  %v700_v19 = vsel %vm658_vm3, %v2352_v45, 0.0  ;;  %v2369_v63 = vadd.f32 %v2212_v40, %v428_v60 }
 0x144   :  { %v1650_v28 = vpop.f32.mrb[51].mxu0  ;;  %v1734_v35 = vpop.f32.mrb[51].mxu1  ;;  %v2378_v31 = vadd.f32 %v2212_v40, %v431_v16 }
 0x145   :  { %v701_v11 = vadd.f32 %v700_v19, %v699_v3  ;;  %4522 = vst [vmem:[#allocation18_spill] sm:$0xff] %v2369_v63  ;;  %v706_v61 = vsel %vm658_vm3, %v2369_v63, 0.0 }
 0x146   :  { %4523 = vst [vmem:[#allocation19_spill] sm:$0xff] %v2378_v31  ;;  %v708_v54 = vsel %vm658_vm3, %v2378_v31, 0.0 }
 0x147   :  { %v703_v41 = vadd.f32 %v702_v50, %v701_v11 }
 0x149   :  { %v436_v12 = vpop.f32.mrb[52].mxu0  ;;  %v2357_v56 = vpop.f32.mrb[52].mxu1 }
 0x14a   :  { %v1653_v51 = vpop.f32.mrb[53].mxu0  ;;  %v1737_v28 = vpop.f32.mrb[53].mxu1  ;;  %v2383_v60 = vadd.f32 %v2212_v40, %v436_v12 }
 0x14b   :  { %v439_v35 = vpop.f32.mrb[54].mxu0  ;;  %v2361_v18 = vpop.f32.mrb[54].mxu1  ;;  %v704_v51 = vsel %vm658_vm3, %v2366_v20, 0.0 }
 0x14c   :  { %v1654_v0 = vpop.f32.mrb[55].mxu0  ;;  %v1738_v39 = vpop.f32.mrb[55].mxu1  ;;  %4524 = vst [vmem:[#allocation20_spill] sm:$0xff] %v2383_v60  ;;  %v710_v63 = vsel %vm658_vm3, %v2383_v60, 0.0  ;;  %v2390_v16 = vadd.f32 %v2212_v40, %v439_v35 }
 0x14d   :  { %v705_v39 = vadd.f32 %v704_v51, %v703_v41 }
 0x14e   :  { %4525 = vst [vmem:[#allocation21_spill] sm:$0xff] %v2390_v16  ;;  %v712_v31 = vsel %vm658_vm3, %v2390_v16, 0.0 }
 0x14f   :  { %v707_v20 = vadd.f32 %v706_v61, %v705_v39 }
 0x151   :  { %v444_v28 = vpop.f32.mrb[56].mxu0  ;;  %v2373_v45 = vpop.f32.mrb[56].mxu1 }
 0x152   :  { %v1657_v26 = vpop.f32.mrb[57].mxu0  ;;  %v1741_v0 = vpop.f32.mrb[57].mxu1 }
 0x153   :  { %v447_v3 = vpop.f32.mrb[58].mxu0  ;;  %v2380_v19 = vpop.f32.mrb[58].mxu1  ;;  %v709_v26 = vadd.f32 %v708_v54, %v707_v20  ;;  %v2395_v0 = vadd.f32 %v2212_v40, %v444_v28 }
 0x154   :  { %v1658_v50 = vpop.f32.mrb[59].mxu0  ;;  %v1742_v11 = vpop.f32.mrb[59].mxu1  ;;  %v2404_v35 = vadd.f32 %v2212_v40, %v447_v3 }
 0x155   :  { %4526 = vst [vmem:[#allocation22_spill] sm:$0xff] %v2395_v0  ;;  %v711_v11 = vadd.f32 %v710_v63, %v709_v26  ;;  %v714_v54 = vsel %vm658_vm3, %v2395_v0, 0.0 }
 0x156   :  { %4527 = vst [vmem:[#allocation23_spill] sm:$0xff] %v2404_v35 }
 0x157   :  { %v713_v20 = vadd.f32 %v712_v31, %v711_v11 }
 0x159   :  { %v452_v41 = vpop.f32.mrb[60].mxu0  ;;  %v2392_v51 = vpop.f32.mrb[60].mxu1 }
 0x15a   :  { %v1661_v12 = vpop.f32.mrb[61].mxu0  ;;  %v1745_v50 = vpop.f32.mrb[61].mxu1  ;;  %v2407_v28 = vadd.f32 %v2212_v40, %v452_v41 }
 0x15b   :  { %v455_v61 = vpop.f32.mrb[62].mxu0  ;;  %v2397_v39 = vpop.f32.mrb[62].mxu1  ;;  %v715_v12 = vadd.f32 %v714_v54, %v713_v20  ;;  %v716_v50 = vsel %vm658_vm3, %v2404_v35, 0.0 }
 0x15c   :  { %v1662_v60 = vpop.f32.mrb[63].mxu0  ;;  %v1746_v57 = vpop.f32.mrb[63].mxu1  ;;  %4528 = vst [vmem:[#allocation24_spill] sm:$0xff] %v2407_v28  ;;  %v718_v3 = vsel %vm658_vm3, %v2407_v28, 0.0  ;;  %v2418_v31 = vadd.f32 %v2212_v40, %v455_v61 }
 0x15d   :  { %v717_v54 = vadd.f32 %v716_v50, %v715_v12 }
 0x15e   :  { %4529 = vst [vmem:[#allocation25_spill] sm:$0xff] %v2418_v31 }
 0x15f   :  { %v719_v0 = vadd.f32 %v718_v3, %v717_v54 }
 0x161   :  { %v460_v63 = vpop.f32.mrb[64].mxu0  ;;  %v2409_v26 = vpop.f32.mrb[64].mxu1 }
 0x162   :  { %v1665_v16 = vpop.f32.mrb[65].mxu0  ;;  %v1749_v60 = vpop.f32.mrb[65].mxu1  ;;  %v2421_v20 = vadd.f32 %v2212_v40, %v460_v63 }
 0x163   :  { %v463_v57 = vpop.f32.mrb[66].mxu0  ;;  %v2413_v24 = vpop.f32.mrb[66].mxu1  ;;  %v720_v16 = vsel %vm658_vm3, %v2418_v31, 0.0 }
 0x164   :  { %v1666_v41 = vpop.f32.mrb[67].mxu0  ;;  %v1750_v11 = vpop.f32.mrb[67].mxu1  ;;  %4530 = vst [vmem:[#allocation26_spill] sm:$0xff] %v2421_v20  ;;  %v722_v5 = vsel %vm658_vm3, %v2421_v20, 0.0  ;;  %v2430_v28 = vadd.f32 %v2212_v40, %v463_v57 }
 0x165   :  { %v721_v11 = vadd.f32 %v720_v16, %v719_v0 }
 0x166   :  { %4531 = vst [vmem:[#allocation27_spill] sm:$0xff] %v2430_v28  ;;  %v724_v36 = vsel %vm658_vm3, %v2430_v28, 0.0 }
 0x167   :  { %v723_v31 = vadd.f32 %v722_v5, %v721_v11 }
 0x169   :  { %v468_v60 = vpop.f32.mrb[68].mxu0  ;;  %v2425_v35 = vpop.f32.mrb[68].mxu1 }
 0x16a   :  { %v1669_v61 = vpop.f32.mrb[69].mxu0  ;;  %v1753_v41 = vpop.f32.mrb[69].mxu1  ;;  %v2435_v63 = vadd.f32 %v2212_v40, %v468_v60 }
 0x16b   :  { %v471_v12 = vpop.f32.mrb[70].mxu0  ;;  %v2432_v50 = vpop.f32.mrb[70].mxu1  ;;  %v725_v61 = vadd.f32 %v724_v36, %v723_v31 }
 0x16c   :  { %4532 = vst [vmem:[#allocation28_spill] sm:$0xff] %v2435_v63  ;;  %v1670_v3 = vpop.f32.mrb[71].mxu0  ;;  %v1754_v54 = vpop.f32.mrb[71].mxu1  ;;  %v726_v20 = vsel %vm658_vm3, %v2435_v63, 0.0  ;;  %v2442_v57 = vadd.f32 %v2212_v40, %v471_v12 }
 0x16d   :  { %v727_v54 = vadd.f32 %v726_v20, %v725_v61 }
 0x16e   :  { %4533 = vst [vmem:[#allocation29_spill] sm:$0xff] %v2442_v57  ;;  %v728_v28 = vsel %vm658_vm3, %v2442_v57, 0.0 }
 0x16f   :  { %v729_v12 = vadd.f32 %v728_v28, %v727_v54 }
 0x171   :  { %v476_v0 = vpop.f32.mrb[72].mxu0  ;;  %v2444_v16 = vpop.f32.mrb[72].mxu1 }
 0x172   :  { %v2447_v41 = vadd.f32 %v2212_v40, %v476_v0  ;;  %v1673_v60 = vpop.f32.mrb[73].mxu0  ;;  %v1757_v3 = vpop.f32.mrb[73].mxu1 }
 0x173   :  { %v479_v5 = vpop.f32.mrb[74].mxu0  ;;  %v2449_v11 = vpop.f32.mrb[74].mxu1 }
 0x174   :  { %4534 = vst [vmem:[#allocation30_spill] sm:$0xff] %v2447_v41  ;;  %v1674_v63 = vpop.f32.mrb[75].mxu0  ;;  %v1758_v32 = vpop.f32.mrb[75].mxu1  ;;  %v730_v36 = vsel %vm658_vm3, %v2447_v41, 0.0  ;;  %v2456_v31 = vadd.f32 %v2212_v40, %v479_v5 }
 0x175   :  { %v731_v0 = vadd.f32 %v730_v36, %v729_v12 }
 0x176   :  { %4535 = vst [vmem:[#allocation31_spill] sm:$0xff] %v2456_v31  ;;  %v732_v20 = vsel %vm658_vm3, %v2456_v31, 0.0 }
 0x177   :  { %v733_v36 = vadd.f32 %v732_v20, %v731_v0 }
 0x179   :  { %v484_v44 = vpop.f32.mrb[76].mxu0  ;;  %v2458_v60 = vpop.f32.mrb[76].mxu1 }
 0x17a   :  { %v2463_v61 = vadd.f32 %v2212_v40, %v484_v44  ;;  %v1677_v3 = vpop.f32.mrb[77].mxu0  ;;  %v1761_v63 = vpop.f32.mrb[77].mxu1 }
 0x17b   :  { %v487_v32 = vpop.f32.mrb[78].mxu0  ;;  %v655_v57 = vpop.f32.mrb[78].mxu1 }
 0x17c   :  { %4536 = vst [vmem:[#allocation32_spill] sm:$0xff] %v2463_v61  ;;  %v734_v41 = vsel %vm658_vm3, %v2463_v61, 0.0  ;;  %v2468_v5 = vadd.f32 %v2212_v40, %v487_v32  ;;  %v1678_v28 = vpop.f32.mrb[79].mxu0  ;;  %v1762_v54 = vpop.f32.mrb[79].mxu1  ;;  %v2477_v61 = vadd.f32 %v2212_v40, %v2189_v2 }
 0x17d   :  { %v735_v12 = vadd.f32 %v734_v41, %v733_v36  ;;  %v2486_v28 = vadd.f32 %v2212_v40, %v2191_v6  ;;  %v2494_v54 = vadd.f32 %v2212_v40, %v2193_v9 }
 0x17e   :  { %v736_v31 = vsel %vm658_vm3, %v2468_v5, 0.0  ;;  %v742_v2 = vsel %vm658_vm3, %v2477_v61, 0.0 }
 0x17f   :  { %v737_v63 = vadd.f32 %v736_v31, %v735_v12  ;;  %v744_v12 = vsel %vm658_vm3, %v2486_v28, 0.0 }
 0x181   :  { %v492_v30 = vpop.f32.mrb[80].mxu0 }
 0x182   :  { %v2473_v44 = vadd.f32 %v2212_v40, %v492_v30  ;;  %v1681_v3 = vpop.f32.mrb[81].mxu0 }
 0x183   :  { %v495_v57 = vpop.f32.mrb[82].mxu0  ;;  %v2500_v3 = vadd.f32 %v2212_v40, %v2195_v13 }
 0x184   :  { %v738_v32 = vsel %vm658_vm3, %v2473_v44, 0.0  ;;  %v2482_v0 = vadd.f32 %v2212_v40, %v495_v57  ;;  %v1682_v41 = vpop.f32.mrb[83].mxu0  ;;  %v2506_v57 = vadd.f32 %v2212_v40, %v2197_v17 }
 0x185   :  { %v739_v20 = vadd.f32 %v738_v32, %v737_v63  ;;  %v746_v63 = vsel %vm658_vm3, %v2494_v54, 0.0  ;;  %v748_v9 = vsel %vm658_vm3, %v2500_v3, 0.0  ;;  %v2512_v41 = vadd.f32 %v2212_v40, %v2199_v21 }
 0x186   :  { %v740_v30 = vsel %vm658_vm3, %v2482_v0, 0.0  ;;  %v750_v13 = vsel %vm658_vm3, %v2506_v57, 0.0 }
 0x187   :  { %v741_v31 = vadd.f32 %v740_v30, %v739_v20  ;;  %v2518_v30 = vadd.f32 %v2212_v40, %v2201_v25  ;;  %v752_v17 = vsel %vm658_vm3, %v2512_v41, 0.0 }
 0x189   :  { %v743_v36 = vadd.f32 %v742_v2, %v741_v31  ;;  %v2524_v2 = vadd.f32 %v2212_v40, %v2203_v29  ;;  %v754_v21 = vsel %vm658_vm3, %v2518_v30, 0.0 }
 0x18b   :  { %v745_v6 = vadd.f32 %v744_v12, %v743_v36  ;;  %v2530_v12 = vadd.f32 %v2212_v40, %v2205_v33  ;;  %v756_v25 = vsel %vm658_vm3, %v2524_v2, 0.0 }
 0x18d   :  { %v747_v32 = vadd.f32 %v746_v63, %v745_v6  ;;  %v2536_v63 = vadd.f32 %v2212_v40, %v2207_v37  ;;  %v758_v29 = vsel %vm658_vm3, %v2530_v12, 0.0 }
 0x18f   :  { %v749_v20 = vadd.f32 %v748_v9, %v747_v32  ;;  %v2542_v9 = vadd.f32 %v2212_v40, %v2214_v42  ;;  %v760_v33 = vsel %vm658_vm3, %v2536_v63, 0.0 }
 0x191   :  { %v751_v31 = vadd.f32 %v750_v13, %v749_v20  ;;  %v2548_v13 = vadd.f32 %v2212_v40, %v2219_v47  ;;  %v762_v37 = vsel %vm658_vm3, %v2542_v9, 0.0 }
 0x193   :  { %v753_v36 = vadd.f32 %v752_v17, %v751_v31  ;;  %v2554_v17 = vadd.f32 %v2212_v40, %v2236_v58  ;;  %v764_v42 = vsel %vm658_vm3, %v2548_v13, 0.0 }
 0x195   :  { %v755_v6 = vadd.f32 %v754_v21, %v753_v36  ;;  %v2560_v21 = vadd.f32 %v2212_v40, %v2241_v1  ;;  %v766_v47 = vsel %vm658_vm3, %v2554_v17, 0.0 }
 0x197   :  { %v757_v32 = vadd.f32 %v756_v25, %v755_v6  ;;  %v2566_v25 = vadd.f32 %v2212_v40, %v2253_v14  ;;  %v768_v58 = vsel %vm658_vm3, %v2560_v21, 0.0 }
 0x199   :  { %v759_v20 = vadd.f32 %v758_v29, %v757_v32  ;;  %v2572_v29 = vadd.f32 %v2212_v40, %v2257_v22  ;;  %v770_v1 = vsel %vm658_vm3, %v2566_v25, 0.0 }
 0x19b   :  { %v761_v31 = vadd.f32 %v760_v33, %v759_v20  ;;  %v2578_v33 = vadd.f32 %v2212_v40, %v2269_v38  ;;  %v772_v14 = vsel %vm658_vm3, %v2572_v29, 0.0 }
 0x19d   :  { %v763_v36 = vadd.f32 %v762_v37, %v761_v31  ;;  %v2584_v37 = vadd.f32 %v2212_v40, %v2276_v52  ;;  %v774_v22 = vsel %vm658_vm3, %v2578_v33, 0.0 }
 0x19f   :  { %v765_v6 = vadd.f32 %v764_v42, %v763_v36  ;;  %v2590_v42 = vadd.f32 %v2212_v40, %v2288_v4  ;;  %v776_v38 = vsel %vm658_vm3, %v2584_v37, 0.0 }
 0x1a1   :  { %v767_v32 = vadd.f32 %v766_v47, %v765_v6  ;;  %v2596_v47 = vadd.f32 %v2212_v40, %v2293_v15  ;;  %v778_v52 = vsel %vm658_vm3, %v2590_v42, 0.0 }
 0x1a3   :  { %v769_v20 = vadd.f32 %v768_v58, %v767_v32  ;;  %v2602_v58 = vadd.f32 %v2212_v40, %v2305_v34  ;;  %v780_v4 = vsel %vm658_vm3, %v2596_v47, 0.0 }
 0x1a5   :  { %v771_v31 = vadd.f32 %v770_v1, %v769_v20  ;;  %v2608_v1 = vadd.f32 %v2212_v40, %v2309_v53  ;;  %v782_v15 = vsel %vm658_vm3, %v2602_v58, 0.0 }
 0x1a7   :  { %v773_v36 = vadd.f32 %v772_v14, %v771_v31  ;;  %v2614_v14 = vadd.f32 %v2212_v40, %v2321_v8  ;;  %v784_v34 = vsel %vm658_vm3, %v2608_v1, 0.0 }
 0x1a9   :  { %v775_v6 = vadd.f32 %v774_v22, %v773_v36  ;;  %v2620_v22 = vadd.f32 %v2212_v40, %v2328_v27  ;;  %v786_v53 = vsel %vm658_vm3, %v2614_v14, 0.0 }
 0x1ab   :  { %v777_v32 = vadd.f32 %v776_v38, %v775_v6  ;;  %v2626_v38 = vadd.f32 %v2212_v40, %v2340_v62  ;;  %v788_v8 = vsel %vm658_vm3, %v2620_v22, 0.0 }
 0x1ad   :  { %v779_v20 = vadd.f32 %v778_v52, %v777_v32  ;;  %v2632_v52 = vadd.f32 %v2212_v40, %v2345_v46  ;;  %v790_v27 = vsel %vm658_vm3, %v2626_v38, 0.0 }
 0x1af   :  { %v781_v31 = vadd.f32 %v780_v4, %v779_v20  ;;  %v2638_v4 = vadd.f32 %v2212_v40, %v2357_v56  ;;  %v792_v62 = vsel %vm658_vm3, %v2632_v52, 0.0 }
 0x1b1   :  { %v783_v36 = vadd.f32 %v782_v15, %v781_v31  ;;  %v2644_v15 = vadd.f32 %v2212_v40, %v2361_v18  ;;  %v794_v46 = vsel %vm658_vm3, %v2638_v4, 0.0 }
 0x1b3   :  { %v785_v6 = vadd.f32 %v784_v34, %v783_v36  ;;  %v2650_v34 = vadd.f32 %v2212_v40, %v2373_v45  ;;  %v796_v56 = vsel %vm658_vm3, %v2644_v15, 0.0 }
 0x1b5   :  { %v787_v32 = vadd.f32 %v786_v53, %v785_v6  ;;  %v2656_v53 = vadd.f32 %v2212_v40, %v2380_v19  ;;  %v798_v18 = vsel %vm658_vm3, %v2650_v34, 0.0  ;;  %v2670_v19 = vadd.f32 %v2212_v40, %v2397_v39 }
 0x1b7   :  { %v789_v20 = vadd.f32 %v788_v8, %v787_v32  ;;  %v2662_v8 = vadd.f32 %v2212_v40, %v2392_v51  ;;  %v800_v45 = vsel %vm658_vm3, %v2656_v53, 0.0  ;;  %v2676_v51 = vadd.f32 %v2212_v40, %v2409_v26 }
 0x1b9   :  { %v791_v31 = vadd.f32 %v790_v27, %v789_v20 }
 0x1bb   :  { %v793_v36 = vadd.f32 %v792_v62, %v791_v31  ;;  %v802_v31 = vsel %vm658_vm3, %v2662_v8, 0.0 }
 0x1bd   :  { %v795_v6 = vadd.f32 %v794_v46, %v793_v36  ;;  %v804_v36 = vsel %vm658_vm3, %v2670_v19, 0.0 }
 0x1bf   :  { %v797_v32 = vadd.f32 %v796_v56, %v795_v6  ;;  %v806_v6 = vsel %vm658_vm3, %v2676_v51, 0.0  ;;  %v2682_v56 = vadd.f32 %v2212_v40, %v2413_v24 }
 0x1c1   :  { %v799_v20 = vadd.f32 %v798_v18, %v797_v32  ;;  %v808_v39 = vsel %vm658_vm3, %v2682_v56, 0.0  ;;  %v2688_v18 = vadd.f32 %v2212_v40, %v2425_v35 }
 0x1c3   :  { %v801_v27 = vadd.f32 %v800_v45, %v799_v20  ;;  %v810_v26 = vsel %vm658_vm3, %v2688_v18, 0.0  ;;  %v2694_v45 = vadd.f32 %v2212_v40, %v2432_v50  ;;  %v2710_v50 = vadd.f32 %v2212_v40, %v2458_v60 }
 0x1c5   :  { %v803_v62 = vadd.f32 %v802_v31, %v801_v27  ;;  %4537 = vst [vmem:[#allocation33_spill] sm:$0xff] %v2694_v45  ;;  %v812_v24 = vsel %vm658_vm3, %v2694_v45, 0.0  ;;  %v2700_v31 = vadd.f32 %v2212_v40, %v2444_v16  ;;  %v818_v16 = vsel %vm658_vm3, %v2710_v50, 0.0 }
 0x1c7   :  { %v805_v46 = vadd.f32 %v804_v36, %v803_v62  ;;  %4538 = vst [vmem:[#allocation34_spill] sm:$0xff] %v2700_v31  ;;  %v814_v35 = vsel %vm658_vm3, %v2700_v31, 0.0  ;;  %v2706_v36 = vadd.f32 %v2212_v40, %v2449_v11 }
 0x1c9   :  { %v807_v32 = vadd.f32 %v806_v6, %v805_v46  ;;  %v816_v6 = vsel %vm658_vm3, %v2706_v36, 0.0 }
 0x1cb   :  { %v809_v20 = vadd.f32 %v808_v39, %v807_v32 }
 0x1cd   :  { %v811_v27 = vadd.f32 %v810_v26, %v809_v20 }
 0x1cf   :  { %v813_v62 = vadd.f32 %v812_v24, %v811_v27 }
 0x1d1   :  { %v815_v46 = vadd.f32 %v814_v35, %v813_v62 }
 0x1d3   :  { %v817_v32 = vadd.f32 %v816_v6, %v815_v46 }
 0x1d5   :  { %v819_v39 = vadd.f32 %v818_v16, %v817_v32 }
 0x1d7   :  { %v820_v20 = vrot.slane %v819_v39, 4 }
 0x1d9   :  { %v821_v26 = vadd.f32 %v820_v20, %v819_v39 }
 0x1db   :  { %v822_v27 = vrot.slane %v821_v26, 2 }
 0x1dd   :  { %v823_v24 = vadd.f32 %v822_v27, %v821_v26 }
 0x1df   :  { %v824_v31 = vrot.slane %v823_v24, 1 }
 0x1e1   :  { %v825_v11 = vadd.f32 %v824_v31, %v823_v24 }
 0x1e3   :  { %v2716_v45 = vmul.f32 0.0015432099, %v825_v11 }
 0x1e5   :  { %v2720_v40 = vsub.f32 %v2222_v48, %v2716_v45  ;;  %v2724_v60 = vsub.f32 %v2217_v43, %v2716_v45  ;;  %v2728_v62 = vsub.f32 %v2225_v49, %v2716_v45  ;;  %v2732_v35 = vsub.f32 %v2234_v55, %v2716_v45 }
 0x1e6   :  { %v2740_v48 = vsub.f32 %v2239_v59, %v2716_v45  ;;  %v2746_v49 = vsub.f32 %v2248_v7, %v2716_v45  ;;  %v2754_v39 = vsub.f32 %v2251_v10, %v2716_v45  ;;  %v2761_v7 = vsub.f32 %v2262_v23, %v2716_v45 }
 0x1e7   :  { %v909_v31 = vmul.f32 %v2720_v40, %v2720_v40  ;;  %v910_v46 = vmul.f32 %v2724_v60, %v2724_v60  ;;  %v911_v43 = vmul.f32 %v2728_v62, %v2728_v62  ;;  %v912_v55 = vmul.f32 %v2732_v35, %v2732_v35 }
 0x1e8   :  { %v913_v59 = vmul.f32 %v2740_v48, %v2740_v48  ;;  %4539 = vst [vmem:[#allocation35_spill] sm:$0xff] %v2761_v7  ;;  %v914_v27 = vmul.f32 %v2746_v49, %v2746_v49 }
 0x1e9   :  { %v990_v6 = vsel %vm658_vm3, %v909_v31, 0.0  ;;  %v991_v32 = vsel %vm658_vm3, %v910_v46, 0.0  ;;  %v993_v20 = vsel %vm658_vm3, %v911_v43, 0.0  ;;  %v995_v24 = vsel %vm658_vm3, %v912_v55, 0.0  ;;  %v4540_v31 = vld [vmem:[#allocation2_spill] sm:$0xff] }
 0x1ea   :  { %v992_v16 = vadd.f32 %v991_v32, %v990_v6  ;;  %v2768_v10 = vsub.f32 %v4540_v31, %v2716_v45  ;;  %v915_v46 = vmul.f32 %v2754_v39, %v2754_v39  ;;  %v997_v43 = vsel %vm658_vm3, %v913_v59, 0.0  ;;  %v4542_v32 = vld [vmem:[#allocation3_spill] sm:$0xff] }
 0x1eb   :  { %v2775_v23 = vsub.f32 %v4542_v32, %v2716_v45  ;;  %v999_v55 = vsel %vm658_vm3, %v914_v27, 0.0 }
 0x1ec   :  { %v994_v26 = vadd.f32 %v993_v20, %v992_v16  ;;  %4541 = vst [vmem:[#allocation2_spill] sm:$0xff] %v2768_v10  ;;  %v916_v16 = vmul.f32 %v2761_v7, %v2761_v7  ;;  %v917_v31 = vmul.f32 %v2768_v10, %v2768_v10  ;;  %v1001_v59 = vsel %vm658_vm3, %v915_v46, 0.0 }
 0x1ed   :  { %4543 = vst [vmem:[#allocation3_spill] sm:$0xff] %v2775_v23  ;;  %v918_v7 = vmul.f32 %v2775_v23, %v2775_v23 }
 0x1ee   :  { %v996_v11 = vadd.f32 %v995_v24, %v994_v26  ;;  %v4544_v26 = vld [vmem:[#allocation4_spill] sm:$0xff]  ;;  %v1003_v27 = vsel %vm658_vm3, %v916_v16, 0.0  ;;  %v1005_v46 = vsel %vm658_vm3, %v917_v31, 0.0 }
 0x1ef   :  { %v2782_v24 = vsub.f32 %v4544_v26, %v2716_v45  ;;  %v1007_v16 = vsel %vm658_vm3, %v918_v7, 0.0 }
 0x1f0   :  { %v998_v6 = vadd.f32 %v997_v43, %v996_v11  ;;  %v4546_v43 = vld [vmem:[#allocation5_spill] sm:$0xff] }
 0x1f1   :  { %4545 = vst [vmem:[#allocation4_spill] sm:$0xff] %v2782_v24  ;;  %v2789_v32 = vsub.f32 %v4546_v43, %v2716_v45  ;;  %v919_v10 = vmul.f32 %v2782_v24, %v2782_v24 }
 0x1f2   :  { %v1000_v20 = vadd.f32 %v999_v55, %v998_v6  ;;  %v4548_v55 = vld [vmem:[#allocation6_spill] sm:$0xff] }
 0x1f3   :  { %4547 = vst [vmem:[#allocation5_spill] sm:$0xff] %v2789_v32  ;;  %v2796_v26 = vsub.f32 %v4548_v55, %v2716_v45  ;;  %v920_v23 = vmul.f32 %v2789_v32, %v2789_v32  ;;  %v1009_v31 = vsel %vm658_vm3, %v919_v10, 0.0 }
 0x1f4   :  { %v1002_v11 = vadd.f32 %v1001_v59, %v1000_v20  ;;  %v4550_v59 = vld [vmem:[#allocation7_spill] sm:$0xff] }
 0x1f5   :  { %4549 = vst [vmem:[#allocation6_spill] sm:$0xff] %v2796_v26  ;;  %v2803_v43 = vsub.f32 %v4550_v59, %v2716_v45  ;;  %v921_v24 = vmul.f32 %v2796_v26, %v2796_v26  ;;  %v1011_v7 = vsel %vm658_vm3, %v920_v23, 0.0 }
 0x1f6   :  { %v1004_v6 = vadd.f32 %v1003_v27, %v1002_v11  ;;  %v4552_v27 = vld [vmem:[#allocation8_spill] sm:$0xff] }
 0x1f7   :  { %4551 = vst [vmem:[#allocation7_spill] sm:$0xff] %v2803_v43  ;;  %v2810_v55 = vsub.f32 %v4552_v27, %v2716_v45  ;;  %v922_v32 = vmul.f32 %v2803_v43, %v2803_v43  ;;  %v1013_v10 = vsel %vm658_vm3, %v921_v24, 0.0 }
 0x1f8   :  { %v1006_v20 = vadd.f32 %v1005_v46, %v1004_v6  ;;  %v4554_v46 = vld [vmem:[#allocation9_spill] sm:$0xff] }
 0x1f9   :  { %4553 = vst [vmem:[#allocation8_spill] sm:$0xff] %v2810_v55  ;;  %v2817_v59 = vsub.f32 %v4554_v46, %v2716_v45  ;;  %v923_v26 = vmul.f32 %v2810_v55, %v2810_v55  ;;  %v1015_v23 = vsel %vm658_vm3, %v922_v32, 0.0 }
 0x1fa   :  { %v1008_v11 = vadd.f32 %v1007_v16, %v1006_v20  ;;  %v4556_v16 = vld [vmem:[#allocation10_spill] sm:$0xff] }
 0x1fb   :  { %4555 = vst [vmem:[#allocation9_spill] sm:$0xff] %v2817_v59  ;;  %v2824_v27 = vsub.f32 %v4556_v16, %v2716_v45  ;;  %v924_v43 = vmul.f32 %v2817_v59, %v2817_v59  ;;  %v1017_v24 = vsel %vm658_vm3, %v923_v26, 0.0 }
 0x1fc   :  { %v1010_v6 = vadd.f32 %v1009_v31, %v1008_v11  ;;  %v4558_v31 = vld [vmem:[#allocation11_spill] sm:$0xff] }
 0x1fd   :  { %4557 = vst [vmem:[#allocation10_spill] sm:$0xff] %v2824_v27  ;;  %v2831_v46 = vsub.f32 %v4558_v31, %v2716_v45  ;;  %v925_v55 = vmul.f32 %v2824_v27, %v2824_v27  ;;  %v1019_v32 = vsel %vm658_vm3, %v924_v43, 0.0 }
 0x1fe   :  { %v1012_v20 = vadd.f32 %v1011_v7, %v1010_v6  ;;  %v4560_v7 = vld [vmem:[#allocation12_spill] sm:$0xff] }
 0x1ff   :  { %4559 = vst [vmem:[#allocation11_spill] sm:$0xff] %v2831_v46  ;;  %v2838_v16 = vsub.f32 %v4560_v7, %v2716_v45  ;;  %v926_v59 = vmul.f32 %v2831_v46, %v2831_v46  ;;  %v1021_v26 = vsel %vm658_vm3, %v925_v55, 0.0 }
 0x200   :  { %v1014_v11 = vadd.f32 %v1013_v10, %v1012_v20  ;;  %v4562_v10 = vld [vmem:[#allocation13_spill] sm:$0xff] }
 0x201   :  { %4561 = vst [vmem:[#allocation12_spill] sm:$0xff] %v2838_v16  ;;  %v2845_v31 = vsub.f32 %v4562_v10, %v2716_v45  ;;  %v927_v27 = vmul.f32 %v2838_v16, %v2838_v16  ;;  %v1023_v43 = vsel %vm658_vm3, %v926_v59, 0.0 }
 0x202   :  { %v1016_v6 = vadd.f32 %v1015_v23, %v1014_v11  ;;  %v4564_v23 = vld [vmem:[#allocation14_spill] sm:$0xff] }
 0x203   :  { %4563 = vst [vmem:[#allocation13_spill] sm:$0xff] %v2845_v31  ;;  %v2852_v7 = vsub.f32 %v4564_v23, %v2716_v45  ;;  %v928_v46 = vmul.f32 %v2845_v31, %v2845_v31  ;;  %v1025_v55 = vsel %vm658_vm3, %v927_v27, 0.0 }
 0x204   :  { %v1018_v20 = vadd.f32 %v1017_v24, %v1016_v6  ;;  %v4566_v24 = vld [vmem:[#allocation15_spill] sm:$0xff] }
 0x205   :  { %4565 = vst [vmem:[#allocation14_spill] sm:$0xff] %v2852_v7  ;;  %v2859_v10 = vsub.f32 %v4566_v24, %v2716_v45  ;;  %v929_v16 = vmul.f32 %v2852_v7, %v2852_v7  ;;  %v1027_v59 = vsel %vm658_vm3, %v928_v46, 0.0 }
 0x206   :  { %v1020_v11 = vadd.f32 %v1019_v32, %v1018_v20  ;;  %v4568_v32 = vld [vmem:[#allocation16_spill] sm:$0xff] }
 0x207   :  { %4567 = vst [vmem:[#allocation15_spill] sm:$0xff] %v2859_v10  ;;  %v2866_v23 = vsub.f32 %v4568_v32, %v2716_v45  ;;  %v930_v31 = vmul.f32 %v2859_v10, %v2859_v10  ;;  %v1029_v27 = vsel %vm658_vm3, %v929_v16, 0.0 }
 0x208   :  { %v1022_v6 = vadd.f32 %v1021_v26, %v1020_v11  ;;  %v4570_v26 = vld [vmem:[#allocation17_spill] sm:$0xff] }
 0x209   :  { %4569 = vst [vmem:[#allocation16_spill] sm:$0xff] %v2866_v23  ;;  %v2873_v24 = vsub.f32 %v4570_v26, %v2716_v45  ;;  %v931_v7 = vmul.f32 %v2866_v23, %v2866_v23  ;;  %v1031_v46 = vsel %vm658_vm3, %v930_v31, 0.0 }
 0x20a   :  { %v1024_v20 = vadd.f32 %v1023_v43, %v1022_v6  ;;  %v4572_v43 = vld [vmem:[#allocation18_spill] sm:$0xff] }
 0x20b   :  { %4571 = vst [vmem:[#allocation17_spill] sm:$0xff] %v2873_v24  ;;  %v2880_v32 = vsub.f32 %v4572_v43, %v2716_v45  ;;  %v932_v10 = vmul.f32 %v2873_v24, %v2873_v24  ;;  %v1033_v16 = vsel %vm658_vm3, %v931_v7, 0.0 }
 0x20c   :  { %v1026_v11 = vadd.f32 %v1025_v55, %v1024_v20  ;;  %v4574_v55 = vld [vmem:[#allocation19_spill] sm:$0xff] }
 0x20d   :  { %4573 = vst [vmem:[#allocation18_spill] sm:$0xff] %v2880_v32  ;;  %v2887_v26 = vsub.f32 %v4574_v55, %v2716_v45  ;;  %v933_v23 = vmul.f32 %v2880_v32, %v2880_v32  ;;  %v1035_v31 = vsel %vm658_vm3, %v932_v10, 0.0 }
 0x20e   :  { %v1028_v6 = vadd.f32 %v1027_v59, %v1026_v11  ;;  %v4576_v59 = vld [vmem:[#allocation20_spill] sm:$0xff] }
 0x20f   :  { %4575 = vst [vmem:[#allocation19_spill] sm:$0xff] %v2887_v26  ;;  %v2894_v43 = vsub.f32 %v4576_v59, %v2716_v45  ;;  %v934_v24 = vmul.f32 %v2887_v26, %v2887_v26  ;;  %v1037_v7 = vsel %vm658_vm3, %v933_v23, 0.0 }
 0x210   :  { %v1030_v20 = vadd.f32 %v1029_v27, %v1028_v6  ;;  %v4578_v27 = vld [vmem:[#allocation21_spill] sm:$0xff] }
 0x211   :  { %4577 = vst [vmem:[#allocation20_spill] sm:$0xff] %v2894_v43  ;;  %v2901_v55 = vsub.f32 %v4578_v27, %v2716_v45  ;;  %v935_v32 = vmul.f32 %v2894_v43, %v2894_v43  ;;  %v1039_v10 = vsel %vm658_vm3, %v934_v24, 0.0 }
 0x212   :  { %v1032_v11 = vadd.f32 %v1031_v46, %v1030_v20  ;;  %v4580_v46 = vld [vmem:[#allocation22_spill] sm:$0xff] }
 0x213   :  { %4579 = vst [vmem:[#allocation21_spill] sm:$0xff] %v2901_v55  ;;  %v2908_v59 = vsub.f32 %v4580_v46, %v2716_v45  ;;  %v936_v26 = vmul.f32 %v2901_v55, %v2901_v55  ;;  %v1041_v23 = vsel %vm658_vm3, %v935_v32, 0.0 }
 0x214   :  { %v1034_v6 = vadd.f32 %v1033_v16, %v1032_v11  ;;  %v4582_v16 = vld [vmem:[#allocation23_spill] sm:$0xff] }
 0x215   :  { %4581 = vst [vmem:[#allocation22_spill] sm:$0xff] %v2908_v59  ;;  %v2915_v27 = vsub.f32 %v4582_v16, %v2716_v45  ;;  %v937_v43 = vmul.f32 %v2908_v59, %v2908_v59  ;;  %v1043_v24 = vsel %vm658_vm3, %v936_v26, 0.0 }
 0x216   :  { %v1036_v20 = vadd.f32 %v1035_v31, %v1034_v6  ;;  %v4584_v31 = vld [vmem:[#allocation24_spill] sm:$0xff] }
 0x217   :  { %4583 = vst [vmem:[#allocation23_spill] sm:$0xff] %v2915_v27  ;;  %v2922_v46 = vsub.f32 %v4584_v31, %v2716_v45  ;;  %v938_v55 = vmul.f32 %v2915_v27, %v2915_v27  ;;  %v1045_v32 = vsel %vm658_vm3, %v937_v43, 0.0 }
 0x218   :  { %v1038_v11 = vadd.f32 %v1037_v7, %v1036_v20  ;;  %v4586_v7 = vld [vmem:[#allocation25_spill] sm:$0xff] }
 0x219   :  { %4585 = vst [vmem:[#allocation24_spill] sm:$0xff] %v2922_v46  ;;  %v2929_v16 = vsub.f32 %v4586_v7, %v2716_v45  ;;  %v939_v59 = vmul.f32 %v2922_v46, %v2922_v46  ;;  %v1047_v26 = vsel %vm658_vm3, %v938_v55, 0.0 }
 0x21a   :  { %v1040_v6 = vadd.f32 %v1039_v10, %v1038_v11  ;;  %v4588_v10 = vld [vmem:[#allocation26_spill] sm:$0xff] }
 0x21b   :  { %4587 = vst [vmem:[#allocation25_spill] sm:$0xff] %v2929_v16  ;;  %v2936_v31 = vsub.f32 %v4588_v10, %v2716_v45  ;;  %v940_v27 = vmul.f32 %v2929_v16, %v2929_v16  ;;  %v1049_v43 = vsel %vm658_vm3, %v939_v59, 0.0 }
 0x21c   :  { %v1042_v20 = vadd.f32 %v1041_v23, %v1040_v6  ;;  %v4590_v23 = vld [vmem:[#allocation27_spill] sm:$0xff] }
 0x21d   :  { %4589 = vst [vmem:[#allocation26_spill] sm:$0xff] %v2936_v31  ;;  %v2943_v7 = vsub.f32 %v4590_v23, %v2716_v45  ;;  %v941_v46 = vmul.f32 %v2936_v31, %v2936_v31  ;;  %v1051_v55 = vsel %vm658_vm3, %v940_v27, 0.0 }
 0x21e   :  { %v1044_v11 = vadd.f32 %v1043_v24, %v1042_v20  ;;  %v4592_v24 = vld [vmem:[#allocation28_spill] sm:$0xff] }
 0x21f   :  { %4591 = vst [vmem:[#allocation27_spill] sm:$0xff] %v2943_v7  ;;  %v2950_v10 = vsub.f32 %v4592_v24, %v2716_v45  ;;  %v942_v16 = vmul.f32 %v2943_v7, %v2943_v7  ;;  %v1053_v59 = vsel %vm658_vm3, %v941_v46, 0.0 }
 0x220   :  { %v1046_v6 = vadd.f32 %v1045_v32, %v1044_v11  ;;  %v4594_v32 = vld [vmem:[#allocation29_spill] sm:$0xff] }
 0x221   :  { %4593 = vst [vmem:[#allocation28_spill] sm:$0xff] %v2950_v10  ;;  %v2957_v23 = vsub.f32 %v4594_v32, %v2716_v45  ;;  %v943_v31 = vmul.f32 %v2950_v10, %v2950_v10  ;;  %v1055_v27 = vsel %vm658_vm3, %v942_v16, 0.0 }
 0x222   :  { %v1048_v20 = vadd.f32 %v1047_v26, %v1046_v6  ;;  %v4595_v26 = vld [vmem:[#allocation30_spill] sm:$0xff] }
 0x223   :  { %v2964_v24 = vsub.f32 %v4595_v26, %v2716_v45  ;;  %v944_v7 = vmul.f32 %v2957_v23, %v2957_v23  ;;  %v1057_v46 = vsel %vm658_vm3, %v943_v31, 0.0 }
 0x224   :  { %v1050_v11 = vadd.f32 %v1049_v43, %v1048_v20  ;;  %v4596_v43 = vld [vmem:[#allocation31_spill] sm:$0xff] }
 0x225   :  { %v2971_v32 = vsub.f32 %v4596_v43, %v2716_v45  ;;  %v945_v10 = vmul.f32 %v2964_v24, %v2964_v24  ;;  %v1059_v16 = vsel %vm658_vm3, %v944_v7, 0.0 }
 0x226   :  { %v1052_v6 = vadd.f32 %v1051_v55, %v1050_v11  ;;  %v4597_v55 = vld [vmem:[#allocation32_spill] sm:$0xff] }
 0x227   :  { %v2978_v26 = vsub.f32 %v4597_v55, %v2716_v45  ;;  %v946_v43 = vmul.f32 %v2971_v32, %v2971_v32  ;;  %v1061_v31 = vsel %vm658_vm3, %v945_v10, 0.0 }
 0x228   :  { %v1054_v20 = vadd.f32 %v1053_v59, %v1052_v6  ;;  %v2985_v59 = vsub.f32 %v2468_v5, %v2716_v45  ;;  %v2999_v5 = vsub.f32 %v2482_v0, %v2716_v45  ;;  %v3013_v0 = vsub.f32 %v2486_v28, %v2716_v45 }
 0x229   :  { %v947_v55 = vmul.f32 %v2978_v26, %v2978_v26  ;;  %v1063_v7 = vsel %vm658_vm3, %v946_v43, 0.0  ;;  %v3027_v28 = vsub.f32 %v2500_v3, %v2716_v45  ;;  %v3041_v3 = vsub.f32 %v2512_v41, %v2716_v45 }
 0x22a   :  { %v1056_v11 = vadd.f32 %v1055_v27, %v1054_v20  ;;  %v2992_v27 = vsub.f32 %v2473_v44, %v2716_v45  ;;  %v3006_v44 = vsub.f32 %v2477_v61, %v2716_v45  ;;  %v3020_v61 = vsub.f32 %v2494_v54, %v2716_v45 }
 0x22b   :  { %v1065_v10 = vsel %vm658_vm3, %v947_v55, 0.0  ;;  %v3034_v54 = vsub.f32 %v2506_v57, %v2716_v45  ;;  %v3048_v57 = vsub.f32 %v2518_v30, %v2716_v45  ;;  %v3055_v41 = vsub.f32 %v2524_v2, %v2716_v45 }
 0x22c   :  { %v1058_v6 = vadd.f32 %v1057_v46, %v1056_v11  ;;  %v948_v46 = vmul.f32 %v2985_v59, %v2985_v59  ;;  %v3062_v30 = vsub.f32 %v2530_v12, %v2716_v45  ;;  %v3069_v2 = vsub.f32 %v2536_v63, %v2716_v45 }
 0x22d   :  { %v3076_v12 = vsub.f32 %v2542_v9, %v2716_v45  ;;  %v3083_v63 = vsub.f32 %v2548_v13, %v2716_v45  ;;  %v3090_v9 = vsub.f32 %v2554_v17, %v2716_v45  ;;  %v3097_v13 = vsub.f32 %v2560_v21, %v2716_v45 }
 0x22e   :  { %v1060_v20 = vadd.f32 %v1059_v16, %v1058_v6  ;;  %v949_v16 = vmul.f32 %v2992_v27, %v2992_v27  ;;  %v1067_v43 = vsel %vm658_vm3, %v948_v46, 0.0  ;;  %v3104_v17 = vsub.f32 %v2566_v25, %v2716_v45 }
 0x22f   :  { %v3111_v21 = vsub.f32 %v2572_v29, %v2716_v45  ;;  %v3118_v25 = vsub.f32 %v2578_v33, %v2716_v45  ;;  %v3125_v29 = vsub.f32 %v2584_v37, %v2716_v45  ;;  %v3132_v33 = vsub.f32 %v2590_v42, %v2716_v45 }
 0x230   :  { %v1062_v11 = vadd.f32 %v1061_v31, %v1060_v20  ;;  %v950_v31 = vmul.f32 %v2999_v5, %v2999_v5  ;;  %v1069_v55 = vsel %vm658_vm3, %v949_v16, 0.0  ;;  %v3139_v37 = vsub.f32 %v2596_v47, %v2716_v45 }
 0x231   :  { %v3146_v42 = vsub.f32 %v2602_v58, %v2716_v45  ;;  %v3153_v47 = vsub.f32 %v2608_v1, %v2716_v45  ;;  %v3160_v58 = vsub.f32 %v2614_v14, %v2716_v45  ;;  %v3167_v1 = vsub.f32 %v2620_v22, %v2716_v45 }
 0x232   :  { %v1064_v6 = vadd.f32 %v1063_v7, %v1062_v11  ;;  %v951_v7 = vmul.f32 %v3006_v44, %v3006_v44  ;;  %v1071_v46 = vsel %vm658_vm3, %v950_v31, 0.0  ;;  %v3174_v14 = vsub.f32 %v2626_v38, %v2716_v45 }
 0x233   :  { %v3181_v22 = vsub.f32 %v2632_v52, %v2716_v45  ;;  %v3188_v38 = vsub.f32 %v2638_v4, %v2716_v45  ;;  %v3195_v52 = vsub.f32 %v2644_v15, %v2716_v45  ;;  %v3202_v4 = vsub.f32 %v2650_v34, %v2716_v45 }
 0x234   :  { %v1066_v20 = vadd.f32 %v1065_v10, %v1064_v6  ;;  %v952_v10 = vmul.f32 %v3013_v0, %v3013_v0  ;;  %v1073_v16 = vsel %vm658_vm3, %v951_v7, 0.0  ;;  %v3209_v15 = vsub.f32 %v2656_v53, %v2716_v45 }
 0x235   :  { %v3216_v34 = vsub.f32 %v2662_v8, %v2716_v45  ;;  %v3223_v53 = vsub.f32 %v2670_v19, %v2716_v45  ;;  %v3230_v8 = vsub.f32 %v2676_v51, %v2716_v45  ;;  %v3237_v19 = vsub.f32 %v2682_v56, %v2716_v45 }
 0x236   :  { %v1068_v11 = vadd.f32 %v1067_v43, %v1066_v20  ;;  %v953_v43 = vmul.f32 %v3020_v61, %v3020_v61  ;;  %v1075_v31 = vsel %vm658_vm3, %v952_v10, 0.0  ;;  %v3244_v51 = vsub.f32 %v2688_v18, %v2716_v45 }
 0x237   :  { %4598 = vst [vmem:[#allocation29_spill] sm:$0xff] %v3216_v34  ;;  %4599 = vst [vmem:[#allocation30_spill] sm:$0xff] %v3223_v53 }
 0x238   :  { %v1070_v6 = vadd.f32 %v1069_v55, %v1068_v11  ;;  %v954_v55 = vmul.f32 %v3027_v28, %v3027_v28  ;;  %v1077_v7 = vsel %vm658_vm3, %v953_v43, 0.0  ;;  %4600 = vst [vmem:[#allocation31_spill] sm:$0xff] %v3230_v8  ;;  %4601 = vst [vmem:[#allocation32_spill] sm:$0xff] %v3237_v19 }
 0x239   :  { %4602 = vst [vmem:[#allocation36_spill] sm:$0xff] %v3244_v51 }
 0x23a   :  { %v1072_v20 = vadd.f32 %v1071_v46, %v1070_v6  ;;  %v955_v46 = vmul.f32 %v3034_v54, %v3034_v54  ;;  %v1079_v10 = vsel %vm658_vm3, %v954_v55, 0.0 }
 0x23c   :  { %v1074_v11 = vadd.f32 %v1073_v16, %v1072_v20  ;;  %v956_v16 = vmul.f32 %v3041_v3, %v3041_v3  ;;  %v1081_v43 = vsel %vm658_vm3, %v955_v46, 0.0 }
 0x23e   :  { %v1076_v6 = vadd.f32 %v1075_v31, %v1074_v11  ;;  %v957_v31 = vmul.f32 %v3048_v57, %v3048_v57  ;;  %v1083_v55 = vsel %vm658_vm3, %v956_v16, 0.0 }
 0x240   :  { %v1078_v20 = vadd.f32 %v1077_v7, %v1076_v6  ;;  %v958_v7 = vmul.f32 %v3055_v41, %v3055_v41  ;;  %v1085_v46 = vsel %vm658_vm3, %v957_v31, 0.0 }
 0x242   :  { %v1080_v11 = vadd.f32 %v1079_v10, %v1078_v20  ;;  %v959_v10 = vmul.f32 %v3062_v30, %v3062_v30  ;;  %v1087_v16 = vsel %vm658_vm3, %v958_v7, 0.0 }
 0x244   :  { %v1082_v6 = vadd.f32 %v1081_v43, %v1080_v11  ;;  %v960_v43 = vmul.f32 %v3069_v2, %v3069_v2  ;;  %v1089_v31 = vsel %vm658_vm3, %v959_v10, 0.0 }
 0x246   :  { %v1084_v20 = vadd.f32 %v1083_v55, %v1082_v6  ;;  %v961_v55 = vmul.f32 %v3076_v12, %v3076_v12  ;;  %v1091_v7 = vsel %vm658_vm3, %v960_v43, 0.0 }
 0x248   :  { %v1086_v11 = vadd.f32 %v1085_v46, %v1084_v20  ;;  %v962_v46 = vmul.f32 %v3083_v63, %v3083_v63  ;;  %v1093_v10 = vsel %vm658_vm3, %v961_v55, 0.0 }
 0x24a   :  { %v1088_v6 = vadd.f32 %v1087_v16, %v1086_v11  ;;  %v963_v16 = vmul.f32 %v3090_v9, %v3090_v9  ;;  %v1095_v43 = vsel %vm658_vm3, %v962_v46, 0.0 }
 0x24c   :  { %v1090_v20 = vadd.f32 %v1089_v31, %v1088_v6  ;;  %v964_v31 = vmul.f32 %v3097_v13, %v3097_v13  ;;  %v1097_v55 = vsel %vm658_vm3, %v963_v16, 0.0 }
 0x24e   :  { %v1092_v11 = vadd.f32 %v1091_v7, %v1090_v20  ;;  %v965_v7 = vmul.f32 %v3104_v17, %v3104_v17  ;;  %v1099_v46 = vsel %vm658_vm3, %v964_v31, 0.0 }
 0x250   :  { %v1094_v6 = vadd.f32 %v1093_v10, %v1092_v11  ;;  %v966_v10 = vmul.f32 %v3111_v21, %v3111_v21  ;;  %v1101_v16 = vsel %vm658_vm3, %v965_v7, 0.0 }
 0x252   :  { %v1096_v20 = vadd.f32 %v1095_v43, %v1094_v6  ;;  %v967_v43 = vmul.f32 %v3118_v25, %v3118_v25  ;;  %v1103_v31 = vsel %vm658_vm3, %v966_v10, 0.0 }
 0x254   :  { %v1098_v11 = vadd.f32 %v1097_v55, %v1096_v20  ;;  %v968_v55 = vmul.f32 %v3125_v29, %v3125_v29  ;;  %v1105_v7 = vsel %vm658_vm3, %v967_v43, 0.0 }
 0x256   :  { %v1100_v6 = vadd.f32 %v1099_v46, %v1098_v11  ;;  %v969_v46 = vmul.f32 %v3132_v33, %v3132_v33  ;;  %v1107_v10 = vsel %vm658_vm3, %v968_v55, 0.0 }
 0x258   :  { %v1102_v20 = vadd.f32 %v1101_v16, %v1100_v6  ;;  %v970_v16 = vmul.f32 %v3139_v37, %v3139_v37  ;;  %v1109_v43 = vsel %vm658_vm3, %v969_v46, 0.0 }
 0x25a   :  { %v1104_v11 = vadd.f32 %v1103_v31, %v1102_v20  ;;  %v971_v31 = vmul.f32 %v3146_v42, %v3146_v42  ;;  %v1111_v55 = vsel %vm658_vm3, %v970_v16, 0.0 }
 0x25c   :  { %v1106_v6 = vadd.f32 %v1105_v7, %v1104_v11  ;;  %v972_v7 = vmul.f32 %v3153_v47, %v3153_v47  ;;  %v1113_v46 = vsel %vm658_vm3, %v971_v31, 0.0 }
 0x25e   :  { %v1108_v20 = vadd.f32 %v1107_v10, %v1106_v6  ;;  %v973_v10 = vmul.f32 %v3160_v58, %v3160_v58  ;;  %v1115_v16 = vsel %vm658_vm3, %v972_v7, 0.0 }
 0x260   :  { %v1110_v11 = vadd.f32 %v1109_v43, %v1108_v20  ;;  %v974_v43 = vmul.f32 %v3167_v1, %v3167_v1  ;;  %v1117_v31 = vsel %vm658_vm3, %v973_v10, 0.0 }
 0x262   :  { %v1112_v6 = vadd.f32 %v1111_v55, %v1110_v11  ;;  %v975_v55 = vmul.f32 %v3174_v14, %v3174_v14  ;;  %v1119_v7 = vsel %vm658_vm3, %v974_v43, 0.0 }
 0x264   :  { %v1114_v20 = vadd.f32 %v1113_v46, %v1112_v6  ;;  %v976_v46 = vmul.f32 %v3181_v22, %v3181_v22  ;;  %v1121_v10 = vsel %vm658_vm3, %v975_v55, 0.0 }
 0x266   :  { %v1116_v11 = vadd.f32 %v1115_v16, %v1114_v20  ;;  %v977_v16 = vmul.f32 %v3188_v38, %v3188_v38  ;;  %v1123_v43 = vsel %vm658_vm3, %v976_v46, 0.0 }
 0x268   :  { %v1118_v6 = vadd.f32 %v1117_v31, %v1116_v11  ;;  %v978_v31 = vmul.f32 %v3195_v52, %v3195_v52  ;;  %v1125_v55 = vsel %vm658_vm3, %v977_v16, 0.0 }
 0x26a   :  { %v1120_v20 = vadd.f32 %v1119_v7, %v1118_v6  ;;  %v979_v7 = vmul.f32 %v3202_v4, %v3202_v4  ;;  %v1127_v46 = vsel %vm658_vm3, %v978_v31, 0.0 }
 0x26c   :  { %v1122_v11 = vadd.f32 %v1121_v10, %v1120_v20  ;;  %v980_v10 = vmul.f32 %v3209_v15, %v3209_v15  ;;  %v1129_v16 = vsel %vm658_vm3, %v979_v7, 0.0 }
 0x26e   :  { %v1124_v6 = vadd.f32 %v1123_v43, %v1122_v11  ;;  %v981_v43 = vmul.f32 %v3216_v34, %v3216_v34  ;;  %v1131_v31 = vsel %vm658_vm3, %v980_v10, 0.0 }
 0x270   :  { %v1126_v20 = vadd.f32 %v1125_v55, %v1124_v6  ;;  %v982_v55 = vmul.f32 %v3223_v53, %v3223_v53  ;;  %v1133_v7 = vsel %vm658_vm3, %v981_v43, 0.0  ;;  %v984_v53 = vmul.f32 %v3237_v19, %v3237_v19 }
 0x272   :  { %v1128_v11 = vadd.f32 %v1127_v46, %v1126_v20  ;;  %v983_v46 = vmul.f32 %v3230_v8, %v3230_v8  ;;  %v1135_v10 = vsel %vm658_vm3, %v982_v55, 0.0  ;;  %v985_v8 = vmul.f32 %v3244_v51, %v3244_v51 }
 0x273   :  { %v1139_v55 = vsel %vm658_vm3, %v984_v53, 0.0 }
 0x274   :  { %v1130_v6 = vadd.f32 %v1129_v16, %v1128_v11  ;;  %v4603_v16 = vld [vmem:[#allocation33_spill] sm:$0xff]  ;;  %v1137_v43 = vsel %vm658_vm3, %v983_v46, 0.0  ;;  %v1141_v46 = vsel %vm658_vm3, %v985_v8, 0.0 }
 0x275   :  { %v3251_v56 = vsub.f32 %v4603_v16, %v2716_v45 }
 0x276   :  { %v1132_v20 = vadd.f32 %v1131_v31, %v1130_v6  ;;  %v4605_v31 = vld [vmem:[#allocation34_spill] sm:$0xff] }
 0x277   :  { %4604 = vst [vmem:[#allocation33_spill] sm:$0xff] %v3251_v56  ;;  %v3258_v18 = vsub.f32 %v4605_v31, %v2716_v45  ;;  %v986_v16 = vmul.f32 %v3251_v56, %v3251_v56 }
 0x278   :  { %v1134_v11 = vadd.f32 %v1133_v7, %v1132_v20  ;;  %v3265_v7 = vsub.f32 %v2706_v36, %v2716_v45 }
 0x279   :  { %4606 = vst [vmem:[#allocation34_spill] sm:$0xff] %v3258_v18  ;;  %v987_v31 = vmul.f32 %v3258_v18, %v3258_v18 }
 0x27a   :  { %v1136_v6 = vadd.f32 %v1135_v10, %v1134_v11  ;;  %4607 = vst [vmem:[#allocation37_spill] sm:$0xff] %v3265_v7  ;;  %v3272_v10 = vsub.f32 %v2710_v50, %v2716_v45  ;;  %v988_v36 = vmul.f32 %v3265_v7, %v3265_v7 }
 0x27c   :  { %v1138_v20 = vadd.f32 %v1137_v43, %v1136_v6  ;;  %v1143_v43 = vsel %vm658_vm3, %v986_v16, 0.0  ;;  %v989_v53 = vmul.f32 %v3272_v10, %v3272_v10  ;;  %v1147_v45 = vsel %vm658_vm3, %v988_v36, 0.0  ;;  %v4610_v36 = vld [vmem:[#allocation3_spill] sm:$0xff] }
 0x27e   :  { %v1140_v11 = vadd.f32 %v1139_v55, %v1138_v20  ;;  %v1145_v20 = vsel %vm658_vm3, %v987_v31, 0.0  ;;  %v1149_v18 = vsel %vm658_vm3, %v989_v53, 0.0  ;;  %v4611_v53 = vld [vmem:[#allocation4_spill] sm:$0xff] }
 0x280   :  { %v1142_v6 = vadd.f32 %v1141_v46, %v1140_v11 }
 0x282   :  { %v1144_v51 = vadd.f32 %v1143_v43, %v1142_v6 }
 0x284   :  { %v1146_v55 = vadd.f32 %v1145_v20, %v1144_v51  ;;  %v4612_v20 = vld [vmem:[#allocation5_spill] sm:$0xff] }
 0x286   :  { %v1148_v50 = vadd.f32 %v1147_v45, %v1146_v55  ;;  %v4613_v55 = vld [vmem:[#allocation6_spill] sm:$0xff] }
 0x288   :  { %v1150_v56 = vadd.f32 %v1149_v18, %v1148_v50  ;;  %v4608_v18 = vld [vmem:[#allocation35_spill] sm:$0xff] }
 0x289   :  { %v4614_v50 = vld [vmem:[#allocation7_spill] sm:$0xff] }
 0x28a   :  { %v1151_v8 = vrot.slane %v1150_v56, 4 }
 0x28c   :  { %v1152_v11 = vadd.f32 %v1151_v8, %v1150_v56 }
 0x28e   :  { %v1153_v46 = vrot.slane %v1152_v11, 2 }
 0x290   :  { %v1154_v19 = vadd.f32 %v1153_v46, %v1152_v11  ;;  %v4615_v11 = vld [vmem:[#allocation8_spill] sm:$0xff] }
 0x292   :  { %v1155_v7 = vrot.slane %v1154_v19, 1 }
 0x294   :  { %v1156_v34 = vadd.f32 %v1155_v7, %v1154_v19  ;;  %v4609_v7 = vld [vmem:[#allocation2_spill] sm:$0xff] }
 0x296   :  { %v1157_v16 = vmul.f32 0.0015432099, %v1156_v34 }
 0x298   :  { %v1158_v6 = vadd.f32 1e-05, %v1157_v16  ;;  %v4617_v16 = vld [vmem:[#allocation9_spill] sm:$0xff] }
 0x29a   :  { %1774 = vrsqrt.f32 %v1158_v6 }
 0x2a4   :  { %v3285_v43 = vpop.eup %1774 }
 0x2a5   :  { %v3289_v51 = vmul.f32 %v3285_v43, %v2720_v40  ;;  %v3293_v31 = vmul.f32 %v3285_v43, %v2724_v60  ;;  %v3297_v56 = vmul.f32 %v3285_v43, %v2728_v62  ;;  %v3301_v19 = vmul.f32 %v3285_v43, %v2732_v35 }
 0x2a6   :  { %v3305_v34 = vmul.f32 %v3285_v43, %v2740_v48  ;;  %v3309_v40 = vmul.f32 %v3285_v43, %v2746_v49  ;;  %v3313_v60 = vmul.f32 %v3285_v43, %v2754_v39  ;;  %v3317_v62 = vmul.f32 %v3285_v43, %v4608_v18  ;;  %v4619_v18 = vld [vmem:[#allocation10_spill] sm:$0xff] }
 0x2a7   :  { %v3321_v35 = vmul.f32 %v3285_v43, %v4609_v7  ;;  %v3325_v48 = vmul.f32 %v3285_v43, %v4610_v36  ;;  %v3329_v49 = vmul.f32 %v3285_v43, %v4611_v53  ;;  %v3333_v39 = vmul.f32 %v3285_v43, %v4612_v20  ;;  %v4621_v36 = vld [vmem:[#allocation11_spill] sm:$0xff]  ;;  %v4623_v20 = vld [vmem:[#allocation12_spill] sm:$0xff] }
 0x2a8   :  { %v3337_v45 = vmul.f32 %v3285_v43, %v4613_v55  ;;  %v3341_v8 = vmul.f32 %v3285_v43, %v4614_v50  ;;  %v3345_v46 = vmul.f32 %v3285_v43, %v4615_v11  ;;  %v3349_v6 = vmul.f32 %v3285_v43, %v4617_v16  ;;  %v4625_v50 = vld [vmem:[#allocation13_spill] sm:$0xff] }
 0x2a9   :  { %v3353_v7 = vmul.f32 %v3285_v43, %v4619_v18  ;;  %v3357_v53 = vmul.f32 %v3285_v43, %v4621_v36  ;;  %v3361_v55 = vmul.f32 %v3285_v43, %v4623_v20  ;;  %v3365_v11 = vmul.f32 %v3285_v43, %v4625_v50 }
 0x2aa   :  { %4616 = vst [vmem:[#allocation35_spill] sm:$0xff] %v3345_v46  ;;  %4618 = vst [vmem:[#allocation2_spill] sm:$0xff] %v3349_v6  ;;  %v4627_v46 = vld [vmem:[#allocation14_spill] sm:$0xff]  ;;  %v4629_v6 = vld [vmem:[#allocation15_spill] sm:$0xff] }
 0x2ab   :  { %4620 = vst [vmem:[#allocation3_spill] sm:$0xff] %v3353_v7  ;;  %4622 = vst [vmem:[#allocation4_spill] sm:$0xff] %v3357_v53  ;;  %v3369_v16 = vmul.f32 %v3285_v43, %v4627_v46  ;;  %v3373_v18 = vmul.f32 %v3285_v43, %v4629_v6  ;;  %v4631_v7 = vld [vmem:[#allocation16_spill] sm:$0xff]  ;;  %v4633_v53 = vld [vmem:[#allocation17_spill] sm:$0xff] }
 0x2ac   :  { %4624 = vst [vmem:[#allocation5_spill] sm:$0xff] %v3361_v55  ;;  %4626 = vst [vmem:[#allocation6_spill] sm:$0xff] %v3365_v11  ;;  %v3377_v36 = vmul.f32 %v3285_v43, %v4631_v7  ;;  %v3381_v20 = vmul.f32 %v3285_v43, %v4633_v53  ;;  %v4635_v55 = vld [vmem:[#allocation18_spill] sm:$0xff]  ;;  %v4637_v11 = vld [vmem:[#allocation19_spill] sm:$0xff] }
 0x2ad   :  { %4628 = vst [vmem:[#allocation7_spill] sm:$0xff] %v3369_v16  ;;  %4630 = vst [vmem:[#allocation8_spill] sm:$0xff] %v3373_v18  ;;  %v3385_v50 = vmul.f32 %v3285_v43, %v4635_v55  ;;  %v3389_v46 = vmul.f32 %v3285_v43, %v4637_v11  ;;  %v4639_v16 = vld [vmem:[#allocation20_spill] sm:$0xff]  ;;  %v4641_v18 = vld [vmem:[#allocation21_spill] sm:$0xff] }
 0x2ae   :  { %4632 = vst [vmem:[#allocation9_spill] sm:$0xff] %v3377_v36  ;;  %4634 = vst [vmem:[#allocation10_spill] sm:$0xff] %v3381_v20  ;;  %v3393_v6 = vmul.f32 %v3285_v43, %v4639_v16  ;;  %v3397_v7 = vmul.f32 %v3285_v43, %v4641_v18  ;;  %v4643_v36 = vld [vmem:[#allocation22_spill] sm:$0xff]  ;;  %v4645_v20 = vld [vmem:[#allocation23_spill] sm:$0xff] }
 0x2af   :  { %4636 = vst [vmem:[#allocation11_spill] sm:$0xff] %v3385_v50  ;;  %4638 = vst [vmem:[#allocation12_spill] sm:$0xff] %v3389_v46  ;;  %v3401_v53 = vmul.f32 %v3285_v43, %v4643_v36  ;;  %v3405_v55 = vmul.f32 %v3285_v43, %v4645_v20  ;;  %v4646_v50 = vld [vmem:[#allocation24_spill] sm:$0xff]  ;;  %v4647_v46 = vld [vmem:[#allocation25_spill] sm:$0xff] }
 0x2b0   :  { %4640 = vst [vmem:[#allocation13_spill] sm:$0xff] %v3393_v6  ;;  %4642 = vst [vmem:[#allocation14_spill] sm:$0xff] %v3397_v7  ;;  %v3409_v11 = vmul.f32 %v3285_v43, %v4646_v50  ;;  %v3413_v16 = vmul.f32 %v3285_v43, %v4647_v46  ;;  %v4648_v6 = vld [vmem:[#allocation26_spill] sm:$0xff]  ;;  %v4649_v7 = vld [vmem:[#allocation27_spill] sm:$0xff]  ;;  %v3429_v50 = vmul.f32 %v3285_v43, %v2957_v23 }
 0x2b1   :  { %4644 = vst [vmem:[#allocation15_spill] sm:$0xff] %v3401_v53  ;;  %v3417_v18 = vmul.f32 %v3285_v43, %v4648_v6  ;;  %v3421_v36 = vmul.f32 %v3285_v43, %v4649_v7  ;;  %v4650_v53 = vld [vmem:[#allocation28_spill] sm:$0xff]  ;;  %v3433_v46 = vmul.f32 %v3285_v43, %v2964_v24  ;;  %v3437_v6 = vmul.f32 %v3285_v43, %v2971_v32 }
 0x2b2   :  { %v3425_v20 = vmul.f32 %v3285_v43, %v4650_v53  ;;  %v3441_v7 = vmul.f32 %v3285_v43, %v2978_v26  ;;  %v3445_v53 = vmul.f32 %v3285_v43, %v2985_v59  ;;  %v3449_v23 = vmul.f32 %v3285_v43, %v2992_v27 }
 0x2b3   :  { %v3453_v24 = vmul.f32 %v3285_v43, %v2999_v5  ;;  %v3457_v32 = vmul.f32 %v3285_v43, %v3006_v44  ;;  %v3461_v26 = vmul.f32 %v3285_v43, %v3013_v0  ;;  %v3465_v59 = vmul.f32 %v3285_v43, %v3020_v61 }
 0x2b4   :  { %v3469_v27 = vmul.f32 %v3285_v43, %v3027_v28  ;;  %v3473_v5 = vmul.f32 %v3285_v43, %v3034_v54  ;;  %v3477_v44 = vmul.f32 %v3285_v43, %v3041_v3  ;;  %v3481_v0 = vmul.f32 %v3285_v43, %v3048_v57 }
 0x2b5   :  { %v3485_v61 = vmul.f32 %v3285_v43, %v3055_v41  ;;  %v3489_v28 = vmul.f32 %v3285_v43, %v3062_v30  ;;  %v3493_v54 = vmul.f32 %v3285_v43, %v3069_v2  ;;  %v3497_v3 = vmul.f32 %v3285_v43, %v3076_v12 }
 0x2b6   :  { %v3501_v57 = vmul.f32 %v3285_v43, %v3083_v63  ;;  %v3505_v41 = vmul.f32 %v3285_v43, %v3090_v9  ;;  %v3509_v30 = vmul.f32 %v3285_v43, %v3097_v13  ;;  %v3513_v2 = vmul.f32 %v3285_v43, %v3104_v17 }
 0x2b7   :  { %v3517_v12 = vmul.f32 %v3285_v43, %v3111_v21  ;;  %v3521_v63 = vmul.f32 %v3285_v43, %v3118_v25  ;;  %v3525_v9 = vmul.f32 %v3285_v43, %v3125_v29  ;;  %v3529_v13 = vmul.f32 %v3285_v43, %v3132_v33 }
 0x2b8   :  { %v3533_v17 = vmul.f32 %v3285_v43, %v3139_v37  ;;  %v3537_v21 = vmul.f32 %v3285_v43, %v3146_v42  ;;  %v3541_v25 = vmul.f32 %v3285_v43, %v3153_v47  ;;  %v3545_v29 = vmul.f32 %v3285_v43, %v3160_v58 }
 0x2b9   :  { %v3549_v33 = vmul.f32 %v3285_v43, %v3167_v1  ;;  %v3553_v37 = vmul.f32 %v3285_v43, %v3174_v14  ;;  %v3557_v42 = vmul.f32 %v3285_v43, %v3181_v22  ;;  %v3561_v47 = vmul.f32 %v3285_v43, %v3188_v38  ;;  %v3578_v22 = vld [vmem:[%s4434_s3] ss:$0 sm:$0xff] }
 0x2ba   :  { %v3565_v58 = vmul.f32 %v3285_v43, %v3195_v52  ;;  %v3569_v1 = vmul.f32 %v3285_v43, %v3202_v4  ;;  %v3573_v14 = vmul.f32 %v3285_v43, %v3209_v15 }
 0x2bb   :  { %4651 = vst [vmem:[#allocation16_spill] sm:$0xff] %v3549_v33  ;;  %4652 = vst [vmem:[#allocation17_spill] sm:$0xff] %v3553_v37  ;;  %v4665_v33 = vld [vmem:[#allocation33_spill] sm:$0xff] }
 0x2bc   :  { %4653 = vst [vmem:[#allocation18_spill] sm:$0xff] %v3557_v42  ;;  %4654 = vst [vmem:[#allocation19_spill] sm:$0xff] %v3561_v47  ;;  %v4658_v42 = vld [vmem:[#allocation29_spill] sm:$0xff]  ;;  %v4660_v47 = vld [vmem:[#allocation30_spill] sm:$0xff] }
 0x2bd   :  { %4655 = vst [vmem:[#allocation20_spill] sm:$0xff] %v3565_v58  ;;  %4656 = vst [vmem:[#allocation21_spill] sm:$0xff] %v3569_v1  ;;  %v3582_v38 = vmul.f32 %v3285_v43, %v4658_v42  ;;  %v3586_v52 = vmul.f32 %v3285_v43, %v4660_v47  ;;  %v4662_v58 = vld [vmem:[#allocation31_spill] sm:$0xff]  ;;  %v4663_v1 = vld [vmem:[#allocation32_spill] sm:$0xff]  ;;  %v3602_v42 = vmul.f32 %v3285_v43, %v4665_v33 }
 0x2be   :  { %4657 = vst [vmem:[#allocation22_spill] sm:$0xff] %v3573_v14  ;;  %v3590_v4 = vmul.f32 %v3285_v43, %v4662_v58  ;;  %v3594_v15 = vmul.f32 %v3285_v43, %v4663_v1  ;;  %v4664_v14 = vld [vmem:[#allocation36_spill] sm:$0xff]  ;;  %v3614_v1 = vmul.f32 %v3285_v43, %v3272_v10  ;;  %v3622_v33 = vmul.f32 %v3578_v22, %v3293_v31 }
 0x2bf   :  { %4659 = vst [vmem:[#allocation23_spill] sm:$0xff] %v3582_v38  ;;  %4661 = vst [vmem:[#allocation24_spill] sm:$0xff] %v3586_v52  ;;  %v3598_v37 = vmul.f32 %v3285_v43, %v4664_v14  ;;  %v4666_v38 = vld [vmem:[#allocation34_spill] sm:$0xff]  ;;  %v4667_v52 = vld [vmem:[#allocation37_spill] sm:$0xff]  ;;  %v3618_v14 = vmul.f32 %v3578_v22, %v3289_v51  ;;  %v3634_v10 = vmul.f32 %v3578_v22, %v3305_v34 }
 0x2c0   :  { %v3606_v47 = vmul.f32 %v3285_v43, %v4666_v38  ;;  %v3610_v58 = vmul.f32 %v3285_v43, %v4667_v52  ;;  %v3626_v38 = vmul.f32 %v3578_v22, %v3297_v56  ;;  %v3630_v52 = vmul.f32 %v3578_v22, %v3301_v19 }
 0x2c1   :  { %v3638_v43 = vmul.f32 %v3578_v22, %v3309_v40  ;;  %v3642_v51 = vmul.f32 %v3578_v22, %v3313_v60  ;;  %v3646_v31 = vmul.f32 %v3578_v22, %v3317_v62  ;;  %v3650_v56 = vmul.f32 %v3578_v22, %v3321_v35  ;;  %v4673_v35 = vld [vmem:[#allocation35_spill] sm:$0xff] }
 0x2c2   :  { %v3654_v19 = vmul.f32 %v3578_v22, %v3325_v48  ;;  %v3658_v34 = vmul.f32 %v3578_v22, %v3329_v49  ;;  %v3662_v40 = vmul.f32 %v3578_v22, %v3333_v39  ;;  %v3666_v60 = vmul.f32 %v3578_v22, %v3337_v45 }
 0x2c3   :  { %v3670_v62 = vmul.f32 %v3578_v22, %v3341_v8  ;;  %v3674_v48 = vmul.f32 %v3578_v22, %v4673_v35 }
 0x2c4   :  { %4668 = vst [vmem:[#allocation25_spill] sm:$0xff] %v3654_v19  ;;  %4669 = vst [vmem:[#allocation26_spill] sm:$0xff] %v3658_v34  ;;  %v4675_v19 = vld [vmem:[#allocation2_spill] sm:$0xff]  ;;  %v4677_v34 = vld [vmem:[#allocation3_spill] sm:$0xff] }
 0x2c5   :  { %4670 = vst [vmem:[#allocation27_spill] sm:$0xff] %v3662_v40  ;;  %4671 = vst [vmem:[#allocation28_spill] sm:$0xff] %v3666_v60  ;;  %v3678_v49 = vmul.f32 %v3578_v22, %v4675_v19  ;;  %v3682_v39 = vmul.f32 %v3578_v22, %v4677_v34  ;;  %v4679_v40 = vld [vmem:[#allocation4_spill] sm:$0xff]  ;;  %v4681_v60 = vld [vmem:[#allocation5_spill] sm:$0xff] }
 0x2c6   :  { %4672 = vst [vmem:[#allocation29_spill] sm:$0xff] %v3670_v62  ;;  %4674 = vst [vmem:[#allocation30_spill] sm:$0xff] %v3674_v48  ;;  %v3686_v45 = vmul.f32 %v3578_v22, %v4679_v40  ;;  %v3690_v8 = vmul.f32 %v3578_v22, %v4681_v60  ;;  %v4683_v62 = vld [vmem:[#allocation6_spill] sm:$0xff]  ;;  %v4685_v48 = vld [vmem:[#allocation7_spill] sm:$0xff] }
 0x2c7   :  { %4676 = vst [vmem:[#allocation31_spill] sm:$0xff] %v3678_v49  ;;  %4678 = vst [vmem:[#allocation32_spill] sm:$0xff] %v3682_v39  ;;  %v3694_v35 = vmul.f32 %v3578_v22, %v4683_v62  ;;  %v3698_v19 = vmul.f32 %v3578_v22, %v4685_v48  ;;  %v4687_v49 = vld [vmem:[#allocation8_spill] sm:$0xff]  ;;  %v4689_v39 = vld [vmem:[#allocation9_spill] sm:$0xff] }
 0x2c8   :  { %4680 = vst [vmem:[#allocation36_spill] sm:$0xff] %v3686_v45  ;;  %4682 = vst [vmem:[#allocation33_spill] sm:$0xff] %v3690_v8  ;;  %v3702_v34 = vmul.f32 %v3578_v22, %v4687_v49  ;;  %v3706_v40 = vmul.f32 %v3578_v22, %v4689_v39  ;;  %v4691_v45 = vld [vmem:[#allocation10_spill] sm:$0xff]  ;;  %v4692_v8 = vld [vmem:[#allocation11_spill] sm:$0xff] }
 0x2c9   :  { %4684 = vst [vmem:[#allocation34_spill] sm:$0xff] %v3694_v35  ;;  %4686 = vst [vmem:[#allocation37_spill] sm:$0xff] %v3698_v19  ;;  %v3710_v60 = vmul.f32 %v3578_v22, %v4691_v45  ;;  %v3714_v62 = vmul.f32 %v3578_v22, %v4692_v8  ;;  %v4693_v35 = vld [vmem:[#allocation12_spill] sm:$0xff]  ;;  %v4694_v19 = vld [vmem:[#allocation13_spill] sm:$0xff]  ;;  %v3734_v8 = vmul.f32 %v3578_v22, %v3405_v55 }
 0x2ca   :  { %4688 = vst [vmem:[#allocation35_spill] sm:$0xff] %v3702_v34  ;;  %4690 = vst [vmem:[#allocation2_spill] sm:$0xff] %v3706_v40  ;;  %v3718_v48 = vmul.f32 %v3578_v22, %v4693_v35  ;;  %v3722_v49 = vmul.f32 %v3578_v22, %v4694_v19  ;;  %v4695_v34 = vld [vmem:[#allocation14_spill] sm:$0xff]  ;;  %v4696_v40 = vld [vmem:[#allocation15_spill] sm:$0xff]  ;;  %v3738_v35 = vmul.f32 %v3578_v22, %v3409_v11 }
 0x2cb   :  { %v3726_v39 = vmul.f32 %v3578_v22, %v4695_v34  ;;  %v3730_v45 = vmul.f32 %v3578_v22, %v4696_v40  ;;  %v3742_v19 = vmul.f32 %v3578_v22, %v3413_v16  ;;  %v3746_v34 = vmul.f32 %v3578_v22, %v3417_v18 }
 0x2cc   :  { %v3750_v40 = vmul.f32 %v3578_v22, %v3421_v36  ;;  %v3754_v55 = vmul.f32 %v3578_v22, %v3425_v20  ;;  %v3758_v11 = vmul.f32 %v3578_v22, %v3429_v50  ;;  %v3762_v16 = vmul.f32 %v3578_v22, %v3433_v46 }
 0x2cd   :  { %v3766_v18 = vmul.f32 %v3578_v22, %v3437_v6  ;;  %v3770_v36 = vmul.f32 %v3578_v22, %v3441_v7  ;;  %v3774_v20 = vmul.f32 %v3578_v22, %v3445_v53  ;;  %v3778_v50 = vmul.f32 %v3578_v22, %v3449_v23 }
 0x2ce   :  { %v3782_v46 = vmul.f32 %v3578_v22, %v3453_v24  ;;  %v3786_v6 = vmul.f32 %v3578_v22, %v3457_v32  ;;  %v3790_v7 = vmul.f32 %v3578_v22, %v3461_v26  ;;  %v3794_v53 = vmul.f32 %v3578_v22, %v3465_v59 }
 0x2cf   :  { %v3798_v23 = vmul.f32 %v3578_v22, %v3469_v27  ;;  %v3802_v24 = vmul.f32 %v3578_v22, %v3473_v5  ;;  %v3806_v32 = vmul.f32 %v3578_v22, %v3477_v44  ;;  %v3810_v26 = vmul.f32 %v3578_v22, %v3481_v0 }
 0x2d0   :  { %v3814_v59 = vmul.f32 %v3578_v22, %v3485_v61  ;;  %v3818_v27 = vmul.f32 %v3578_v22, %v3489_v28  ;;  %v3822_v5 = vmul.f32 %v3578_v22, %v3493_v54  ;;  %v3826_v44 = vmul.f32 %v3578_v22, %v3497_v3 }
 0x2d1   :  { %v3830_v0 = vmul.f32 %v3578_v22, %v3501_v57  ;;  %v3834_v61 = vmul.f32 %v3578_v22, %v3505_v41  ;;  %v3838_v28 = vmul.f32 %v3578_v22, %v3509_v30  ;;  %v3842_v54 = vmul.f32 %v3578_v22, %v3513_v2 }
 0x2d2   :  { %v3846_v3 = vmul.f32 %v3578_v22, %v3517_v12  ;;  %v3850_v57 = vmul.f32 %v3578_v22, %v3521_v63  ;;  %v3854_v41 = vmul.f32 %v3578_v22, %v3525_v9  ;;  %v3858_v30 = vmul.f32 %v3578_v22, %v3529_v13 }
 0x2d3   :  { %v3862_v2 = vmul.f32 %v3578_v22, %v3533_v17  ;;  %v3866_v12 = vmul.f32 %v3578_v22, %v3537_v21  ;;  %v3870_v63 = vmul.f32 %v3578_v22, %v3541_v25  ;;  %v3874_v9 = vmul.f32 %v3578_v22, %v3545_v29 }
 0x2d4   :  { %4697 = vst [vmem:[#allocation3_spill] sm:$0xff] %v3854_v41  ;;  %4698 = vst [vmem:[#allocation4_spill] sm:$0xff] %v3858_v30  ;;  %v4703_v41 = vld [vmem:[#allocation16_spill] sm:$0xff]  ;;  %v4704_v30 = vld [vmem:[#allocation17_spill] sm:$0xff] }
 0x2d5   :  { %4699 = vst [vmem:[#allocation5_spill] sm:$0xff] %v3862_v2  ;;  %4700 = vst [vmem:[#allocation6_spill] sm:$0xff] %v3866_v12  ;;  %v3878_v13 = vmul.f32 %v3578_v22, %v4703_v41  ;;  %v3882_v17 = vmul.f32 %v3578_v22, %v4704_v30  ;;  %v4706_v2 = vld [vmem:[#allocation18_spill] sm:$0xff]  ;;  %v4708_v12 = vld [vmem:[#allocation19_spill] sm:$0xff] }
 0x2d6   :  { %4701 = vst [vmem:[#allocation7_spill] sm:$0xff] %v3870_v63  ;;  %4702 = vst [vmem:[#allocation8_spill] sm:$0xff] %v3874_v9  ;;  %v3886_v21 = vmul.f32 %v3578_v22, %v4706_v2  ;;  %v3890_v25 = vmul.f32 %v3578_v22, %v4708_v12  ;;  %v4710_v63 = vld [vmem:[#allocation20_spill] sm:$0xff]  ;;  %v4711_v9 = vld [vmem:[#allocation21_spill] sm:$0xff] }
 0x2d7   :  { %4705 = vst [vmem:[#allocation9_spill] sm:$0xff] %v3882_v17  ;;  %v3894_v29 = vmul.f32 %v3578_v22, %v4710_v63  ;;  %v3898_v41 = vmul.f32 %v3578_v22, %v4711_v9  ;;  %v3903_v30 = vld [vmem:[%s4435_s4] ss:$0 sm:$0xff]  ;;  %v3919_v9 = vmul.f32 %v3578_v22, %v3590_v4  ;;  %v3939_v4 = vmul.f32 %v3578_v22, %v3610_v58 }
 0x2d8   :  { %4707 = vst [vmem:[#allocation10_spill] sm:$0xff] %v3886_v21  ;;  %4709 = vst [vmem:[#allocation11_spill] sm:$0xff] %v3890_v25  ;;  %v4713_v17 = vld [vmem:[#allocation22_spill] sm:$0xff]  ;;  %v4714_v21 = vld [vmem:[#allocation23_spill] sm:$0xff]  ;;  %v1340_v58 = vadd.f32 %v3903_v30, %v3634_v10 }
 0x2d9   :  { %4712 = vst [vmem:[#allocation12_spill] sm:$0xff] %v3898_v41  ;;  %v3907_v2 = vmul.f32 %v3578_v22, %v4713_v17  ;;  %v3911_v12 = vmul.f32 %v3578_v22, %v4714_v21  ;;  %v4715_v25 = vld [vmem:[#allocation24_spill] sm:$0xff]  ;;  %v3923_v41 = vmul.f32 %v3578_v22, %v3594_v15  ;;  %v3927_v17 = vmul.f32 %v3578_v22, %v3598_v37 }
 0x2da   :  { %v3915_v63 = vmul.f32 %v3578_v22, %v4715_v25  ;;  %v3931_v21 = vmul.f32 %v3578_v22, %v3602_v42  ;;  %v3935_v25 = vmul.f32 %v3578_v22, %v3606_v47  ;;  %4717 = vst [vmem:[#allocation14_spill] sm:$0xff] %v3939_v4  ;;  %v3943_v15 = vmul.f32 %v3578_v22, %v3614_v1 }
 0x2db   :  { %4716 = vst [vmem:[#allocation13_spill] sm:$0xff] %v3927_v17  ;;  %v1336_v37 = vadd.f32 %v3903_v30, %v3618_v14  ;;  %v1337_v17 = vadd.f32 %v3903_v30, %v3622_v33  ;;  %v1338_v42 = vadd.f32 %v3903_v30, %v3626_v38  ;;  %v1339_v47 = vadd.f32 %v3903_v30, %v3630_v52  ;;  %v4719_v33 = vld [vmem:[#allocation25_spill] sm:$0xff]  ;;  %v4720_v52 = vld [vmem:[#allocation26_spill] sm:$0xff] }
 0x2dc   :  { %4718 = vst [vmem:[#allocation15_spill] sm:$0xff] %v3943_v15  ;;  %v1341_v4 = vadd.f32 %v3903_v30, %v3638_v43  ;;  %v1342_v22 = vadd.f32 %v3903_v30, %v3642_v51  ;;  %v1343_v1 = vadd.f32 %v3903_v30, %v3646_v31  ;;  %v1344_v14 = vadd.f32 %v3903_v30, %v3650_v56  ;;  %v4721_v43 = vld [vmem:[#allocation27_spill] sm:$0xff]  ;;  %v4722_v31 = vld [vmem:[#allocation28_spill] sm:$0xff] }
 0x2dd   :  { %v1345_v38 = vadd.f32 %v3903_v30, %v4719_v33  ;;  %1417 = vst.msk [vmem:[%s4436_s5] sm:$0xff] %vm658_vm3, %v1336_v37  ;;  %1418 = vst.msk [vmem:[%s4436_s5 + $0x8] sm:$0xff] %vm658_vm3, %v1337_v17  ;;  %v1346_v10 = vadd.f32 %v3903_v30, %v4720_v52  ;;  %v1347_v51 = vadd.f32 %v3903_v30, %v4721_v43  ;;  %v4723_v33 = vld [vmem:[#allocation29_spill] sm:$0xff]  ;;  %v4724_v17 = vld [vmem:[#allocation30_spill] sm:$0xff] }
 0x2de   :  { %v1348_v56 = vadd.f32 %v3903_v30, %v4722_v31  ;;  %v1349_v15 = vadd.f32 %v3903_v30, %v4723_v33  ;;  %1419 = vst.msk [vmem:[%s4436_s5 + $0x10] sm:$0xff] %vm658_vm3, %v1338_v42  ;;  %1420 = vst.msk [vmem:[%s4436_s5 + $0x18] sm:$0xff] %vm658_vm3, %v1339_v47  ;;  %v1350_v37 = vadd.f32 %v3903_v30, %v4724_v17  ;;  %v4725_v52 = vld [vmem:[#allocation31_spill] sm:$0xff]  ;;  %v4726_v43 = vld [vmem:[#allocation32_spill] sm:$0xff] }
 0x2df   :  { %1421 = vst.msk [vmem:[%s4436_s5 + $0x20] sm:$0xff] %vm658_vm3, %v1340_v58  ;;  %1422 = vst.msk [vmem:[%s4436_s5 + $0x28] sm:$0xff] %vm658_vm3, %v1341_v4  ;;  %v1351_v42 = vadd.f32 %v3903_v30, %v4725_v52  ;;  %v1352_v31 = vadd.f32 %v3903_v30, %v4726_v43  ;;  %v4727_v47 = vld [vmem:[#allocation36_spill] sm:$0xff]  ;;  %v4728_v4 = vld [vmem:[#allocation33_spill] sm:$0xff] }
 0x2e0   :  { %v1353_v33 = vadd.f32 %v3903_v30, %v4727_v47  ;;  %1423 = vst.msk [vmem:[%s4436_s5 + $0x30] sm:$0xff] %vm658_vm3, %v1342_v22  ;;  %1424 = vst.msk [vmem:[%s4436_s5 + $0x38] sm:$0xff] %vm658_vm3, %v1343_v1  ;;  %v1354_v58 = vadd.f32 %v3903_v30, %v4728_v4  ;;  %v4729_v17 = vld [vmem:[#allocation34_spill] sm:$0xff]  ;;  %v4730_v52 = vld [vmem:[#allocation37_spill] sm:$0xff]  ;;  %v1360_v4 = vadd.f32 %v3903_v30, %v3714_v62 }
 0x2e1   :  { %1425 = vst.msk [vmem:[%s4436_s5 + $0x40] sm:$0xff] %vm658_vm3, %v1344_v14  ;;  %1426 = vst.msk [vmem:[%s4436_s5 + $0x48] sm:$0xff] %vm658_vm3, %v1345_v38  ;;  %v1355_v22 = vadd.f32 %v3903_v30, %v4729_v17  ;;  %v1356_v43 = vadd.f32 %v3903_v30, %v4730_v52  ;;  %v4731_v1 = vld [vmem:[#allocation35_spill] sm:$0xff]  ;;  %v4732_v14 = vld [vmem:[#allocation2_spill] sm:$0xff]  ;;  %v1363_v62 = vadd.f32 %v3903_v30, %v3726_v39 }
 0x2e2   :  { %v1357_v47 = vadd.f32 %v3903_v30, %v4731_v1  ;;  %1427 = vst.msk [vmem:[%s4436_s5 + $0x50] sm:$0xff] %vm658_vm3, %v1346_v10  ;;  %1428 = vst.msk [vmem:[%s4436_s5 + $0x58] sm:$0xff] %vm658_vm3, %v1347_v51  ;;  %v1358_v38 = vadd.f32 %v3903_v30, %v4732_v14  ;;  %v1359_v10 = vadd.f32 %v3903_v30, %v3710_v60  ;;  %v4738_v17 = vld [vmem:[#allocation8_spill] sm:$0xff]  ;;  %v4740_v1 = vld [vmem:[#allocation10_spill] sm:$0xff] }
 0x2e3   :  { %1429 = vst.msk [vmem:[%s4436_s5 + $0x60] sm:$0xff] %vm658_vm3, %v1348_v56  ;;  %1430 = vst.msk [vmem:[%s4436_s5 + $0x68] sm:$0xff] %vm658_vm3, %v1349_v15  ;;  %v1361_v51 = vadd.f32 %v3903_v30, %v3718_v48  ;;  %v1362_v60 = vadd.f32 %v3903_v30, %v3722_v49  ;;  %v1364_v48 = vadd.f32 %v3903_v30, %v3730_v45  ;;  %v4741_v14 = vld [vmem:[#allocation11_spill] sm:$0xff] }
 0x2e4   :  { %1431 = vst.msk [vmem:[%s4436_s5 + $0x70] sm:$0xff] %vm658_vm3, %v1350_v37  ;;  %1432 = vst.msk [vmem:[%s4436_s5 + $0x78] sm:$0xff] %vm658_vm3, %v1351_v42  ;;  %v1365_v15 = vadd.f32 %v3903_v30, %v3734_v8  ;;  %v1366_v49 = vadd.f32 %v3903_v30, %v3738_v35  ;;  %v1367_v39 = vadd.f32 %v3903_v30, %v3742_v19  ;;  %v4735_v37 = vld [vmem:[#allocation5_spill] sm:$0xff] }
 0x2e5   :  { %1433 = vst.msk [vmem:[%s4436_s5 + $0x80] sm:$0xff] %vm658_vm3, %v1352_v31  ;;  %1434 = vst.msk [vmem:[%s4436_s5 + $0x88] sm:$0xff] %vm658_vm3, %v1353_v33  ;;  %v1368_v45 = vadd.f32 %v3903_v30, %v3746_v34  ;;  %v1369_v8 = vadd.f32 %v3903_v30, %v3750_v40  ;;  %v1370_v35 = vadd.f32 %v3903_v30, %v3754_v55  ;;  %v4737_v33 = vld [vmem:[#allocation7_spill] sm:$0xff] }
 0x2e6   :  { %1435 = vst.msk [vmem:[%s4436_s5 + $0x90] sm:$0xff] %vm658_vm3, %v1354_v58  ;;  %1436 = vst.msk [vmem:[%s4436_s5 + $0x98] sm:$0xff] %vm658_vm3, %v1355_v22  ;;  %v1371_v19 = vadd.f32 %v3903_v30, %v3758_v11  ;;  %v1372_v34 = vadd.f32 %v3903_v30, %v3762_v16  ;;  %v1373_v40 = vadd.f32 %v3903_v30, %v3766_v18 }
 0x2e7   :  { %1437 = vst.msk [vmem:[%s4436_s5 + $0xa0] sm:$0xff] %vm658_vm3, %v1356_v43  ;;  %1438 = vst.msk [vmem:[%s4436_s5 + $0xa8] sm:$0xff] %vm658_vm3, %v1357_v47  ;;  %v1374_v55 = vadd.f32 %v3903_v30, %v3770_v36  ;;  %v1375_v11 = vadd.f32 %v3903_v30, %v3774_v20  ;;  %v1376_v16 = vadd.f32 %v3903_v30, %v3778_v50 }
 0x2e8   :  { %1439 = vst.msk [vmem:[%s4436_s5 + $0xb0] sm:$0xff] %vm658_vm3, %v1358_v38  ;;  %1440 = vst.msk [vmem:[%s4436_s5 + $0xb8] sm:$0xff] %vm658_vm3, %v1359_v10  ;;  %v1377_v18 = vadd.f32 %v3903_v30, %v3782_v46  ;;  %v1378_v36 = vadd.f32 %v3903_v30, %v3786_v6  ;;  %v1379_v20 = vadd.f32 %v3903_v30, %v3790_v7 }
 0x2e9   :  { %1441 = vst.msk [vmem:[%s4436_s5 + $0xc0] sm:$0xff] %vm658_vm3, %v1360_v4  ;;  %1442 = vst.msk [vmem:[%s4436_s5 + $0xc8] sm:$0xff] %vm658_vm3, %v1361_v51  ;;  %v1380_v50 = vadd.f32 %v3903_v30, %v3794_v53  ;;  %v1381_v46 = vadd.f32 %v3903_v30, %v3798_v23  ;;  %v1382_v6 = vadd.f32 %v3903_v30, %v3802_v24 }
 0x2ea   :  { %1443 = vst.msk [vmem:[%s4436_s5 + $0xd0] sm:$0xff] %vm658_vm3, %v1362_v60  ;;  %1444 = vst.msk [vmem:[%s4436_s5 + $0xd8] sm:$0xff] %vm658_vm3, %v1363_v62  ;;  %v1383_v7 = vadd.f32 %v3903_v30, %v3806_v32  ;;  %v1384_v53 = vadd.f32 %v3903_v30, %v3810_v26  ;;  %v1385_v23 = vadd.f32 %v3903_v30, %v3814_v59 }
 0x2eb   :  { %1445 = vst.msk [vmem:[%s4436_s5 + $0xe0] sm:$0xff] %vm658_vm3, %v1364_v48  ;;  %1446 = vst.msk [vmem:[%s4436_s5 + $0xe8] sm:$0xff] %vm658_vm3, %v1365_v15  ;;  %v1386_v24 = vadd.f32 %v3903_v30, %v3818_v27  ;;  %v1387_v32 = vadd.f32 %v3903_v30, %v3822_v5  ;;  %v1388_v26 = vadd.f32 %v3903_v30, %v3826_v44 }
 0x2ec   :  { %1447 = vst.msk [vmem:[%s4436_s5 + $0xf0] sm:$0xff] %vm658_vm3, %v1366_v49  ;;  %1448 = vst.msk [vmem:[%s4436_s5 + $0xf8] sm:$0xff] %vm658_vm3, %v1367_v39  ;;  %v1389_v59 = vadd.f32 %v3903_v30, %v3830_v0  ;;  %v1390_v27 = vadd.f32 %v3903_v30, %v3834_v61  ;;  %v1391_v5 = vadd.f32 %v3903_v30, %v3838_v28  ;;  %v4733_v28 = vld [vmem:[#allocation3_spill] sm:$0xff] }
 0x2ed   :  { %1449 = vst.msk [vmem:[%s4436_s5 + $0x100] sm:$0xff] %vm658_vm3, %v1368_v45  ;;  %1450 = vst.msk [vmem:[%s4436_s5 + $0x108] sm:$0xff] %vm658_vm3, %v1369_v8  ;;  %v1392_v44 = vadd.f32 %v3903_v30, %v3842_v54  ;;  %v1393_v0 = vadd.f32 %v3903_v30, %v3846_v3  ;;  %v1394_v61 = vadd.f32 %v3903_v30, %v3850_v57  ;;  %v4734_v3 = vld [vmem:[#allocation4_spill] sm:$0xff]  ;;  %v4736_v57 = vld [vmem:[#allocation6_spill] sm:$0xff] }
 0x2ee   :  { %1451 = vst.msk [vmem:[%s4436_s5 + $0x110] sm:$0xff] %vm658_vm3, %v1370_v35  ;;  %1452 = vst.msk [vmem:[%s4436_s5 + $0x118] sm:$0xff] %vm658_vm3, %v1371_v19  ;;  %v1395_v54 = vadd.f32 %v3903_v30, %v4733_v28  ;;  %v1396_v56 = vadd.f32 %v3903_v30, %v4734_v3  ;;  %v1397_v42 = vadd.f32 %v3903_v30, %v4735_v37  ;;  %v4745_v49 = vld [vmem:[#allocation15_spill] sm:$0xff] }
 0x2ef   :  { %1453 = vst.msk [vmem:[%s4436_s5 + $0x120] sm:$0xff] %vm658_vm3, %v1372_v34  ;;  %1454 = vst.msk [vmem:[%s4436_s5 + $0x128] sm:$0xff] %vm658_vm3, %v1373_v40  ;;  %v1398_v31 = vadd.f32 %v3903_v30, %v4736_v57  ;;  %v1399_v58 = vadd.f32 %v3903_v30, %v4737_v33  ;;  %v1400_v22 = vadd.f32 %v3903_v30, %v4738_v17 }
 0x2f0   :  { %1455 = vst.msk [vmem:[%s4436_s5 + $0x130] sm:$0xff] %vm658_vm3, %v1374_v55  ;;  %1456 = vst.msk [vmem:[%s4436_s5 + $0x138] sm:$0xff] %vm658_vm3, %v1375_v11  ;;  %v1401_v52 = vadd.f32 %v3903_v30, %v3878_v13  ;;  %v4739_v13 = vld [vmem:[#allocation9_spill] sm:$0xff]  ;;  %v1403_v47 = vadd.f32 %v3903_v30, %v4740_v1  ;;  %v1404_v38 = vadd.f32 %v3903_v30, %v4741_v14 }
 0x2f1   :  { %1457 = vst.msk [vmem:[%s4436_s5 + $0x140] sm:$0xff] %vm658_vm3, %v1376_v16  ;;  %1458 = vst.msk [vmem:[%s4436_s5 + $0x148] sm:$0xff] %vm658_vm3, %v1377_v18  ;;  %v1402_v43 = vadd.f32 %v3903_v30, %v4739_v13  ;;  %v1405_v10 = vadd.f32 %v3903_v30, %v3894_v29  ;;  %v4742_v29 = vld [vmem:[#allocation12_spill] sm:$0xff]  ;;  %v1407_v51 = vadd.f32 %v3903_v30, %v3907_v2 }
 0x2f2   :  { %1459 = vst.msk [vmem:[%s4436_s5 + $0x150] sm:$0xff] %vm658_vm3, %v1378_v36  ;;  %1460 = vst.msk [vmem:[%s4436_s5 + $0x158] sm:$0xff] %vm658_vm3, %v1379_v20  ;;  %v1406_v4 = vadd.f32 %v3903_v30, %v4742_v29  ;;  %v1408_v60 = vadd.f32 %v3903_v30, %v3911_v12  ;;  %v1409_v62 = vadd.f32 %v3903_v30, %v3915_v63  ;;  %v4743_v63 = vld [vmem:[#allocation13_spill] sm:$0xff] }
 0x2f3   :  { %1461 = vst.msk [vmem:[%s4436_s5 + $0x160] sm:$0xff] %vm658_vm3, %v1380_v50  ;;  %1462 = vst.msk [vmem:[%s4436_s5 + $0x168] sm:$0xff] %vm658_vm3, %v1381_v46  ;;  %v1410_v2 = vadd.f32 %v3903_v30, %v3919_v9  ;;  %v1411_v12 = vadd.f32 %v3903_v30, %v3923_v41  ;;  %v1412_v48 = vadd.f32 %v3903_v30, %v4743_v63  ;;  %v4744_v9 = vld [vmem:[#allocation14_spill] sm:$0xff] }
 0x2f4   :  { %1463 = vst.msk [vmem:[%s4436_s5 + $0x170] sm:$0xff] %vm658_vm3, %v1382_v6  ;;  %1464 = vst.msk [vmem:[%s4436_s5 + $0x178] sm:$0xff] %vm658_vm3, %v1383_v7  ;;  %v1413_v15 = vadd.f32 %v3903_v30, %v3931_v21  ;;  %v1414_v41 = vadd.f32 %v3903_v30, %v3935_v25  ;;  %v1415_v21 = vadd.f32 %v3903_v30, %v4744_v9 }
 0x2f5   :  { %1465 = vst.msk [vmem:[%s4436_s5 + $0x180] sm:$0xff] %vm658_vm3, %v1384_v53  ;;  %1466 = vst.msk [vmem:[%s4436_s5 + $0x188] sm:$0xff] %vm658_vm3, %v1385_v23  ;;  %v1416_v39 = vadd.f32 %v3903_v30, %v4745_v49 }
 0x2f6   :  { %1467 = vst.msk [vmem:[%s4436_s5 + $0x190] sm:$0xff] %vm658_vm3, %v1386_v24  ;;  %1468 = vst.msk [vmem:[%s4436_s5 + $0x198] sm:$0xff] %vm658_vm3, %v1387_v32 }
 0x2f7   :  { %1469 = vst.msk [vmem:[%s4436_s5 + $0x1a0] sm:$0xff] %vm658_vm3, %v1388_v26  ;;  %1470 = vst.msk [vmem:[%s4436_s5 + $0x1a8] sm:$0xff] %vm658_vm3, %v1389_v59 }
 0x2f8   :  { %1471 = vst.msk [vmem:[%s4436_s5 + $0x1b0] sm:$0xff] %vm658_vm3, %v1390_v27  ;;  %1472 = vst.msk [vmem:[%s4436_s5 + $0x1b8] sm:$0xff] %vm658_vm3, %v1391_v5 }
 0x2f9   :  { %1473 = vst.msk [vmem:[%s4436_s5 + $0x1c0] sm:$0xff] %vm658_vm3, %v1392_v44  ;;  %1474 = vst.msk [vmem:[%s4436_s5 + $0x1c8] sm:$0xff] %vm658_vm3, %v1393_v0 }
 0x2fa   :  { %1475 = vst.msk [vmem:[%s4436_s5 + $0x1d0] sm:$0xff] %vm658_vm3, %v1394_v61  ;;  %1476 = vst.msk [vmem:[%s4436_s5 + $0x1d8] sm:$0xff] %vm658_vm3, %v1395_v54 }
 0x2fb   :  { %1477 = vst.msk [vmem:[%s4436_s5 + $0x1e0] sm:$0xff] %vm658_vm3, %v1396_v56  ;;  %1478 = vst.msk [vmem:[%s4436_s5 + $0x1e8] sm:$0xff] %vm658_vm3, %v1397_v42 }
 0x2fc   :  { %1479 = vst.msk [vmem:[%s4436_s5 + $0x1f0] sm:$0xff] %vm658_vm3, %v1398_v31  ;;  %1480 = vst.msk [vmem:[%s4436_s5 + $0x1f8] sm:$0xff] %vm658_vm3, %v1399_v58 }
 0x2fd   :  { %1481 = vst.msk [vmem:[%s4436_s5 + $0x200] sm:$0xff] %vm658_vm3, %v1400_v22  ;;  %1482 = vst.msk [vmem:[%s4436_s5 + $0x208] sm:$0xff] %vm658_vm3, %v1401_v52 }
 0x2fe   :  { %1483 = vst.msk [vmem:[%s4436_s5 + $0x210] sm:$0xff] %vm658_vm3, %v1402_v43  ;;  %1484 = vst.msk [vmem:[%s4436_s5 + $0x218] sm:$0xff] %vm658_vm3, %v1403_v47 }
 0x2ff   :  { %1485 = vst.msk [vmem:[%s4436_s5 + $0x220] sm:$0xff] %vm658_vm3, %v1404_v38  ;;  %1486 = vst.msk [vmem:[%s4436_s5 + $0x228] sm:$0xff] %vm658_vm3, %v1405_v10 }
 0x300   :  { %1487 = vst.msk [vmem:[%s4436_s5 + $0x230] sm:$0xff] %vm658_vm3, %v1406_v4  ;;  %1488 = vst.msk [vmem:[%s4436_s5 + $0x238] sm:$0xff] %vm658_vm3, %v1407_v51 }
 0x301   :  { %1489 = vst.msk [vmem:[%s4436_s5 + $0x240] sm:$0xff] %vm658_vm3, %v1408_v60  ;;  %1490 = vst.msk [vmem:[%s4436_s5 + $0x248] sm:$0xff] %vm658_vm3, %v1409_v62 }
 0x302   :  { %1491 = vst.msk [vmem:[%s4436_s5 + $0x250] sm:$0xff] %vm658_vm3, %v1410_v2  ;;  %1492 = vst.msk [vmem:[%s4436_s5 + $0x258] sm:$0xff] %vm658_vm3, %v1411_v12 }
 0x303   :  { %1493 = vst.msk [vmem:[%s4436_s5 + $0x260] sm:$0xff] %vm658_vm3, %v1412_v48  ;;  %1494 = vst.msk [vmem:[%s4436_s5 + $0x268] sm:$0xff] %vm658_vm3, %v1413_v15 }
 0x304   :  { %1495 = vst.msk [vmem:[%s4436_s5 + $0x270] sm:$0xff] %vm658_vm3, %v1414_v41  ;;  %1496 = vst.msk [vmem:[%s4436_s5 + $0x278] sm:$0xff] %vm658_vm3, %v1415_v21 }
 0x305   :  { %1497 = vst.msk [vmem:[%s4436_s5 + $0x280] sm:$0xff] %vm658_vm3, %v1416_v39 }

// kernel: up_conv_block_forward.3
= control target key start
LH: loop header
LB: loop body
LE: loop exit
PB: predicated region body
PF: predicated region fallthrough
CT: control target
= control target key end

     0   :  { %s1333_s12 = smov 0   ;;  %s1880_s0 = inlined_call_operand.vmem [shape: f32[800,144], index: 0, kind: input, shape index: {}]   ;;  %s1881_s1 = inlined_call_operand.vmem [shape: bf16[144,16], index: 1, kind: input, shape index: {}]   ;;  %s1882_s2 = inlined_call_operand.vmem [shape: f32[1,16], index: 2, kind: input, shape index: {}]   ;;  %s1883_s3 = inlined_call_operand.vmem [shape: f32[800,16], index: 3, kind: output, shape index: {}]  }
   0x1 LB: > { %s1072_s13 = sadd.s32 4294967295, %s1310_s12   ;;  %p1076_p0 = scmp.ge.s32.totalorder %s1310_s12, 1  ;;  %s1310_s12 = sphi %s1333_s12, %s13_s12  }
   0x2   : > { %p139_p1 = scmp.lt.s32.totalorder %s1310_s12, 3 }
   0x4   : > { %p140_p2 = pnand %p1076_p0, %p139_p1 }
   0x5   : > { %v1195_v0 = vld [vmem:[%s1881_s1] sm:$0xff] (!%p140_p2)   ;;  %v1312_v1 = vmov (!%p140_p2), 0   ;;  %s164_s16 = smul.u32 (!%p140_p2), 50, %s1072_s13  ;;  %v1196_v2 = vld [vmem:[%s1881_s1 + $0x8] sm:$0xff] (!%p140_p2)   ;;  %v1197_v3 = vld [vmem:[%s1881_s1 + $0x10] sm:$0xff] (!%p140_p2)   ;;  %vm407_vm0 = vcmask (!%p140_p2), 130048  }
   0x6   : > { %143 = sbr.rel (%p140_p2) target bundleno = 371 (0x173), region = 32  ;;  %483 = vmatprep.subr.bf16.mxu0 (!%p140_p2), %v1312_v1  ;;  %1168 = vmatprep.subr.bf16.mxu1 (!%p140_p2), %v1312_v1  ;;  %v1198_v7 = vld [vmem:[%s1881_s1 + $0x18] sm:$0xff] (!%p140_p2)   ;;  %v1199_v11 = vld [vmem:[%s1881_s1 + $0x20] sm:$0xff] (!%p140_p2)   ;;  %v1200_v12 = vld [vmem:[%s1881_s1 + $0x28] sm:$0xff] (!%p140_p2)  }
   0x7   : > { %484 = vmatpush1.bf16.msra.mxu0 (!%p140_p2), %v1195_v0  ;;  %1177 = vmatpush1.bf16.msra.mxu1 (!%p140_p2), %v1195_v0  ;;  %p165_p3 = scmp.lt.s32.totalorder (!%p140_p2), %s164_s16, 99  ;;  %v1201_v13 = vld [vmem:[%s1881_s1 + $0x30] sm:$0xff] (!%p140_p2)   ;;  %v1202_v14 = vld [vmem:[%s1881_s1 + $0x38] sm:$0xff] (!%p140_p2)   ;;  %v1203_v15 = vld [vmem:[%s1881_s1 + $0x40] sm:$0xff] (!%p140_p2)  }
   0x8   : > { %485 = vmatprep.subr.bf16.mxu0 (!%p140_p2), %v1312_v1  ;;  %1169 = vmatprep.subr.bf16.mxu1 (!%p140_p2), %v1312_v1 }
   0xb   : > { %486 = vmatpush1.bf16.msra.mxu0 (!%p140_p2), %v1196_v2  ;;  %1178 = vmatpush1.bf16.msra.mxu1 (!%p140_p2), %v1196_v2 }
   0xc   : > { %487 = vmatprep.subr.bf16.mxu0 (!%p140_p2), %v1312_v1  ;;  %1170 = vmatprep.subr.bf16.mxu1 (!%p140_p2), %v1312_v1 }
   0xd   : > { %s1885_s16 = smov (!%p165_p3, %s164_s16), 99 }
   0xe   : > { %s1167_s21 = sshll.u32 %s1885_s16, 4  ;;  %s1079_s13 = sshll.u32 %s1885_s16, 3 }
   0xf   : > { %s1356_s24 = scalar_lea.vmem %s1880_s0, %s1167_s21  ;;  %488 = vmatpush1.bf16.msra.mxu0 %v1197_v3  ;;  %1179 = vmatpush1.bf16.msra.mxu1 %v1197_v3  ;;  %s1533_s17 = scalar_lea.vmem %s1883_s3, %s1079_s13 }
  0x10   : > { %v179_v4 = vld [vmem:[%s1356_s24 + $0x8] sm:$0xff]  ;;  %v181_v5 = vld [vmem:[%s1356_s24 + $0x18] sm:$0xff]  ;;  %489 = vmatprep.subr.bf16.mxu0 %v1312_v1  ;;  %1171 = vmatprep.subr.bf16.mxu1 %v1312_v1  ;;  %v178_v16 = vld [vmem:[%s1356_s24] sm:$0xff] }
  0x11   : > { %v231_v6 = vld [vmem:[%s1356_s24 + $0x1a8] sm:$0xff]  ;;  %v279_v8 = vpack.c.bf16 %v181_v5, %v179_v4  ;;  %v233_v9 = vld [vmem:[%s1356_s24 + $0x1b8] sm:$0xff]  ;;  %v180_v17 = vld [vmem:[%s1356_s24 + $0x10] sm:$0xff] }
  0x12   : > { %v305_v10 = vpack.c.bf16 %v233_v9, %v231_v6  ;;  %v230_v18 = vld [vmem:[%s1356_s24 + $0x1a0] sm:$0xff]  ;;  %v232_v19 = vld [vmem:[%s1356_s24 + $0x1b0] sm:$0xff]  ;;  %v183_v20 = vld [vmem:[%s1356_s24 + $0x28] sm:$0xff]  ;;  %v278_v24 = vpack.c.bf16 %v180_v17, %v178_v16 }
  0x13   : > { %1090 = vmatprep.mubr.msk.bf16.mxu0 %vm407_vm0, %v279_v8  ;;  %490 = vmatpush1.bf16.msra.mxu0 %v1198_v7  ;;  %v185_v21 = vld [vmem:[%s1356_s24 + $0x38] sm:$0xff]  ;;  %v235_v22 = vld [vmem:[%s1356_s24 + $0x1c8] sm:$0xff]  ;;  %v304_v25 = vpack.c.bf16 %v232_v19, %v230_v18  ;;  %v182_v28 = vld [vmem:[%s1356_s24 + $0x20] sm:$0xff] }
  0x14   : > { %1103 = vmatprep.mubr.msk.bf16.mxu1 %vm407_vm0, %v305_v10  ;;  %1180 = vmatpush1.bf16.msra.mxu1 %v1198_v7  ;;  %v237_v23 = vld [vmem:[%s1356_s24 + $0x1d8] sm:$0xff]  ;;  %v281_v26 = vpack.c.bf16 %v185_v21, %v183_v20  ;;  %v184_v29 = vld [vmem:[%s1356_s24 + $0x30] sm:$0xff]  ;;  %v234_v30 = vld [vmem:[%s1356_s24 + $0x1c0] sm:$0xff] }
  0x15   : > { %491 = vmatprep.subr.bf16.mxu0 %v1312_v1  ;;  %1172 = vmatprep.subr.bf16.mxu1 %v1312_v1  ;;  %v307_v27 = vpack.c.bf16 %v237_v23, %v235_v22  ;;  %v236_v31 = vld [vmem:[%s1356_s24 + $0x1d0] sm:$0xff]  ;;  %v187_v32 = vld [vmem:[%s1356_s24 + $0x48] sm:$0xff]  ;;  %v189_v33 = vld [vmem:[%s1356_s24 + $0x58] sm:$0xff]  ;;  %v280_v36 = vpack.c.bf16 %v184_v29, %v182_v28 }
  0x16   : > { %v239_v34 = vld [vmem:[%s1356_s24 + $0x1e8] sm:$0xff]  ;;  %v241_v35 = vld [vmem:[%s1356_s24 + $0x1f8] sm:$0xff]  ;;  %v306_v37 = vpack.c.bf16 %v236_v31, %v234_v30  ;;  %v283_v38 = vpack.c.bf16 %v189_v33, %v187_v32  ;;  %v186_v40 = vld [vmem:[%s1356_s24 + $0x40] sm:$0xff] }
  0x17   : > { %492 = vmatpush1.bf16.msra.mxu0 %v1199_v11  ;;  %v309_v39 = vpack.c.bf16 %v241_v35, %v239_v34  ;;  %v188_v41 = vld [vmem:[%s1356_s24 + $0x50] sm:$0xff]  ;;  %v238_v42 = vld [vmem:[%s1356_s24 + $0x1e0] sm:$0xff]  ;;  %v191_v44 = vld [vmem:[%s1356_s24 + $0x68] sm:$0xff] }
  0x18   : > { %1181 = vmatpush1.bf16.msra.mxu1 %v1199_v11  ;;  %493 = vmatprep.subr.bf16.mxu0 %v1312_v1  ;;  %v240_v43 = vld [vmem:[%s1356_s24 + $0x1f0] sm:$0xff]  ;;  %v193_v45 = vld [vmem:[%s1356_s24 + $0x78] sm:$0xff]  ;;  %v243_v46 = vld [vmem:[%s1356_s24 + $0x208] sm:$0xff]  ;;  %v282_v48 = vpack.c.bf16 %v188_v41, %v186_v40 }
  0x19   : > { %1173 = vmatprep.subr.bf16.mxu1 %v1312_v1  ;;  %v245_v47 = vld [vmem:[%s1356_s24 + $0x218] sm:$0xff]  ;;  %v308_v49 = vpack.c.bf16 %v240_v43, %v238_v42  ;;  %v285_v50 = vpack.c.bf16 %v193_v45, %v191_v44  ;;  %v190_v52 = vld [vmem:[%s1356_s24 + $0x60] sm:$0xff]  ;;  %v192_v53 = vld [vmem:[%s1356_s24 + $0x70] sm:$0xff] }
  0x1a   : > { %v311_v51 = vpack.c.bf16 %v245_v47, %v243_v46  ;;  %v242_v54 = vld [vmem:[%s1356_s24 + $0x200] sm:$0xff]  ;;  %v244_v55 = vld [vmem:[%s1356_s24 + $0x210] sm:$0xff]  ;;  %v195_v56 = vld [vmem:[%s1356_s24 + $0x88] sm:$0xff]  ;;  %v284_v60 = vpack.c.bf16 %v192_v53, %v190_v52 }
  0x1b   : > { %494 = vmatpush1.bf16.msra.mxu0 %v1200_v12  ;;  %v197_v57 = vld [vmem:[%s1356_s24 + $0x98] sm:$0xff]  ;;  %v247_v58 = vld [vmem:[%s1356_s24 + $0x228] sm:$0xff]  ;;  %v310_v61 = vpack.c.bf16 %v244_v55, %v242_v54  ;;  %v194_v0 = vld [vmem:[%s1356_s24 + $0x80] sm:$0xff] }
  0x1c   : > { %1182 = vmatpush1.bf16.msra.mxu1 %v1200_v12  ;;  %495 = vmatprep.subr.bf16.mxu0 %v1312_v1  ;;  %v249_v59 = vld [vmem:[%s1356_s24 + $0x238] sm:$0xff]  ;;  %v287_v62 = vpack.c.bf16 %v197_v57, %v195_v56  ;;  %v246_v2 = vld [vmem:[%s1356_s24 + $0x220] sm:$0xff]  ;;  %v248_v3 = vld [vmem:[%s1356_s24 + $0x230] sm:$0xff] }
  0x1d   : > { %1174 = vmatprep.subr.bf16.mxu1 %v1312_v1  ;;  %v313_v63 = vpack.c.bf16 %v249_v59, %v247_v58  ;;  %v199_v4 = vld [vmem:[%s1356_s24 + $0xa8] sm:$0xff]  ;;  %v201_v5 = vld [vmem:[%s1356_s24 + $0xb8] sm:$0xff]  ;;  %v312_v9 = vpack.c.bf16 %v248_v3, %v246_v2  ;;  %v198_v12 = vld [vmem:[%s1356_s24 + $0xa0] sm:$0xff] }
  0x1e   : > { %v251_v6 = vld [vmem:[%s1356_s24 + $0x248] sm:$0xff]  ;;  %v253_v7 = vld [vmem:[%s1356_s24 + $0x258] sm:$0xff]  ;;  %v289_v10 = vpack.c.bf16 %v201_v5, %v199_v4 }
  0x1f   : > { %496 = vmatpush1.bf16.msra.mxu0 %v1201_v13  ;;  %v315_v11 = vpack.c.bf16 %v253_v7, %v251_v6  ;;  %v203_v16 = vld [vmem:[%s1356_s24 + $0xc8] sm:$0xff]  ;;  %v205_v17 = vld [vmem:[%s1356_s24 + $0xd8] sm:$0xff] }
  0x20   : > { %1183 = vmatpush1.bf16.msra.mxu1 %v1201_v13  ;;  %497 = vmatprep.subr.bf16.mxu0 %v1312_v1  ;;  %v200_v13 = vld [vmem:[%s1356_s24 + $0xb0] sm:$0xff]  ;;  %v255_v18 = vld [vmem:[%s1356_s24 + $0x268] sm:$0xff]  ;;  %v257_v19 = vld [vmem:[%s1356_s24 + $0x278] sm:$0xff]  ;;  %v291_v22 = vpack.c.bf16 %v205_v17, %v203_v16 }
  0x21   : > { %1175 = vmatprep.subr.bf16.mxu1 %v1312_v1  ;;  %v288_v20 = vpack.c.bf16 %v200_v13, %v198_v12  ;;  %v317_v23 = vpack.c.bf16 %v257_v19, %v255_v18  ;;  %v207_v28 = vld [vmem:[%s1356_s24 + $0xe8] sm:$0xff]  ;;  %v209_v29 = vld [vmem:[%s1356_s24 + $0xf8] sm:$0xff] }
  0x22   : > { %v259_v30 = vld [vmem:[%s1356_s24 + $0x288] sm:$0xff]  ;;  %v261_v31 = vld [vmem:[%s1356_s24 + $0x298] sm:$0xff]  ;;  %v293_v34 = vpack.c.bf16 %v209_v29, %v207_v28  ;;  %v226_v29 = vld [vmem:[%s1356_s24 + $0x180] sm:$0xff] }
  0x23   : > { %498 = vmatpush1.bf16.msra.mxu0 %v1202_v14  ;;  %v319_v35 = vpack.c.bf16 %v261_v31, %v259_v30  ;;  %v211_v40 = vld [vmem:[%s1356_s24 + $0x108] sm:$0xff]  ;;  %v213_v41 = vld [vmem:[%s1356_s24 + $0x118] sm:$0xff]  ;;  %v228_v30 = vld [vmem:[%s1356_s24 + $0x190] sm:$0xff] }
  0x24   : > { %1184 = vmatpush1.bf16.msra.mxu1 %v1202_v14  ;;  %499 = vmatprep.subr.bf16.mxu0 %v1312_v1  ;;  %v250_v14 = vld [vmem:[%s1356_s24 + $0x240] sm:$0xff]  ;;  %v263_v42 = vld [vmem:[%s1356_s24 + $0x2a8] sm:$0xff]  ;;  %v265_v43 = vld [vmem:[%s1356_s24 + $0x2b8] sm:$0xff]  ;;  %v295_v46 = vpack.c.bf16 %v213_v41, %v211_v40  ;;  %v302_v31 = vpack.c.bf16 %v228_v30, %v226_v29 }
  0x25   : > { %1176 = vmatprep.subr.bf16.mxu1 %v1312_v1  ;;  %v196_v1 = vld [vmem:[%s1356_s24 + $0x90] sm:$0xff]  ;;  %v321_v47 = vpack.c.bf16 %v265_v43, %v263_v42  ;;  %v215_v52 = vld [vmem:[%s1356_s24 + $0x128] sm:$0xff]  ;;  %v217_v53 = vld [vmem:[%s1356_s24 + $0x138] sm:$0xff] }
  0x26   : > { %v286_v8 = vpack.c.bf16 %v196_v1, %v194_v0  ;;  %v267_v54 = vld [vmem:[%s1356_s24 + $0x2c8] sm:$0xff]  ;;  %v269_v55 = vld [vmem:[%s1356_s24 + $0x2d8] sm:$0xff]  ;;  %v297_v58 = vpack.c.bf16 %v217_v53, %v215_v52 }
  0x27   : > { %500 = vmatpush1.bf16.msra.mxu0 %v1203_v15  ;;  %v323_v59 = vpack.c.bf16 %v269_v55, %v267_v54  ;;  %v219_v0 = vld [vmem:[%s1356_s24 + $0x148] sm:$0xff]  ;;  %v221_v1 = vld [vmem:[%s1356_s24 + $0x158] sm:$0xff] }
  0x28   : > { %1185 = vmatpush1.bf16.msra.mxu1 %v1203_v15  ;;  %v252_v15 = vld [vmem:[%s1356_s24 + $0x250] sm:$0xff]  ;;  %v271_v2 = vld [vmem:[%s1356_s24 + $0x2e8] sm:$0xff]  ;;  %v273_v3 = vld [vmem:[%s1356_s24 + $0x2f8] sm:$0xff]  ;;  %v299_v6 = vpack.c.bf16 %v221_v1, %v219_v0 }
  0x29   : > { %v314_v21 = vpack.c.bf16 %v252_v15, %v250_v14  ;;  %v325_v7 = vpack.c.bf16 %v273_v3, %v271_v2  ;;  %v223_v12 = vld [vmem:[%s1356_s24 + $0x168] sm:$0xff]  ;;  %v225_v13 = vld [vmem:[%s1356_s24 + $0x178] sm:$0xff] }
  0x2a   : > { %516 = vmatmul.mubr.bf16.vlgmr.msra.gmra.mrb[0].mxu0 %v278_v24  ;;  %v202_v24 = vld [vmem:[%s1356_s24 + $0xc0] sm:$0xff]  ;;  %v275_v14 = vld [vmem:[%s1356_s24 + $0x308] sm:$0xff]  ;;  %v277_v15 = vld [vmem:[%s1356_s24 + $0x318] sm:$0xff]  ;;  %v301_v18 = vpack.c.bf16 %v225_v13, %v223_v12 }
  0x2b   : > { %620 = vmatmul.mubr.bf16.vlgmr.msra.gmra.mrb[0].mxu1 %v304_v25  ;;  %1091 = vmatprep.mubr.msk.bf16.mxu0 %vm407_vm0, %v281_v26  ;;  %v204_v25 = vld [vmem:[%s1356_s24 + $0xd0] sm:$0xff]  ;;  %v254_v26 = vld [vmem:[%s1356_s24 + $0x260] sm:$0xff]  ;;  %v327_v19 = vpack.c.bf16 %v277_v15, %v275_v14 }
  0x2c   : > { %1104 = vmatprep.mubr.msk.bf16.mxu1 %vm407_vm0, %v307_v27  ;;  %v256_v27 = vld [vmem:[%s1356_s24 + $0x270] sm:$0xff]  ;;  %v290_v32 = vpack.c.bf16 %v204_v25, %v202_v24  ;;  %v227_v24 = vld [vmem:[%s1356_s24 + $0x188] sm:$0xff]  ;;  %v229_v25 = vld [vmem:[%s1356_s24 + $0x198] sm:$0xff] }
  0x2d   : > { %v316_v33 = vpack.c.bf16 %v256_v27, %v254_v26  ;;  %v303_v28 = vpack.c.bf16 %v229_v25, %v227_v24 }
  0x32   : > { %524 = vmatmul.mubr.bf16.gmra.mrb[4].mxu0 %v280_v36  ;;  %v206_v36 = vld [vmem:[%s1356_s24 + $0xe0] sm:$0xff] }
  0x33   : > { %628 = vmatmul.mubr.bf16.gmra.mrb[4].mxu1 %v306_v37  ;;  %1092 = vmatprep.mubr.msk.bf16.mxu0 %vm407_vm0, %v283_v38  ;;  %v208_v37 = vld [vmem:[%s1356_s24 + $0xf0] sm:$0xff]  ;;  %v258_v38 = vld [vmem:[%s1356_s24 + $0x280] sm:$0xff] }
  0x34   : > { %1105 = vmatprep.mubr.msk.bf16.mxu1 %vm407_vm0, %v309_v39  ;;  %v260_v39 = vld [vmem:[%s1356_s24 + $0x290] sm:$0xff]  ;;  %v292_v44 = vpack.c.bf16 %v208_v37, %v206_v36 }
  0x35   : > { %v318_v45 = vpack.c.bf16 %v260_v39, %v258_v38 }
  0x3a   : > { %532 = vmatmul.mubr.bf16.gmra.mrb[8].mxu0 %v282_v48  ;;  %v210_v48 = vld [vmem:[%s1356_s24 + $0x100] sm:$0xff] }
  0x3b   : > { %636 = vmatmul.mubr.bf16.gmra.mrb[8].mxu1 %v308_v49  ;;  %1093 = vmatprep.mubr.msk.bf16.mxu0 %vm407_vm0, %v285_v50  ;;  %v212_v49 = vld [vmem:[%s1356_s24 + $0x110] sm:$0xff]  ;;  %v262_v50 = vld [vmem:[%s1356_s24 + $0x2a0] sm:$0xff] }
  0x3c   : > { %1106 = vmatprep.mubr.msk.bf16.mxu1 %vm407_vm0, %v311_v51  ;;  %v264_v51 = vld [vmem:[%s1356_s24 + $0x2b0] sm:$0xff]  ;;  %v294_v56 = vpack.c.bf16 %v212_v49, %v210_v48 }
  0x3d   : > { %v320_v57 = vpack.c.bf16 %v264_v51, %v262_v50 }
  0x42   : > { %540 = vmatmul.mubr.bf16.gmra.mrb[12].mxu0 %v284_v60  ;;  %v214_v60 = vld [vmem:[%s1356_s24 + $0x120] sm:$0xff] }
  0x43   : > { %644 = vmatmul.mubr.bf16.gmra.mrb[12].mxu1 %v310_v61  ;;  %1094 = vmatprep.mubr.msk.bf16.mxu0 %vm407_vm0, %v287_v62  ;;  %v216_v61 = vld [vmem:[%s1356_s24 + $0x130] sm:$0xff]  ;;  %v266_v62 = vld [vmem:[%s1356_s24 + $0x2c0] sm:$0xff] }
  0x44   : > { %1107 = vmatprep.mubr.msk.bf16.mxu1 %vm407_vm0, %v313_v63  ;;  %v268_v63 = vld [vmem:[%s1356_s24 + $0x2d0] sm:$0xff]  ;;  %v296_v4 = vpack.c.bf16 %v216_v61, %v214_v60 }
  0x45   : > { %v322_v5 = vpack.c.bf16 %v268_v63, %v266_v62 }
  0x4a   : > { %548 = vmatmul.mubr.bf16.gmra.mrb[16].mxu0 %v286_v8  ;;  %v218_v8 = vld [vmem:[%s1356_s24 + $0x140] sm:$0xff] }
  0x4b   : > { %652 = vmatmul.mubr.bf16.gmra.mrb[16].mxu1 %v312_v9  ;;  %1095 = vmatprep.mubr.msk.bf16.mxu0 %vm407_vm0, %v289_v10  ;;  %v220_v9 = vld [vmem:[%s1356_s24 + $0x150] sm:$0xff]  ;;  %v270_v10 = vld [vmem:[%s1356_s24 + $0x2e0] sm:$0xff] }
  0x4c   : > { %1108 = vmatprep.mubr.msk.bf16.mxu1 %vm407_vm0, %v315_v11  ;;  %v272_v11 = vld [vmem:[%s1356_s24 + $0x2f0] sm:$0xff]  ;;  %v298_v16 = vpack.c.bf16 %v220_v9, %v218_v8 }
  0x4d   : > { %v324_v17 = vpack.c.bf16 %v272_v11, %v270_v10 }
  0x52   : > { %556 = vmatmul.mubr.bf16.gmra.mrb[20].mxu0 %v288_v20  ;;  %v222_v20 = vld [vmem:[%s1356_s24 + $0x160] sm:$0xff] }
  0x53   : > { %660 = vmatmul.mubr.bf16.gmra.mrb[20].mxu1 %v314_v21  ;;  %1096 = vmatprep.mubr.msk.bf16.mxu0 %vm407_vm0, %v291_v22  ;;  %v224_v21 = vld [vmem:[%s1356_s24 + $0x170] sm:$0xff]  ;;  %v274_v22 = vld [vmem:[%s1356_s24 + $0x300] sm:$0xff] }
  0x54   : > { %1109 = vmatprep.mubr.msk.bf16.mxu1 %vm407_vm0, %v317_v23  ;;  %v276_v23 = vld [vmem:[%s1356_s24 + $0x310] sm:$0xff]  ;;  %v300_v26 = vpack.c.bf16 %v224_v21, %v222_v20 }
  0x55   : > { %v326_v27 = vpack.c.bf16 %v276_v23, %v274_v22 }
  0x5a   : > { %564 = vmatmul.mubr.bf16.gmra.mrb[24].mxu0 %v290_v32  ;;  %v1504_v32 = vld [vmem:[%s1882_s2] ss:$0 sm:$0xff] }
  0x5b   : > { %668 = vmatmul.mubr.bf16.gmra.mrb[24].mxu1 %v316_v33  ;;  %1097 = vmatprep.mubr.msk.bf16.mxu0 %vm407_vm0, %v293_v34 }
  0x5c   : > { %1110 = vmatprep.mubr.msk.bf16.mxu1 %vm407_vm0, %v319_v35 }
  0x62   : > { %572 = vmatmul.mubr.bf16.gmra.mrb[28].mxu0 %v292_v44 }
  0x63   : > { %676 = vmatmul.mubr.bf16.gmra.mrb[28].mxu1 %v318_v45  ;;  %1098 = vmatprep.mubr.msk.bf16.mxu0 %vm407_vm0, %v295_v46 }
  0x64   : > { %1111 = vmatprep.mubr.msk.bf16.mxu1 %vm407_vm0, %v321_v47 }
  0x6a   : > { %580 = vmatmul.mubr.bf16.gmra.mrb[32].mxu0 %v294_v56 }
  0x6b   : > { %684 = vmatmul.mubr.bf16.gmra.mrb[32].mxu1 %v320_v57  ;;  %1099 = vmatprep.mubr.msk.bf16.mxu0 %vm407_vm0, %v297_v58 }
  0x6c   : > { %1112 = vmatprep.mubr.msk.bf16.mxu1 %vm407_vm0, %v323_v59 }
  0x72   : > { %588 = vmatmul.mubr.bf16.gmra.mrb[36].mxu0 %v296_v4 }
  0x73   : > { %692 = vmatmul.mubr.bf16.gmra.mrb[36].mxu1 %v322_v5  ;;  %1100 = vmatprep.mubr.msk.bf16.mxu0 %vm407_vm0, %v299_v6 }
  0x74   : > { %1113 = vmatprep.mubr.msk.bf16.mxu1 %vm407_vm0, %v325_v7 }
  0x7a   : > { %596 = vmatmul.mubr.bf16.gmra.mrb[40].mxu0 %v298_v16 }
  0x7b   : > { %700 = vmatmul.mubr.bf16.gmra.mrb[40].mxu1 %v324_v17  ;;  %1101 = vmatprep.mubr.msk.bf16.mxu0 %vm407_vm0, %v301_v18 }
  0x7c   : > { %1114 = vmatprep.mubr.msk.bf16.mxu1 %vm407_vm0, %v327_v19 }
  0x82   : > { %604 = vmatmul.mubr.bf16.gmra.mrb[44].mxu0 %v300_v26 }
  0x83   : > { %708 = vmatmul.mubr.bf16.gmra.mrb[44].mxu1 %v326_v27  ;;  %1102 = vmatprep.mubr.msk.bf16.mxu0 %vm407_vm0, %v303_v28 }
  0x8a   : > { %612 = vmatmul.mubr.bf16.gmra.mrb[48].mxu0 %v302_v31 }
  0xfd   : > { %v517_v33 = vpop.f32.mrb[0].mxu0 }
  0xfe   : > { %v621_v34 = vpop.f32.mrb[0].mxu1  ;;  %v518_v35 = vadd.f32 %v1504_v32, %v517_v33  ;;  %v519_v37 = vpop.f32.mrb[1].mxu0 }
  0xff   : > { %v622_v36 = vadd.f32 %v1504_v32, %v621_v34  ;;  %v623_v38 = vpop.f32.mrb[1].mxu1  ;;  %v520_v39 = vpop.f32.mrb[2].mxu0 }
 0x100   : > { %v624_v40 = vpop.f32.mrb[2].mxu1  ;;  %v766_v41 = vmul.f32 1.442695, %v518_v35  ;;  %v521_v43 = vadd.f32 %v1504_v32, %v520_v39  ;;  %v522_v45 = vpop.f32.mrb[3].mxu0  ;;  %vm716_vm1 = vcmp.gt.f32.partialorder %v518_v35, 0.0 }
 0x101   : > { %v818_v42 = vmul.f32 1.442695, %v622_v36  ;;  %v1510_v44 = vadd.f32 %v1504_v32, %v624_v40  ;;  %v626_v46 = vpop.f32.mrb[3].mxu1  ;;  %vm742_vm2 = vcmp.gt.f32.partialorder %v622_v36, 0.0 }
 0x102   : > { %1204 = vpow2.f32 %v766_v41  ;;  %v768_v47 = vmul.f32 1.442695, %v521_v43  ;;  %vm717_vm3 = vcmp.gt.f32.partialorder %v521_v43, 0.0 }
 0x103   : > { %1206 = vpow2.f32 %v818_v42  ;;  %v820_v48 = vmul.f32 1.442695, %v1510_v44  ;;  %vm743_vm4 = vcmp.gt.f32.partialorder %v1510_v44, 0.0 }
 0x104   : > { %1208 = vpow2.f32 %v768_v47 }
 0x105   : > { %v525_v49 = vpop.f32.mrb[4].mxu0  ;;  %1210 = vpow2.f32 %v820_v48 }
 0x106   : > { %v629_v50 = vpop.f32.mrb[4].mxu1  ;;  %v1514_v51 = vadd.f32 %v1504_v32, %v525_v49  ;;  %v527_v53 = vpop.f32.mrb[5].mxu0 }
 0x107   : > { %v1517_v52 = vadd.f32 %v1504_v32, %v629_v50  ;;  %v631_v54 = vpop.f32.mrb[5].mxu1  ;;  %v528_v55 = vpop.f32.mrb[6].mxu0 }
 0x108   : > { %v632_v56 = vpop.f32.mrb[6].mxu1  ;;  %v770_v57 = vmul.f32 1.442695, %v1514_v51  ;;  %v1522_v59 = vadd.f32 %v1504_v32, %v528_v55  ;;  %v530_v61 = vpop.f32.mrb[7].mxu0  ;;  %vm718_vm5 = vcmp.gt.f32.partialorder %v1514_v51, 0.0 }
 0x109   : > { %v822_v58 = vmul.f32 1.442695, %v1517_v52  ;;  %v1525_v60 = vadd.f32 %v1504_v32, %v632_v56  ;;  %v634_v62 = vpop.f32.mrb[7].mxu1  ;;  %vm744_vm6 = vcmp.gt.f32.partialorder %v1517_v52, 0.0 }
 0x10a   : > { %1212 = vpow2.f32 %v770_v57  ;;  %v772_v63 = vmul.f32 1.442695, %v1522_v59  ;;  %vm719_vm7 = vcmp.gt.f32.partialorder %v1522_v59, 0.0 }
 0x10b   : > { %1214 = vpow2.f32 %v822_v58  ;;  %v824_v1 = vmul.f32 1.442695, %v1525_v60  ;;  %vm745_vm8 = vcmp.gt.f32.partialorder %v1525_v60, 0.0 }
 0x10c   : > { %v1205_v0 = vpop.eup %1204  ;;  %1216 = vpow2.f32 %v772_v63 }
 0x10d   : > { %v1207_v2 = vpop.eup %1206  ;;  %v1115_v3 = vadd.f32 -1.0, %v1205_v0  ;;  %v533_v4 = vpop.f32.mrb[8].mxu0  ;;  %1218 = vpow2.f32 %v824_v1 }
 0x10e   : > { %v637_v5 = vpop.f32.mrb[8].mxu1  ;;  %v1141_v6 = vadd.f32 -1.0, %v1207_v2  ;;  %v1536_v7 = vadd.f32 %v1504_v32, %v533_v4  ;;  %v535_v9 = vpop.f32.mrb[9].mxu0 }
 0x10f   : > { %v1539_v8 = vadd.f32 %v1504_v32, %v637_v5  ;;  %v639_v10 = vpop.f32.mrb[9].mxu1  ;;  %v1209_v11 = vpop.eup %1208  ;;  %v916_v12 = vsel %vm716_vm1, %v518_v35, %v1115_v3 }
 0x110   : > { %v536_v13 = vpop.f32.mrb[10].mxu0  ;;  %v640_v14 = vpop.f32.mrb[10].mxu1  ;;  %966 = vst.msk [vmem:[%s1533_s17] sm:$0xff] %vm407_vm0, %v916_v12  ;;  %v942_v16 = vsel %vm742_vm2, %v622_v36, %v1141_v6  ;;  %v1116_v17 = vadd.f32 -1.0, %v1209_v11  ;;  %v774_v18 = vmul.f32 1.442695, %v1536_v7 }
 0x111   : > { %v1211_v15 = vpop.eup %1210  ;;  %v538_v19 = vpop.f32.mrb[11].mxu0  ;;  %992 = vst.msk [vmem:[%s1533_s17 + $0xd0] sm:$0xff] %vm407_vm0, %v942_v16  ;;  %v826_v22 = vmul.f32 1.442695, %v1539_v8  ;;  %v1548_v23 = vadd.f32 %v1504_v32, %v536_v13  ;;  %v1552_v25 = vadd.f32 %v1504_v32, %v640_v14  ;;  %vm720_vm9 = vcmp.gt.f32.partialorder %v1536_v7, 0.0 }
 0x112   : > { %v642_v20 = vpop.f32.mrb[11].mxu1  ;;  %v1142_v21 = vadd.f32 -1.0, %v1211_v15  ;;  %v917_v24 = vsel %vm717_vm3, %v521_v43, %v1116_v17  ;;  %1220 = vpow2.f32 %v774_v18  ;;  %vm746_vm10 = vcmp.gt.f32.partialorder %v1539_v8, 0.0 }
 0x113   : > { %967 = vst.msk [vmem:[%s1533_s17 + $0x8] sm:$0xff] %vm407_vm0, %v917_v24  ;;  %1222 = vpow2.f32 %v826_v22  ;;  %v776_v27 = vmul.f32 1.442695, %v1548_v23  ;;  %v828_v29 = vmul.f32 1.442695, %v1552_v25  ;;  %vm721_vm11 = vcmp.gt.f32.partialorder %v1548_v23, 0.0 }
 0x114   : > { %v943_v26 = vsel %vm743_vm4, %v1510_v44, %v1142_v21  ;;  %v1213_v28 = vpop.eup %1212  ;;  %vm747_vm12 = vcmp.gt.f32.partialorder %v1552_v25, 0.0 }
 0x115   : > { %993 = vst.msk [vmem:[%s1533_s17 + $0xd8] sm:$0xff] %vm407_vm0, %v943_v26  ;;  %v1215_v30 = vpop.eup %1214  ;;  %v1117_v31 = vadd.f32 -1.0, %v1213_v28  ;;  %1224 = vpow2.f32 %v776_v27  ;;  %v541_v33 = vpop.f32.mrb[12].mxu0 }
 0x116   : > { %v645_v34 = vpop.f32.mrb[12].mxu1  ;;  %v1143_v35 = vadd.f32 -1.0, %v1215_v30  ;;  %1226 = vpow2.f32 %v828_v29  ;;  %v1563_v36 = vadd.f32 %v1504_v32, %v541_v33  ;;  %v543_v38 = vpop.f32.mrb[13].mxu0 }
 0x117   : > { %v1566_v37 = vadd.f32 %v1504_v32, %v645_v34  ;;  %v647_v39 = vpop.f32.mrb[13].mxu1  ;;  %v1217_v40 = vpop.eup %1216  ;;  %v918_v41 = vsel %vm718_vm5, %v1514_v51, %v1117_v31 }
 0x118   : > { %v544_v42 = vpop.f32.mrb[14].mxu0  ;;  %v648_v43 = vpop.f32.mrb[14].mxu1  ;;  %968 = vst.msk [vmem:[%s1533_s17 + $0x10] sm:$0xff] %vm407_vm0, %v918_v41  ;;  %v944_v45 = vsel %vm744_vm6, %v1517_v52, %v1143_v35  ;;  %v1118_v46 = vadd.f32 -1.0, %v1217_v40  ;;  %v778_v47 = vmul.f32 1.442695, %v1563_v36 }
 0x119   : > { %v1219_v44 = vpop.eup %1218  ;;  %v546_v48 = vpop.f32.mrb[15].mxu0  ;;  %994 = vst.msk [vmem:[%s1533_s17 + $0xe0] sm:$0xff] %vm407_vm0, %v944_v45  ;;  %v830_v51 = vmul.f32 1.442695, %v1566_v37  ;;  %v1579_v53 = vadd.f32 %v1504_v32, %v544_v42  ;;  %v1584_v52 = vadd.f32 %v1504_v32, %v648_v43  ;;  %vm722_vm13 = vcmp.gt.f32.partialorder %v1563_v36, 0.0 }
 0x11a   : > { %v650_v49 = vpop.f32.mrb[15].mxu1  ;;  %v1144_v50 = vadd.f32 -1.0, %v1219_v44  ;;  %v919_v54 = vsel %vm719_vm7, %v1522_v59, %v1118_v46  ;;  %1228 = vpow2.f32 %v778_v47  ;;  %vm748_vm14 = vcmp.gt.f32.partialorder %v1566_v37, 0.0 }
 0x11b   : > { %969 = vst.msk [vmem:[%s1533_s17 + $0x18] sm:$0xff] %vm407_vm0, %v919_v54  ;;  %1230 = vpow2.f32 %v830_v51  ;;  %v780_v56 = vmul.f32 1.442695, %v1579_v53  ;;  %v832_v58 = vmul.f32 1.442695, %v1584_v52  ;;  %vm723_vm15 = vcmp.gt.f32.partialorder %v1579_v53, 0.0 }
 0x11c   : > { %v945_v55 = vsel %vm745_vm8, %v1525_v60, %v1144_v50  ;;  %v1221_v57 = vpop.eup %1220  ;;  %vm749_vm1 = vcmp.gt.f32.partialorder %v1584_v52, 0.0 }
 0x11d   : > { %995 = vst.msk [vmem:[%s1533_s17 + $0xe8] sm:$0xff] %vm407_vm0, %v945_v55  ;;  %v1223_v61 = vpop.eup %1222  ;;  %v1119_v59 = vadd.f32 -1.0, %v1221_v57  ;;  %1232 = vpow2.f32 %v780_v56  ;;  %v549_v62 = vpop.f32.mrb[16].mxu0 }
 0x11e   : > { %v653_v63 = vpop.f32.mrb[16].mxu1  ;;  %v1145_v0 = vadd.f32 -1.0, %v1223_v61  ;;  %1234 = vpow2.f32 %v832_v58  ;;  %v1595_v60 = vadd.f32 %v1504_v32, %v549_v62  ;;  %v551_v2 = vpop.f32.mrb[17].mxu0 }
 0x11f   : > { %v1598_v1 = vadd.f32 %v1504_v32, %v653_v63  ;;  %v655_v3 = vpop.f32.mrb[17].mxu1  ;;  %v1225_v4 = vpop.eup %1224  ;;  %v920_v5 = vsel %vm720_vm9, %v1536_v7, %v1119_v59 }
 0x120   : > { %v552_v6 = vpop.f32.mrb[18].mxu0  ;;  %v656_v9 = vpop.f32.mrb[18].mxu1  ;;  %970 = vst.msk [vmem:[%s1533_s17 + $0x20] sm:$0xff] %vm407_vm0, %v920_v5  ;;  %v946_v11 = vsel %vm746_vm10, %v1539_v8, %v1145_v0  ;;  %v1120_v12 = vadd.f32 -1.0, %v1225_v4  ;;  %v782_v13 = vmul.f32 1.442695, %v1595_v60 }
 0x121   : > { %v1227_v10 = vpop.eup %1226  ;;  %v554_v14 = vpop.f32.mrb[19].mxu0  ;;  %996 = vst.msk [vmem:[%s1533_s17 + $0xf0] sm:$0xff] %vm407_vm0, %v946_v11  ;;  %v834_v16 = vmul.f32 1.442695, %v1598_v1  ;;  %v1611_v17 = vadd.f32 %v1504_v32, %v552_v6  ;;  %v1616_v8 = vadd.f32 %v1504_v32, %v656_v9  ;;  %vm724_vm2 = vcmp.gt.f32.partialorder %v1595_v60, 0.0 }
 0x122   : > { %v658_v15 = vpop.f32.mrb[19].mxu1  ;;  %v1146_v7 = vadd.f32 -1.0, %v1227_v10  ;;  %v921_v18 = vsel %vm721_vm11, %v1548_v23, %v1120_v12  ;;  %1236 = vpow2.f32 %v782_v13  ;;  %vm750_vm3 = vcmp.gt.f32.partialorder %v1598_v1, 0.0 }
 0x123   : > { %971 = vst.msk [vmem:[%s1533_s17 + $0x28] sm:$0xff] %vm407_vm0, %v921_v18  ;;  %1238 = vpow2.f32 %v834_v16  ;;  %v784_v20 = vmul.f32 1.442695, %v1611_v17  ;;  %v836_v22 = vmul.f32 1.442695, %v1616_v8  ;;  %vm725_vm4 = vcmp.gt.f32.partialorder %v1611_v17, 0.0 }
 0x124   : > { %v947_v19 = vsel %vm747_vm12, %v1552_v25, %v1146_v7  ;;  %v1229_v21 = vpop.eup %1228  ;;  %vm751_vm5 = vcmp.gt.f32.partialorder %v1616_v8, 0.0 }
 0x125   : > { %997 = vst.msk [vmem:[%s1533_s17 + $0xf8] sm:$0xff] %vm407_vm0, %v947_v19  ;;  %v1231_v24 = vpop.eup %1230  ;;  %v1121_v23 = vadd.f32 -1.0, %v1229_v21  ;;  %1240 = vpow2.f32 %v784_v20  ;;  %v557_v26 = vpop.f32.mrb[20].mxu0 }
 0x126   : > { %v661_v27 = vpop.f32.mrb[20].mxu1  ;;  %v1147_v28 = vadd.f32 -1.0, %v1231_v24  ;;  %1242 = vpow2.f32 %v836_v22  ;;  %v1627_v25 = vadd.f32 %v1504_v32, %v557_v26  ;;  %v559_v30 = vpop.f32.mrb[21].mxu0 }
 0x127   : > { %v1630_v29 = vadd.f32 %v1504_v32, %v661_v27  ;;  %v663_v31 = vpop.f32.mrb[21].mxu1  ;;  %v1233_v33 = vpop.eup %1232  ;;  %v922_v34 = vsel %vm722_vm13, %v1563_v36, %v1121_v23 }
 0x128   : > { %v560_v35 = vpop.f32.mrb[22].mxu0  ;;  %v664_v38 = vpop.f32.mrb[22].mxu1  ;;  %972 = vst.msk [vmem:[%s1533_s17 + $0x30] sm:$0xff] %vm407_vm0, %v922_v34  ;;  %v948_v40 = vsel %vm748_vm14, %v1566_v37, %v1147_v28  ;;  %v1122_v41 = vadd.f32 -1.0, %v1233_v33  ;;  %v786_v42 = vmul.f32 1.442695, %v1627_v25 }
 0x129   : > { %v1235_v39 = vpop.eup %1234  ;;  %v562_v43 = vpop.f32.mrb[23].mxu0  ;;  %998 = vst.msk [vmem:[%s1533_s17 + $0x100] sm:$0xff] %vm407_vm0, %v948_v40  ;;  %v838_v45 = vmul.f32 1.442695, %v1630_v29  ;;  %v1643_v46 = vadd.f32 %v1504_v32, %v560_v35  ;;  %v1648_v37 = vadd.f32 %v1504_v32, %v664_v38  ;;  %vm726_vm6 = vcmp.gt.f32.partialorder %v1627_v25, 0.0 }
 0x12a   : > { %v666_v44 = vpop.f32.mrb[23].mxu1  ;;  %v1148_v36 = vadd.f32 -1.0, %v1235_v39  ;;  %v923_v47 = vsel %vm723_vm15, %v1579_v53, %v1122_v41  ;;  %1244 = vpow2.f32 %v786_v42  ;;  %vm752_vm7 = vcmp.gt.f32.partialorder %v1630_v29, 0.0 }
 0x12b   : > { %973 = vst.msk [vmem:[%s1533_s17 + $0x38] sm:$0xff] %vm407_vm0, %v923_v47  ;;  %1246 = vpow2.f32 %v838_v45  ;;  %v788_v49 = vmul.f32 1.442695, %v1643_v46  ;;  %v840_v51 = vmul.f32 1.442695, %v1648_v37  ;;  %vm727_vm8 = vcmp.gt.f32.partialorder %v1643_v46, 0.0 }
 0x12c   : > { %v949_v48 = vsel %vm749_vm1, %v1584_v52, %v1148_v36  ;;  %v1237_v50 = vpop.eup %1236  ;;  %vm753_vm9 = vcmp.gt.f32.partialorder %v1648_v37, 0.0 }
 0x12d   : > { %999 = vst.msk [vmem:[%s1533_s17 + $0x108] sm:$0xff] %vm407_vm0, %v949_v48  ;;  %v1239_v54 = vpop.eup %1238  ;;  %v1123_v53 = vadd.f32 -1.0, %v1237_v50  ;;  %1248 = vpow2.f32 %v788_v49  ;;  %v565_v55 = vpop.f32.mrb[24].mxu0 }
 0x12e   : > { %v669_v56 = vpop.f32.mrb[24].mxu1  ;;  %v1149_v57 = vadd.f32 -1.0, %v1239_v54  ;;  %1250 = vpow2.f32 %v840_v51  ;;  %v1659_v52 = vadd.f32 %v1504_v32, %v565_v55  ;;  %v567_v61 = vpop.f32.mrb[25].mxu0 }
 0x12f   : > { %v1662_v58 = vadd.f32 %v1504_v32, %v669_v56  ;;  %v671_v59 = vpop.f32.mrb[25].mxu1  ;;  %v1241_v62 = vpop.eup %1240  ;;  %v924_v63 = vsel %vm724_vm2, %v1595_v60, %v1123_v53 }
 0x130   : > { %v568_v0 = vpop.f32.mrb[26].mxu0  ;;  %v672_v2 = vpop.f32.mrb[26].mxu1  ;;  %974 = vst.msk [vmem:[%s1533_s17 + $0x40] sm:$0xff] %vm407_vm0, %v924_v63  ;;  %v950_v4 = vsel %vm750_vm3, %v1598_v1, %v1149_v57  ;;  %v1124_v5 = vadd.f32 -1.0, %v1241_v62  ;;  %v790_v6 = vmul.f32 1.442695, %v1659_v52 }
 0x131   : > { %v1243_v3 = vpop.eup %1242  ;;  %v570_v9 = vpop.f32.mrb[27].mxu0  ;;  %1000 = vst.msk [vmem:[%s1533_s17 + $0x110] sm:$0xff] %vm407_vm0, %v950_v4  ;;  %v842_v11 = vmul.f32 1.442695, %v1662_v58  ;;  %v1675_v12 = vadd.f32 %v1504_v32, %v568_v0  ;;  %v1680_v1 = vadd.f32 %v1504_v32, %v672_v2  ;;  %vm728_vm10 = vcmp.gt.f32.partialorder %v1659_v52, 0.0 }
 0x132   : > { %v674_v10 = vpop.f32.mrb[27].mxu1  ;;  %v1150_v60 = vadd.f32 -1.0, %v1243_v3  ;;  %v925_v13 = vsel %vm725_vm4, %v1611_v17, %v1124_v5  ;;  %1252 = vpow2.f32 %v790_v6  ;;  %vm754_vm11 = vcmp.gt.f32.partialorder %v1662_v58, 0.0 }
 0x133   : > { %975 = vst.msk [vmem:[%s1533_s17 + $0x48] sm:$0xff] %vm407_vm0, %v925_v13  ;;  %1254 = vpow2.f32 %v842_v11  ;;  %v792_v15 = vmul.f32 1.442695, %v1675_v12  ;;  %v844_v16 = vmul.f32 1.442695, %v1680_v1  ;;  %vm729_vm12 = vcmp.gt.f32.partialorder %v1675_v12, 0.0 }
 0x134   : > { %v951_v14 = vsel %vm751_vm5, %v1616_v8, %v1150_v60  ;;  %v1245_v7 = vpop.eup %1244  ;;  %vm755_vm13 = vcmp.gt.f32.partialorder %v1680_v1, 0.0 }
 0x135   : > { %1001 = vst.msk [vmem:[%s1533_s17 + $0x118] sm:$0xff] %vm407_vm0, %v951_v14  ;;  %v1247_v18 = vpop.eup %1246  ;;  %v1125_v17 = vadd.f32 -1.0, %v1245_v7  ;;  %1256 = vpow2.f32 %v792_v15  ;;  %v573_v19 = vpop.f32.mrb[28].mxu0 }
 0x136   : > { %v677_v20 = vpop.f32.mrb[28].mxu1  ;;  %v1151_v21 = vadd.f32 -1.0, %v1247_v18  ;;  %1258 = vpow2.f32 %v844_v16  ;;  %v1691_v8 = vadd.f32 %v1504_v32, %v573_v19  ;;  %v575_v24 = vpop.f32.mrb[29].mxu0 }
 0x137   : > { %v1694_v22 = vadd.f32 %v1504_v32, %v677_v20  ;;  %v679_v23 = vpop.f32.mrb[29].mxu1  ;;  %v1249_v26 = vpop.eup %1248  ;;  %v926_v27 = vsel %vm726_vm6, %v1627_v25, %v1125_v17 }
 0x138   : > { %v576_v28 = vpop.f32.mrb[30].mxu0  ;;  %v680_v30 = vpop.f32.mrb[30].mxu1  ;;  %976 = vst.msk [vmem:[%s1533_s17 + $0x50] sm:$0xff] %vm407_vm0, %v926_v27  ;;  %v952_v33 = vsel %vm752_vm7, %v1630_v29, %v1151_v21  ;;  %v1126_v34 = vadd.f32 -1.0, %v1249_v26  ;;  %v794_v35 = vmul.f32 1.442695, %v1691_v8 }
 0x139   : > { %v1251_v31 = vpop.eup %1250  ;;  %v578_v38 = vpop.f32.mrb[31].mxu0  ;;  %1002 = vst.msk [vmem:[%s1533_s17 + $0x120] sm:$0xff] %vm407_vm0, %v952_v33  ;;  %v846_v40 = vmul.f32 1.442695, %v1694_v22  ;;  %v1707_v41 = vadd.f32 %v1504_v32, %v576_v28  ;;  %v1712_v29 = vadd.f32 %v1504_v32, %v680_v30  ;;  %vm730_vm14 = vcmp.gt.f32.partialorder %v1691_v8, 0.0 }
 0x13a   : > { %v682_v39 = vpop.f32.mrb[31].mxu1  ;;  %v1152_v25 = vadd.f32 -1.0, %v1251_v31  ;;  %v927_v42 = vsel %vm727_vm8, %v1643_v46, %v1126_v34  ;;  %1260 = vpow2.f32 %v794_v35  ;;  %vm756_vm15 = vcmp.gt.f32.partialorder %v1694_v22, 0.0 }
 0x13b   : > { %977 = vst.msk [vmem:[%s1533_s17 + $0x58] sm:$0xff] %vm407_vm0, %v927_v42  ;;  %1262 = vpow2.f32 %v846_v40  ;;  %v796_v44 = vmul.f32 1.442695, %v1707_v41  ;;  %v848_v45 = vmul.f32 1.442695, %v1712_v29  ;;  %vm731_vm1 = vcmp.gt.f32.partialorder %v1707_v41, 0.0 }
 0x13c   : > { %v953_v43 = vsel %vm753_vm9, %v1648_v37, %v1152_v25  ;;  %v1253_v36 = vpop.eup %1252  ;;  %vm757_vm2 = vcmp.gt.f32.partialorder %v1712_v29, 0.0 }
 0x13d   : > { %1003 = vst.msk [vmem:[%s1533_s17 + $0x128] sm:$0xff] %vm407_vm0, %v953_v43  ;;  %v1255_v47 = vpop.eup %1254  ;;  %v1127_v46 = vadd.f32 -1.0, %v1253_v36  ;;  %1264 = vpow2.f32 %v796_v44  ;;  %v581_v48 = vpop.f32.mrb[32].mxu0 }
 0x13e   : > { %v685_v49 = vpop.f32.mrb[32].mxu1  ;;  %v1153_v50 = vadd.f32 -1.0, %v1255_v47  ;;  %1266 = vpow2.f32 %v848_v45  ;;  %v1723_v37 = vadd.f32 %v1504_v32, %v581_v48  ;;  %v583_v54 = vpop.f32.mrb[33].mxu0 }
 0x13f   : > { %v1726_v51 = vadd.f32 %v1504_v32, %v685_v49  ;;  %v687_v53 = vpop.f32.mrb[33].mxu1  ;;  %v1257_v55 = vpop.eup %1256  ;;  %v928_v56 = vsel %vm728_vm10, %v1659_v52, %v1127_v46 }
 0x140   : > { %v584_v57 = vpop.f32.mrb[34].mxu0  ;;  %v688_v61 = vpop.f32.mrb[34].mxu1  ;;  %978 = vst.msk [vmem:[%s1533_s17 + $0x60] sm:$0xff] %vm407_vm0, %v928_v56  ;;  %v954_v62 = vsel %vm754_vm11, %v1662_v58, %v1153_v50  ;;  %v1128_v63 = vadd.f32 -1.0, %v1257_v55  ;;  %v798_v0 = vmul.f32 1.442695, %v1723_v37 }
 0x141   : > { %v1259_v59 = vpop.eup %1258  ;;  %v586_v2 = vpop.f32.mrb[35].mxu0  ;;  %1004 = vst.msk [vmem:[%s1533_s17 + $0x130] sm:$0xff] %vm407_vm0, %v954_v62  ;;  %v850_v4 = vmul.f32 1.442695, %v1726_v51  ;;  %v1739_v5 = vadd.f32 %v1504_v32, %v584_v57  ;;  %v1744_v58 = vadd.f32 %v1504_v32, %v688_v61  ;;  %vm732_vm3 = vcmp.gt.f32.partialorder %v1723_v37, 0.0 }
 0x142   : > { %v690_v3 = vpop.f32.mrb[35].mxu1  ;;  %v1154_v52 = vadd.f32 -1.0, %v1259_v59  ;;  %v929_v6 = vsel %vm729_vm12, %v1675_v12, %v1128_v63  ;;  %1268 = vpow2.f32 %v798_v0  ;;  %vm758_vm4 = vcmp.gt.f32.partialorder %v1726_v51, 0.0 }
 0x143   : > { %979 = vst.msk [vmem:[%s1533_s17 + $0x68] sm:$0xff] %vm407_vm0, %v929_v6  ;;  %1270 = vpow2.f32 %v850_v4  ;;  %v800_v10 = vmul.f32 1.442695, %v1739_v5  ;;  %v852_v11 = vmul.f32 1.442695, %v1744_v58  ;;  %vm733_vm5 = vcmp.gt.f32.partialorder %v1739_v5, 0.0 }
 0x144   : > { %v955_v9 = vsel %vm755_vm13, %v1680_v1, %v1154_v52  ;;  %v1261_v60 = vpop.eup %1260  ;;  %vm759_vm6 = vcmp.gt.f32.partialorder %v1744_v58, 0.0 }
 0x145   : > { %1005 = vst.msk [vmem:[%s1533_s17 + $0x138] sm:$0xff] %vm407_vm0, %v955_v9  ;;  %v1263_v13 = vpop.eup %1262  ;;  %v1129_v12 = vadd.f32 -1.0, %v1261_v60  ;;  %1272 = vpow2.f32 %v800_v10  ;;  %v589_v14 = vpop.f32.mrb[36].mxu0 }
 0x146   : > { %v693_v15 = vpop.f32.mrb[36].mxu1  ;;  %v1155_v7 = vadd.f32 -1.0, %v1263_v13  ;;  %1274 = vpow2.f32 %v852_v11  ;;  %v1755_v1 = vadd.f32 %v1504_v32, %v589_v14  ;;  %v591_v18 = vpop.f32.mrb[37].mxu0 }
 0x147   : > { %v1758_v16 = vadd.f32 %v1504_v32, %v693_v15  ;;  %v695_v17 = vpop.f32.mrb[37].mxu1  ;;  %v1265_v19 = vpop.eup %1264  ;;  %v930_v20 = vsel %vm730_vm14, %v1691_v8, %v1129_v12 }
 0x148   : > { %v592_v21 = vpop.f32.mrb[38].mxu0  ;;  %v696_v24 = vpop.f32.mrb[38].mxu1  ;;  %980 = vst.msk [vmem:[%s1533_s17 + $0x70] sm:$0xff] %vm407_vm0, %v930_v20  ;;  %v956_v26 = vsel %vm756_vm15, %v1694_v22, %v1155_v7  ;;  %v1130_v27 = vadd.f32 -1.0, %v1265_v19  ;;  %v802_v28 = vmul.f32 1.442695, %v1755_v1 }
 0x149   : > { %v1267_v23 = vpop.eup %1266  ;;  %v594_v30 = vpop.f32.mrb[39].mxu0  ;;  %1006 = vst.msk [vmem:[%s1533_s17 + $0x140] sm:$0xff] %vm407_vm0, %v956_v26  ;;  %v854_v33 = vmul.f32 1.442695, %v1758_v16  ;;  %v1771_v34 = vadd.f32 %v1504_v32, %v592_v21  ;;  %v1776_v22 = vadd.f32 %v1504_v32, %v696_v24  ;;  %vm734_vm7 = vcmp.gt.f32.partialorder %v1755_v1, 0.0 }
 0x14a   : > { %v698_v31 = vpop.f32.mrb[39].mxu1  ;;  %v1156_v8 = vadd.f32 -1.0, %v1267_v23  ;;  %v931_v35 = vsel %vm731_vm1, %v1707_v41, %v1130_v27  ;;  %1276 = vpow2.f32 %v802_v28  ;;  %vm760_vm8 = vcmp.gt.f32.partialorder %v1758_v16, 0.0 }
 0x14b   : > { %981 = vst.msk [vmem:[%s1533_s17 + $0x78] sm:$0xff] %vm407_vm0, %v931_v35  ;;  %1278 = vpow2.f32 %v854_v33  ;;  %v804_v39 = vmul.f32 1.442695, %v1771_v34  ;;  %v856_v40 = vmul.f32 1.442695, %v1776_v22  ;;  %vm735_vm9 = vcmp.gt.f32.partialorder %v1771_v34, 0.0 }
 0x14c   : > { %v957_v38 = vsel %vm757_vm2, %v1712_v29, %v1156_v8  ;;  %v1269_v25 = vpop.eup %1268  ;;  %vm761_vm10 = vcmp.gt.f32.partialorder %v1776_v22, 0.0 }
 0x14d   : > { %1007 = vst.msk [vmem:[%s1533_s17 + $0x148] sm:$0xff] %vm407_vm0, %v957_v38  ;;  %v1271_v42 = vpop.eup %1270  ;;  %v1131_v41 = vadd.f32 -1.0, %v1269_v25  ;;  %1280 = vpow2.f32 %v804_v39  ;;  %v597_v43 = vpop.f32.mrb[40].mxu0 }
 0x14e   : > { %v701_v44 = vpop.f32.mrb[40].mxu1  ;;  %v1157_v36 = vadd.f32 -1.0, %v1271_v42  ;;  %1282 = vpow2.f32 %v856_v40  ;;  %v1787_v29 = vadd.f32 %v1504_v32, %v597_v43  ;;  %v599_v47 = vpop.f32.mrb[41].mxu0 }
 0x14f   : > { %v1790_v45 = vadd.f32 %v1504_v32, %v701_v44  ;;  %v703_v46 = vpop.f32.mrb[41].mxu1  ;;  %v1273_v48 = vpop.eup %1272  ;;  %v932_v49 = vsel %vm732_vm3, %v1723_v37, %v1131_v41 }
 0x150   : > { %v600_v50 = vpop.f32.mrb[42].mxu0  ;;  %v704_v54 = vpop.f32.mrb[42].mxu1  ;;  %982 = vst.msk [vmem:[%s1533_s17 + $0x80] sm:$0xff] %vm407_vm0, %v932_v49  ;;  %v958_v55 = vsel %vm758_vm4, %v1726_v51, %v1157_v36  ;;  %v1132_v56 = vadd.f32 -1.0, %v1273_v48  ;;  %v806_v57 = vmul.f32 1.442695, %v1787_v29 }
 0x151   : > { %v1275_v53 = vpop.eup %1274  ;;  %v602_v61 = vpop.f32.mrb[43].mxu0  ;;  %1008 = vst.msk [vmem:[%s1533_s17 + $0x150] sm:$0xff] %vm407_vm0, %v958_v55  ;;  %v858_v62 = vmul.f32 1.442695, %v1790_v45  ;;  %v1803_v63 = vadd.f32 %v1504_v32, %v600_v50  ;;  %v1808_v51 = vadd.f32 %v1504_v32, %v704_v54  ;;  %vm736_vm11 = vcmp.gt.f32.partialorder %v1787_v29, 0.0 }
 0x152   : > { %v706_v59 = vpop.f32.mrb[43].mxu1  ;;  %v1158_v37 = vadd.f32 -1.0, %v1275_v53  ;;  %v933_v0 = vsel %vm733_vm5, %v1739_v5, %v1132_v56  ;;  %1284 = vpow2.f32 %v806_v57  ;;  %vm762_vm12 = vcmp.gt.f32.partialorder %v1790_v45, 0.0 }
 0x153   : > { %983 = vst.msk [vmem:[%s1533_s17 + $0x88] sm:$0xff] %vm407_vm0, %v933_v0  ;;  %1286 = vpow2.f32 %v858_v62  ;;  %v808_v3 = vmul.f32 1.442695, %v1803_v63  ;;  %v860_v4 = vmul.f32 1.442695, %v1808_v51  ;;  %vm737_vm13 = vcmp.gt.f32.partialorder %v1803_v63, 0.0 }
 0x154   : > { %v959_v2 = vsel %vm759_vm6, %v1744_v58, %v1158_v37  ;;  %v1277_v52 = vpop.eup %1276  ;;  %vm763_vm14 = vcmp.gt.f32.partialorder %v1808_v51, 0.0 }
 0x155   : > { %1009 = vst.msk [vmem:[%s1533_s17 + $0x158] sm:$0xff] %vm407_vm0, %v959_v2  ;;  %v1279_v6 = vpop.eup %1278  ;;  %v1133_v5 = vadd.f32 -1.0, %v1277_v52  ;;  %1288 = vpow2.f32 %v808_v3  ;;  %v605_v9 = vpop.f32.mrb[44].mxu0 }
 0x156   : > { %v709_v10 = vpop.f32.mrb[44].mxu1  ;;  %v1159_v60 = vadd.f32 -1.0, %v1279_v6  ;;  %1290 = vpow2.f32 %v860_v4  ;;  %v1819_v58 = vadd.f32 %v1504_v32, %v605_v9  ;;  %v607_v13 = vpop.f32.mrb[45].mxu0 }
 0x157   : > { %v1822_v11 = vadd.f32 %v1504_v32, %v709_v10  ;;  %v711_v12 = vpop.f32.mrb[45].mxu1  ;;  %v1281_v14 = vpop.eup %1280  ;;  %v934_v15 = vsel %vm734_vm7, %v1755_v1, %v1133_v5 }
 0x158   : > { %v608_v7 = vpop.f32.mrb[46].mxu0  ;;  %v712_v18 = vpop.f32.mrb[46].mxu1  ;;  %984 = vst.msk [vmem:[%s1533_s17 + $0x90] sm:$0xff] %vm407_vm0, %v934_v15  ;;  %v960_v19 = vsel %vm760_vm8, %v1758_v16, %v1159_v60  ;;  %v1134_v20 = vadd.f32 -1.0, %v1281_v14  ;;  %v810_v21 = vmul.f32 1.442695, %v1819_v58 }
 0x159   : > { %v1283_v17 = vpop.eup %1282  ;;  %v610_v24 = vpop.f32.mrb[47].mxu0  ;;  %1010 = vst.msk [vmem:[%s1533_s17 + $0x160] sm:$0xff] %vm407_vm0, %v960_v19  ;;  %v862_v26 = vmul.f32 1.442695, %v1822_v11  ;;  %v609_v27 = vadd.f32 %v1504_v32, %v608_v7  ;;  %v713_v16 = vadd.f32 %v1504_v32, %v712_v18  ;;  %vm738_vm15 = vcmp.gt.f32.partialorder %v1819_v58, 0.0 }
 0x15a   : > { %v714_v23 = vpop.f32.mrb[47].mxu1  ;;  %v1160_v1 = vadd.f32 -1.0, %v1283_v17  ;;  %v935_v28 = vsel %vm735_vm9, %v1771_v34, %v1134_v20  ;;  %1292 = vpow2.f32 %v810_v21  ;;  %vm764_vm1 = vcmp.gt.f32.partialorder %v1822_v11, 0.0 }
 0x15b   : > { %985 = vst.msk [vmem:[%s1533_s17 + $0x98] sm:$0xff] %vm407_vm0, %v935_v28  ;;  %1294 = vpow2.f32 %v862_v26  ;;  %v812_v31 = vmul.f32 1.442695, %v609_v27  ;;  %v864_v33 = vmul.f32 1.442695, %v713_v16  ;;  %vm739_vm2 = vcmp.gt.f32.partialorder %v609_v27, 0.0 }
 0x15c   : > { %v961_v30 = vsel %vm761_vm10, %v1776_v22, %v1160_v1  ;;  %v1285_v8 = vpop.eup %1284  ;;  %vm765_vm3 = vcmp.gt.f32.partialorder %v713_v16, 0.0 }
 0x15d   : > { %1011 = vst.msk [vmem:[%s1533_s17 + $0x168] sm:$0xff] %vm407_vm0, %v961_v30  ;;  %v1287_v35 = vpop.eup %1286  ;;  %v1135_v38 = vadd.f32 -1.0, %v1285_v8  ;;  %1296 = vpow2.f32 %v812_v31  ;;  %v613_v34 = vpop.f32.mrb[48].mxu0 }
 0x15e   : > { %v1161_v39 = vadd.f32 -1.0, %v1287_v35  ;;  %1298 = vpow2.f32 %v864_v33  ;;  %v614_v25 = vadd.f32 %v1504_v32, %v613_v34  ;;  %v615_v40 = vpop.f32.mrb[49].mxu0 }
 0x15f   : > { %v1289_v22 = vpop.eup %1288  ;;  %v936_v42 = vsel %vm736_vm11, %v1787_v29, %v1135_v38  ;;  %v616_v41 = vpop.f32.mrb[50].mxu0 }
 0x160   : > { %v1291_v43 = vpop.eup %1290  ;;  %986 = vst.msk [vmem:[%s1533_s17 + $0xa0] sm:$0xff] %vm407_vm0, %v936_v42  ;;  %v962_v44 = vsel %vm762_vm12, %v1790_v45, %v1161_v39  ;;  %v1136_v36 = vadd.f32 -1.0, %v1289_v22  ;;  %v814_v47 = vmul.f32 1.442695, %v614_v25  ;;  %v618_v46 = vpop.f32.mrb[51].mxu0  ;;  %v617_v29 = vadd.f32 %v1504_v32, %v616_v41 }
 0x161   : > { %1012 = vst.msk [vmem:[%s1533_s17 + $0x170] sm:$0xff] %vm407_vm0, %v962_v44  ;;  %v1162_v48 = vadd.f32 -1.0, %v1291_v43  ;;  %vm740_vm4 = vcmp.gt.f32.partialorder %v614_v25, 0.0 }
 0x162   : > { %v937_v49 = vsel %vm737_vm13, %v1803_v63, %v1136_v36  ;;  %1300 = vpow2.f32 %v814_v47  ;;  %v816_v50 = vmul.f32 1.442695, %v617_v29  ;;  %vm741_vm5 = vcmp.gt.f32.partialorder %v617_v29, 0.0 }
 0x163   : > { %987 = vst.msk [vmem:[%s1533_s17 + $0xa8] sm:$0xff] %vm407_vm0, %v937_v49  ;;  %v963_v45 = vsel %vm763_vm14, %v1808_v51, %v1162_v48 }
 0x164   : > { %v1293_v54 = vpop.eup %1292  ;;  %1013 = vst.msk [vmem:[%s1533_s17 + $0x178] sm:$0xff] %vm407_vm0, %v963_v45  ;;  %1302 = vpow2.f32 %v816_v50 }
 0x165   : > { %v1295_v53 = vpop.eup %1294  ;;  %v1137_v55 = vadd.f32 -1.0, %v1293_v54 }
 0x166   : > { %v1163_v32 = vadd.f32 -1.0, %v1295_v53 }
 0x167   : > { %v1297_v56 = vpop.eup %1296  ;;  %v938_v57 = vsel %vm738_vm15, %v1819_v58, %v1137_v55 }
 0x168   : > { %v1299_v61 = vpop.eup %1298  ;;  %988 = vst.msk [vmem:[%s1533_s17 + $0xb0] sm:$0xff] %vm407_vm0, %v938_v57  ;;  %v964_v59 = vsel %vm764_vm1, %v1822_v11, %v1163_v32  ;;  %v1138_v37 = vadd.f32 -1.0, %v1297_v56 }
 0x169   : > { %1014 = vst.msk [vmem:[%s1533_s17 + $0x180] sm:$0xff] %vm407_vm0, %v964_v59  ;;  %v1164_v62 = vadd.f32 -1.0, %v1299_v61 }
 0x16a   : > { %v939_v63 = vsel %vm739_vm2, %v609_v27, %v1138_v37 }
 0x16b   : > { %989 = vst.msk [vmem:[%s1533_s17 + $0xb8] sm:$0xff] %vm407_vm0, %v939_v63  ;;  %v965_v0 = vsel %vm765_vm3, %v713_v16, %v1164_v62 }
 0x16c   : > { %v1301_v51 = vpop.eup %1300  ;;  %1015 = vst.msk [vmem:[%s1533_s17 + $0x188] sm:$0xff] %vm407_vm0, %v965_v0 }
 0x16d   : > { %v1139_v2 = vadd.f32 -1.0, %v1301_v51 }
 0x16e   : > { %v1303_v3 = vpop.eup %1302 }
 0x16f   : > { %v940_v52 = vsel %vm740_vm4, %v614_v25, %v1139_v2  ;;  %v1140_v4 = vadd.f32 -1.0, %v1303_v3 }
 0x170   : > { %990 = vst.msk [vmem:[%s1533_s17 + $0xc0] sm:$0xff] %vm407_vm0, %v940_v52 }
 0x171   : > { %v941_v6 = vsel %vm741_vm5, %v617_v29, %v1140_v4 }
 0x172   : > { %991 = vst.msk [vmem:[%s1533_s17 + $0xc8] sm:$0xff] %vm407_vm0, %v941_v6 }
 0x173 PF: > { %s13_s12 = sadd.s32 1, %s1310_s12  }
 0x174   : > { %p10_p4 = scmp.ge.s32.totalorder %s13_s12, 4  }
 0x176   :  { %12 = sbr.rel (!%p10_p4) target bundleno = 1 (0x1), region = 62 }

</bundles_post_ra>
